<compile_context>
chip_gen: v5e
topology: v5e:2x2
jax: 0.10.0
libtpu: 0.0.40
codegen_flags: <defaults>
</compile_context>

<pallas_src>
import jax
import jax.numpy as jnp
from jax.experimental import pallas as pl
from jax.experimental.pallas import tpu as pltpu

INPUT_DIM = 481
# (in, out) for each of the 8 Linear layers, in forward order.
LAYER_DIMS = [
    (INPUT_DIM, 128), (128, 64), (64, 12), (12, 2),       # encoder
    (2, 12), (12, 64), (64, 128), (128, INPUT_DIM),       # decoder
]
N_LAYERS = len(LAYER_DIMS)
BOTTLENECK_IDX = 3                   # Linear(12, 2): no activation afterwards
BF16_LAYERS = (0, 1, 6, 7)           # the four "big" layers run in bf16


def _round_up(n, m):
    return ((n + m - 1) // m) * m


def autoencoder_kernel(x_ref, *refs):
    """All 8 matmuls + activations fused in one kernel invocation.

    refs = (w0, b0, w1, b1, ..., w7, b7, out_ref)

    Weights of the big layers are bf16 (the lhs is cast to the weight dtype),
    every matmul accumulates in f32, and each f32 bias is added exactly once
    per layer.  The final tanh is computed in f32 and stored as bf16.
    """
    param_refs = refs[:-1]
    out_ref = refs[-1]

    h = x_ref[...].astype(jnp.bfloat16)            # (bt, 481)
    for li in range(N_LAYERS):
        w = param_refs[2 * li][...]
        b = param_refs[2 * li + 1][...]            # (1, out) f32 -> broadcasts once
        h = jnp.dot(h.astype(w.dtype), w,
                    preferred_element_type=jnp.float32) + b
        if li == N_LAYERS - 1:
            h = jnp.tanh(h)                        # final Tanh of the decoder
        elif li == BOTTLENECK_IDX:
            pass                                   # Linear(12, 2): no activation
        else:
            h = jnp.maximum(h, 0.0)                # ReLU
    out_ref[...] = h.astype(out_ref.dtype)         # bf16 store (half the HBM write)


def make_params(key, dtype=jnp.float32):
    """Deterministic PyTorch-style init: U(-1/sqrt(fan_in), 1/sqrt(fan_in))."""
    params = []
    for (fan_in, fan_out) in LAYER_DIMS:
        key, kw, kb = jax.random.split(key, 3)
        bound = 1.0 / (fan_in ** 0.5)
        w = jax.random.uniform(kw, (fan_in, fan_out), dtype, -bound, bound)
        b = jax.random.uniform(kb, (1, fan_out), dtype, -bound, bound)
        params.append((w, b))
    return params


def _prepare_params(params):
    """Big layers -> bf16 weights; tiny bottleneck layers stay f32; f32 biases."""
    prepped = []
    for li, (w, b) in enumerate(params):
        w_dtype = jnp.bfloat16 if li in BF16_LAYERS else jnp.float32
        prepped.append((w.astype(w_dtype),
                        b.reshape(1, -1).astype(jnp.float32)))
    return prepped


def autoencoder_forward(x, params, *, batch_tile=1024):
    """Returns the reconstruction in bf16, shape (B, 481). No pad/slice passes."""
    B, D = x.shape
    assert D == INPUT_DIM
    assert batch_tile % 16 == 0, "bf16 sublane packing wants a multiple of 16"

    # Clamp the tile so the grid keeps >= 2 balanced steps (both TCs busy on
    # v7x) while staying a multiple of 16.  Pallas clips the boundary block if
    # the tile does not divide B, so no batch padding is needed.
    bt = max(16, min(batch_tile, _round_up((B + 1) // 2, 16)))
    grid = (pl.cdiv(B, bt),)

    prepped = _prepare_params(params)
    flat_params = []
    in_specs = [pl.BlockSpec((bt, INPUT_DIM), lambda i: (i, 0))]
    for (w, b) in prepped:
        flat_params += [w, b]
        # Whole-array blocks with a constant block index: each parameter is
        # DMA'd once and the same VMEM copy is reused for every batch tile.
        in_specs.append(pl.BlockSpec(w.shape, lambda i: (0, 0)))
        in_specs.append(pl.BlockSpec(b.shape, lambda i: (0, 0)))

    out_spec = pl.BlockSpec((bt, INPUT_DIM), lambda i: (i, 0))

    # Scoped-VMEM estimate: double-buffered in/out tiles + params + f32
    # intermediates, with margin.  Floor 32 MiB (fine on every generation,
    # above v5e's 16 MiB default), cap well under v7x's 64 MiB physical VMEM.
    itemsize = jnp.dtype(x.dtype).itemsize
    vmem_est = 4 * bt * INPUT_DIM * (itemsize + 2) + (6 << 20)
    vmem_limit = int(min(56 << 20, max(32 << 20, vmem_est)))

    out = pl.pallas_call(
        autoencoder_kernel,
        out_shape=jax.ShapeDtypeStruct((B, INPUT_DIM), jnp.bfloat16),
        grid_spec=pltpu.PrefetchScalarGridSpec(
            num_scalar_prefetch=0,
            grid=grid,
            in_specs=in_specs,
            out_specs=out_spec,
        ),
        compiler_params=pltpu.CompilerParams(
            dimension_semantics=("parallel",),      # shard batch tiles across TCs
            vmem_limit_bytes=vmem_limit),
    )(x, *flat_params)

    return out                                      # bf16, (B, 481)


def autoencoder_ref(x, params):
    """Pure-JAX reference matching the kernel's mixed precision
    (bf16 inputs/weights on the big layers, f32 accumulation, f32 output)."""
    h = x.astype(jnp.float32)
    for li, (w, b) in enumerate(params):
        if li in BF16_LAYERS:
            lhs = h.astype(jnp.bfloat16)
            wm = w.astype(jnp.bfloat16)
        else:
            lhs = h
            wm = w.astype(jnp.float32)
        h = jnp.dot(lhs, wm, preferred_element_type=jnp.float32) \
            + b.reshape(1, -1).astype(jnp.float32)
        if li == N_LAYERS - 1:
            h = jnp.tanh(h)
        elif li == BOTTLENECK_IDX:
            pass
        else:
            h = jnp.maximum(h, 0.0)
    return h


if __name__ == "__main__":
    key = jax.random.PRNGKey(0)
    key, kx = jax.random.split(key)

    B = 512                       # tile auto-clamps to 256 -> 2 grid steps (both TCs on v7x)
    x = jax.random.normal(kx, (B, INPUT_DIM), jnp.float32)
    params = make_params(key)

    out = autoencoder_forward(x, params)
    out = jax.block_until_ready(out)

    ref = autoencoder_ref(x, params)
    assert out.shape == (B, INPUT_DIM)
    assert out.dtype == jnp.bfloat16
    max_err = float(jnp.max(jnp.abs(out.astype(jnp.float32) - ref)))
    # tanh output is in [-1, 1]; bf16 store adds <= ~4e-3 abs error on top of
    # tiny accumulation-order differences, so 1e-2 is a comfortable bound.
    assert max_err < 1e-2, max_err

    print("KERNEL_OK")
</pallas_src>

<mosaic_0001>
module attributes {stable_mosaic.version = 11 : i64} {
  func.func @autoencoder_kernel(%arg0: i32, %arg1: memref<256x481xf32, #tpu.memory_space<vmem>>, %arg2: memref<481x128xbf16, #tpu.memory_space<vmem>>, %arg3: memref<1x128xf32, #tpu.memory_space<vmem>>, %arg4: memref<128x64xbf16, #tpu.memory_space<vmem>>, %arg5: memref<1x64xf32, #tpu.memory_space<vmem>>, %arg6: memref<64x12xf32, #tpu.memory_space<vmem>>, %arg7: memref<1x12xf32, #tpu.memory_space<vmem>>, %arg8: memref<12x2xf32, #tpu.memory_space<vmem>>, %arg9: memref<1x2xf32, #tpu.memory_space<vmem>>, %arg10: memref<2x12xf32, #tpu.memory_space<vmem>>, %arg11: memref<1x12xf32, #tpu.memory_space<vmem>>, %arg12: memref<12x64xf32, #tpu.memory_space<vmem>>, %arg13: memref<1x64xf32, #tpu.memory_space<vmem>>, %arg14: memref<64x128xbf16, #tpu.memory_space<vmem>>, %arg15: memref<1x128xf32, #tpu.memory_space<vmem>>, %arg16: memref<128x481xbf16, #tpu.memory_space<vmem>>, %arg17: memref<1x481xf32, #tpu.memory_space<vmem>>, %arg18: memref<256x481xbf16, #tpu.memory_space<vmem>>) attributes {dimension_semantics = [#tpu.dimension_semantics<parallel>], iteration_bounds = array<i64: 2>, scalar_prefetch = 0 : i64, scratch_operands = 0 : i64, tpu.core_type = #tpu.core_type<tc>, window_params = [{transform_indices = @transform_0, window_bounds = array<i64: 256, 481>}, {pipeline_mode = #tpu.pipeline_mode<synchronous>, transform_indices = @transform_1, window_bounds = array<i64: 481, 128>}, {pipeline_mode = #tpu.pipeline_mode<synchronous>, transform_indices = @transform_2, window_bounds = array<i64: 1, 128>}, {pipeline_mode = #tpu.pipeline_mode<synchronous>, transform_indices = @transform_3, window_bounds = array<i64: 128, 64>}, {pipeline_mode = #tpu.pipeline_mode<synchronous>, transform_indices = @transform_4, window_bounds = array<i64: 1, 64>}, {pipeline_mode = #tpu.pipeline_mode<synchronous>, transform_indices = @transform_5, window_bounds = array<i64: 64, 12>}, {pipeline_mode = #tpu.pipeline_mode<synchronous>, transform_indices = @transform_6, window_bounds = array<i64: 1, 12>}, {pipeline_mode = #tpu.pipeline_mode<synchronous>, transform_indices = @transform_7, window_bounds = array<i64: 12, 2>}, {pipeline_mode = #tpu.pipeline_mode<synchronous>, transform_indices = @transform_8, window_bounds = array<i64: 1, 2>}, {pipeline_mode = #tpu.pipeline_mode<synchronous>, transform_indices = @transform_9, window_bounds = array<i64: 2, 12>}, {pipeline_mode = #tpu.pipeline_mode<synchronous>, transform_indices = @transform_10, window_bounds = array<i64: 1, 12>}, {pipeline_mode = #tpu.pipeline_mode<synchronous>, transform_indices = @transform_11, window_bounds = array<i64: 12, 64>}, {pipeline_mode = #tpu.pipeline_mode<synchronous>, transform_indices = @transform_12, window_bounds = array<i64: 1, 64>}, {pipeline_mode = #tpu.pipeline_mode<synchronous>, transform_indices = @transform_13, window_bounds = array<i64: 64, 128>}, {pipeline_mode = #tpu.pipeline_mode<synchronous>, transform_indices = @transform_14, window_bounds = array<i64: 1, 128>}, {pipeline_mode = #tpu.pipeline_mode<synchronous>, transform_indices = @transform_15, window_bounds = array<i64: 128, 481>}, {pipeline_mode = #tpu.pipeline_mode<synchronous>, transform_indices = @transform_16, window_bounds = array<i64: 1, 481>}, {transform_indices = @transform_17, window_bounds = array<i64: 256, 481>}]} {
    %c0 = arith.constant 0 : index
    %c0_0 = arith.constant 0 : index
    %0 = vector.load %arg1[%c0, %c0_0] : memref<256x481xf32, #tpu.memory_space<vmem>>, vector<256x481xf32>
    %1 = arith.truncf %0 : vector<256x481xf32> to vector<256x481xbf16>
    %c0_1 = arith.constant 0 : index
    %c0_2 = arith.constant 0 : index
    %2 = vector.load %arg2[%c0_1, %c0_2] : memref<481x128xbf16, #tpu.memory_space<vmem>>, vector<481x128xbf16>
    %c0_3 = arith.constant 0 : index
    %c0_4 = arith.constant 0 : index
    %3 = vector.load %arg3[%c0_3, %c0_4] : memref<1x128xf32, #tpu.memory_space<vmem>>, vector<1x128xf32>
    %cst = arith.constant dense<0.000000e+00> : vector<256x128xf32>
    %4 = tpu.matmul %1, %2, %cst {dimension_numbers = #tpu.dot_dimension_numbers<[1], [0], [0], [1], [0, 0, 1, 1], [], []>} : vector<256x481xbf16>, vector<481x128xbf16>, vector<256x128xf32> -> vector<256x128xf32>
    %5 = vector.broadcast %3 : vector<1x128xf32> to vector<256x128xf32>
    %6 = arith.addf %4, %5 : vector<256x128xf32>
    %cst_5 = arith.constant 0.000000e+00 : f32
    %7 = vector.broadcast %cst_5 : f32 to vector<256x128xf32>
    %8 = arith.maximumf %6, %7 : vector<256x128xf32>
    %c0_6 = arith.constant 0 : index
    %c0_7 = arith.constant 0 : index
    %9 = vector.load %arg4[%c0_6, %c0_7] : memref<128x64xbf16, #tpu.memory_space<vmem>>, vector<128x64xbf16>
    %c0_8 = arith.constant 0 : index
    %c0_9 = arith.constant 0 : index
    %10 = vector.load %arg5[%c0_8, %c0_9] : memref<1x64xf32, #tpu.memory_space<vmem>>, vector<1x64xf32>
    %11 = arith.truncf %8 : vector<256x128xf32> to vector<256x128xbf16>
    %cst_10 = arith.constant dense<0.000000e+00> : vector<256x64xf32>
    %12 = tpu.matmul %11, %9, %cst_10 {dimension_numbers = #tpu.dot_dimension_numbers<[1], [0], [0], [1], [0, 0, 1, 1], [], []>} : vector<256x128xbf16>, vector<128x64xbf16>, vector<256x64xf32> -> vector<256x64xf32>
    %13 = vector.broadcast %10 : vector<1x64xf32> to vector<256x64xf32>
    %14 = arith.addf %12, %13 : vector<256x64xf32>
    %cst_11 = arith.constant 0.000000e+00 : f32
    %15 = vector.broadcast %cst_11 : f32 to vector<256x64xf32>
    %16 = arith.maximumf %14, %15 : vector<256x64xf32>
    %c0_12 = arith.constant 0 : index
    %c0_13 = arith.constant 0 : index
    %17 = vector.load %arg6[%c0_12, %c0_13] : memref<64x12xf32, #tpu.memory_space<vmem>>, vector<64x12xf32>
    %c0_14 = arith.constant 0 : index
    %c0_15 = arith.constant 0 : index
    %18 = vector.load %arg7[%c0_14, %c0_15] : memref<1x12xf32, #tpu.memory_space<vmem>>, vector<1x12xf32>
    %cst_16 = arith.constant dense<0.000000e+00> : vector<256x12xf32>
    %19 = tpu.matmul %16, %17, %cst_16 {dimension_numbers = #tpu.dot_dimension_numbers<[1], [0], [0], [1], [0, 0, 1, 1], [], []>} : vector<256x64xf32>, vector<64x12xf32>, vector<256x12xf32> -> vector<256x12xf32>
    %20 = vector.broadcast %18 : vector<1x12xf32> to vector<256x12xf32>
    %21 = arith.addf %19, %20 : vector<256x12xf32>
    %cst_17 = arith.constant 0.000000e+00 : f32
    %22 = vector.broadcast %cst_17 : f32 to vector<256x12xf32>
    %23 = arith.maximumf %21, %22 : vector<256x12xf32>
    %c0_18 = arith.constant 0 : index
    %c0_19 = arith.constant 0 : index
    %24 = vector.load %arg8[%c0_18, %c0_19] : memref<12x2xf32, #tpu.memory_space<vmem>>, vector<12x2xf32>
    %c0_20 = arith.constant 0 : index
    %c0_21 = arith.constant 0 : index
    %25 = vector.load %arg9[%c0_20, %c0_21] : memref<1x2xf32, #tpu.memory_space<vmem>>, vector<1x2xf32>
    %cst_22 = arith.constant dense<0.000000e+00> : vector<256x2xf32>
    %26 = tpu.matmul %23, %24, %cst_22 {dimension_numbers = #tpu.dot_dimension_numbers<[1], [0], [0], [1], [0, 0, 1, 1], [], []>} : vector<256x12xf32>, vector<12x2xf32>, vector<256x2xf32> -> vector<256x2xf32>
    %27 = vector.broadcast %25 : vector<1x2xf32> to vector<256x2xf32>
    %28 = arith.addf %26, %27 : vector<256x2xf32>
    %c0_23 = arith.constant 0 : index
    %c0_24 = arith.constant 0 : index
    %29 = vector.load %arg10[%c0_23, %c0_24] : memref<2x12xf32, #tpu.memory_space<vmem>>, vector<2x12xf32>
    %c0_25 = arith.constant 0 : index
    %c0_26 = arith.constant 0 : index
    %30 = vector.load %arg11[%c0_25, %c0_26] : memref<1x12xf32, #tpu.memory_space<vmem>>, vector<1x12xf32>
    %cst_27 = arith.constant dense<0.000000e+00> : vector<256x12xf32>
    %31 = tpu.matmul %28, %29, %cst_27 {dimension_numbers = #tpu.dot_dimension_numbers<[1], [0], [0], [1], [0, 0, 1, 1], [], []>} : vector<256x2xf32>, vector<2x12xf32>, vector<256x12xf32> -> vector<256x12xf32>
    %32 = vector.broadcast %30 : vector<1x12xf32> to vector<256x12xf32>
    %33 = arith.addf %31, %32 : vector<256x12xf32>
    %cst_28 = arith.constant 0.000000e+00 : f32
    %34 = vector.broadcast %cst_28 : f32 to vector<256x12xf32>
    %35 = arith.maximumf %33, %34 : vector<256x12xf32>
    %c0_29 = arith.constant 0 : index
    %c0_30 = arith.constant 0 : index
    %36 = vector.load %arg12[%c0_29, %c0_30] : memref<12x64xf32, #tpu.memory_space<vmem>>, vector<12x64xf32>
    %c0_31 = arith.constant 0 : index
    %c0_32 = arith.constant 0 : index
    %37 = vector.load %arg13[%c0_31, %c0_32] : memref<1x64xf32, #tpu.memory_space<vmem>>, vector<1x64xf32>
    %cst_33 = arith.constant dense<0.000000e+00> : vector<256x64xf32>
    %38 = tpu.matmul %35, %36, %cst_33 {dimension_numbers = #tpu.dot_dimension_numbers<[1], [0], [0], [1], [0, 0, 1, 1], [], []>} : vector<256x12xf32>, vector<12x64xf32>, vector<256x64xf32> -> vector<256x64xf32>
    %39 = vector.broadcast %37 : vector<1x64xf32> to vector<256x64xf32>
    %40 = arith.addf %38, %39 : vector<256x64xf32>
    %cst_34 = arith.constant 0.000000e+00 : f32
    %41 = vector.broadcast %cst_34 : f32 to vector<256x64xf32>
    %42 = arith.maximumf %40, %41 : vector<256x64xf32>
    %c0_35 = arith.constant 0 : index
    %c0_36 = arith.constant 0 : index
    %43 = vector.load %arg14[%c0_35, %c0_36] : memref<64x128xbf16, #tpu.memory_space<vmem>>, vector<64x128xbf16>
    %c0_37 = arith.constant 0 : index
    %c0_38 = arith.constant 0 : index
    %44 = vector.load %arg15[%c0_37, %c0_38] : memref<1x128xf32, #tpu.memory_space<vmem>>, vector<1x128xf32>
    %45 = arith.truncf %42 : vector<256x64xf32> to vector<256x64xbf16>
    %cst_39 = arith.constant dense<0.000000e+00> : vector<256x128xf32>
    %46 = tpu.matmul %45, %43, %cst_39 {dimension_numbers = #tpu.dot_dimension_numbers<[1], [0], [0], [1], [0, 0, 1, 1], [], []>} : vector<256x64xbf16>, vector<64x128xbf16>, vector<256x128xf32> -> vector<256x128xf32>
    %47 = vector.broadcast %44 : vector<1x128xf32> to vector<256x128xf32>
    %48 = arith.addf %46, %47 : vector<256x128xf32>
    %cst_40 = arith.constant 0.000000e+00 : f32
    %49 = vector.broadcast %cst_40 : f32 to vector<256x128xf32>
    %50 = arith.maximumf %48, %49 : vector<256x128xf32>
    %c0_41 = arith.constant 0 : index
    %c0_42 = arith.constant 0 : index
    %51 = vector.load %arg16[%c0_41, %c0_42] : memref<128x481xbf16, #tpu.memory_space<vmem>>, vector<128x481xbf16>
    %c0_43 = arith.constant 0 : index
    %c0_44 = arith.constant 0 : index
    %52 = vector.load %arg17[%c0_43, %c0_44] : memref<1x481xf32, #tpu.memory_space<vmem>>, vector<1x481xf32>
    %53 = arith.truncf %50 : vector<256x128xf32> to vector<256x128xbf16>
    %cst_45 = arith.constant dense<0.000000e+00> : vector<256x481xf32>
    %54 = tpu.matmul %53, %51, %cst_45 {dimension_numbers = #tpu.dot_dimension_numbers<[1], [0], [0], [1], [0, 0, 1, 1], [], []>} : vector<256x128xbf16>, vector<128x481xbf16>, vector<256x481xf32> -> vector<256x481xf32>
    %55 = vector.broadcast %52 : vector<1x481xf32> to vector<256x481xf32>
    %56 = arith.addf %54, %55 : vector<256x481xf32>
    %57 = math.tanh %56 : vector<256x481xf32>
    %58 = arith.truncf %57 : vector<256x481xf32> to vector<256x481xbf16>
    %c0_46 = arith.constant 0 : index
    %c0_47 = arith.constant 0 : index
    %59 = vector.load %arg18[%c0_46, %c0_47] : memref<256x481xbf16, #tpu.memory_space<vmem>>, vector<256x481xbf16>
    tpu.vector_store %arg18[%c0_46, %c0_47], %58 {strides = array<i32>} : memref<256x481xbf16, #tpu.memory_space<vmem>>, vector<256x481xbf16>,
    return
  }
  func.func @transform_0(%arg0: i32) -> (i32, i32) {
    %c0_i32 = arith.constant 0 : i32
    %c0_i32_0 = arith.constant 0 : i32
    return %arg0, %c0_i32 : i32, i32
  }
  func.func @transform_1(%arg0: i32) -> (i32, i32) {
    %c0_i32 = arith.constant 0 : i32
    %c0_i32_0 = arith.constant 0 : i32
    %c0_i32_1 = arith.constant 0 : i32
    return %c0_i32, %c0_i32_0 : i32, i32
  }
  func.func @transform_2(%arg0: i32) -> (i32, i32) {
    %c0_i32 = arith.constant 0 : i32
    %c0_i32_0 = arith.constant 0 : i32
    %c0_i32_1 = arith.constant 0 : i32
    return %c0_i32, %c0_i32_0 : i32, i32
  }
  func.func @transform_3(%arg0: i32) -> (i32, i32) {
    %c0_i32 = arith.constant 0 : i32
    %c0_i32_0 = arith.constant 0 : i32
    %c0_i32_1 = arith.constant 0 : i32
    return %c0_i32, %c0_i32_0 : i32, i32
  }
  func.func @transform_4(%arg0: i32) -> (i32, i32) {
    %c0_i32 = arith.constant 0 : i32
    %c0_i32_0 = arith.constant 0 : i32
    %c0_i32_1 = arith.constant 0 : i32
    return %c0_i32, %c0_i32_0 : i32, i32
  }
  func.func @transform_5(%arg0: i32) -> (i32, i32) {
    %c0_i32 = arith.constant 0 : i32
    %c0_i32_0 = arith.constant 0 : i32
    %c0_i32_1 = arith.constant 0 : i32
    return %c0_i32, %c0_i32_0 : i32, i32
  }
  func.func @transform_6(%arg0: i32) -> (i32, i32) {
    %c0_i32 = arith.constant 0 : i32
    %c0_i32_0 = arith.constant 0 : i32
    %c0_i32_1 = arith.constant 0 : i32
    return %c0_i32, %c0_i32_0 : i32, i32
  }
  func.func @transform_7(%arg0: i32) -> (i32, i32) {
    %c0_i32 = arith.constant 0 : i32
    %c0_i32_0 = arith.constant 0 : i32
    %c0_i32_1 = arith.constant 0 : i32
    return %c0_i32, %c0_i32_0 : i32, i32
  }
  func.func @transform_8(%arg0: i32) -> (i32, i32) {
    %c0_i32 = arith.constant 0 : i32
    %c0_i32_0 = arith.constant 0 : i32
    %c0_i32_1 = arith.constant 0 : i32
    return %c0_i32, %c0_i32_0 : i32, i32
  }
  func.func @transform_9(%arg0: i32) -> (i32, i32) {
    %c0_i32 = arith.constant 0 : i32
    %c0_i32_0 = arith.constant 0 : i32
    %c0_i32_1 = arith.constant 0 : i32
    return %c0_i32, %c0_i32_0 : i32, i32
  }
  func.func @transform_10(%arg0: i32) -> (i32, i32) {
    %c0_i32 = arith.constant 0 : i32
    %c0_i32_0 = arith.constant 0 : i32
    %c0_i32_1 = arith.constant 0 : i32
    return %c0_i32, %c0_i32_0 : i32, i32
  }
  func.func @transform_11(%arg0: i32) -> (i32, i32) {
    %c0_i32 = arith.constant 0 : i32
    %c0_i32_0 = arith.constant 0 : i32
    %c0_i32_1 = arith.constant 0 : i32
    return %c0_i32, %c0_i32_0 : i32, i32
  }
  func.func @transform_12(%arg0: i32) -> (i32, i32) {
    %c0_i32 = arith.constant 0 : i32
    %c0_i32_0 = arith.constant 0 : i32
    %c0_i32_1 = arith.constant 0 : i32
    return %c0_i32, %c0_i32_0 : i32, i32
  }
  func.func @transform_13(%arg0: i32) -> (i32, i32) {
    %c0_i32 = arith.constant 0 : i32
    %c0_i32_0 = arith.constant 0 : i32
    %c0_i32_1 = arith.constant 0 : i32
    return %c0_i32, %c0_i32_0 : i32, i32
  }
  func.func @transform_14(%arg0: i32) -> (i32, i32) {
    %c0_i32 = arith.constant 0 : i32
    %c0_i32_0 = arith.constant 0 : i32
    %c0_i32_1 = arith.constant 0 : i32
    return %c0_i32, %c0_i32_0 : i32, i32
  }
  func.func @transform_15(%arg0: i32) -> (i32, i32) {
    %c0_i32 = arith.constant 0 : i32
    %c0_i32_0 = arith.constant 0 : i32
    %c0_i32_1 = arith.constant 0 : i32
    return %c0_i32, %c0_i32_0 : i32, i32
  }
  func.func @transform_16(%arg0: i32) -> (i32, i32) {
    %c0_i32 = arith.constant 0 : i32
    %c0_i32_0 = arith.constant 0 : i32
    %c0_i32_1 = arith.constant 0 : i32
    return %c0_i32, %c0_i32_0 : i32, i32
  }
  func.func @transform_17(%arg0: i32) -> (i32, i32) {
    %c0_i32 = arith.constant 0 : i32
    %c0_i32_0 = arith.constant 0 : i32
    return %arg0, %c0_i32 : i32, i32
  }
}

</mosaic_0001>

<bundles_post_ra>
// kernel: tpu_custom_call.1
= control target key start
LH: loop header
LB: loop body
LE: loop exit
PB: predicated region body
PF: predicated region fallthrough
CT: control target
= control target key end

     0   :  { %s4661_s24 = smov 0   ;;  %s6258_s0 = inlined_call_operand.vmem [shape: f32[512,481], index: 0, kind: input, shape index: {}]   ;;  %s6259_s1 = inlined_call_operand.vmem [shape: bf16[481,128], index: 1, kind: input, shape index: {}]   ;;  %s6260_s2 = inlined_call_operand.vmem [shape: f32[1,128], index: 2, kind: input, shape index: {}]   ;;  %s6261_s3 = inlined_call_operand.vmem [shape: bf16[128,64], index: 3, kind: input, shape index: {}]   ;;  %s6262_s4 = inlined_call_operand.vmem [shape: f32[1,64], index: 4, kind: input, shape index: {}]   ;;  %s6263_s5 = inlined_call_operand.vmem [shape: f32[64,12], index: 5, kind: input, shape index: {}]   ;;  %s6264_s6 = inlined_call_operand.vmem [shape: f32[1,12], index: 6, kind: input, shape index: {}]   ;;  %s6265_s7 = inlined_call_operand.vmem [shape: f32[12,2], index: 7, kind: input, shape index: {}]   ;;  %s6266_s8 = inlined_call_operand.vmem [shape: f32[1,2], index: 8, kind: input, shape index: {}]   ;;  %s6267_s9 = inlined_call_operand.vmem [shape: f32[2,12], index: 9, kind: input, shape index: {}]   ;;  %s6268_s10 = inlined_call_operand.vmem [shape: f32[1,12], index: 10, kind: input, shape index: {}]   ;;  %s6269_s11 = inlined_call_operand.vmem [shape: f32[12,64], index: 11, kind: input, shape index: {}]   ;;  %s6270_s12 = inlined_call_operand.vmem [shape: f32[1,64], index: 12, kind: input, shape index: {}]   ;;  %s6271_s13 = inlined_call_operand.vmem [shape: bf16[64,128], index: 13, kind: input, shape index: {}]   ;;  %s6272_s14 = inlined_call_operand.vmem [shape: f32[1,128], index: 14, kind: input, shape index: {}]   ;;  %s6273_s15 = inlined_call_operand.vmem [shape: bf16[128,481], index: 15, kind: input, shape index: {}]   ;;  %s6274_s16 = inlined_call_operand.vmem [shape: f32[1,481], index: 16, kind: input, shape index: {}]   ;;  %s6275_s17 = inlined_call_operand.vmem [shape: bf16[512,481], index: 17, kind: output, shape index: {}]  }
   0x1   :  { %6277 = sst [smem:[#allocation2_spill]] %s6258_s0 }
   0x2   :  { %6278 = sst [smem:[#allocation3_spill]] %s6259_s1 }
   0x3 LB: > { %s3732_s25 = sadd.s32 4294967295, %s4568_s24   ;;  %p3736_p0 = scmp.ge.s32.totalorder %s4568_s24, 1  ;;  %s4568_s24 = sphi %s4661_s24, %s27_s24  }
   0x4   : > { %p489_p1 = scmp.lt.s32.totalorder %s4568_s24, 3 }
   0x6   : > { %p490_p2 = pnand %p3736_p0, %p489_p1 }
   0x7   : > { %s6279_s28 = sld [smem:[#allocation3_spill]] (!%p490_p2)  ;;  %s3737_s22 = sshll.u32 (!%p490_p2), %s3732_s25, 5 }
   0x8   : > { %493 = sbr.rel (%p490_p2) target bundleno = 1755 (0x6db), region = 88  ;;  %p544_p3 = scmp.lt.s32.totalorder (!%p490_p2), %s3737_s22, 63 }
   0x9   : > { %s6280_s30 = sld [smem:[#allocation2_spill]] (!%p490_p2) }
   0xd   : > { %v4213_v0 = vld [vmem:[%s6279_s28 + $0x38] sm:$0xff]  ;;  %vm1047_vm0 = vcmask 1040384   ;;  %v810_v1 = vld [vmem:[%s6279_s28 + $0xf0] sm:$0x1]  ;;  %v4570_v4 = vmov 0   ;;  %v4211_v7 = vld [vmem:[%s6279_s28 + $0x28] sm:$0xff] }
   0xe   : > { %4280 = vmatpush.bf16.msra.mxu1 %v4213_v0  ;;  %v4212_v2 = vld [vmem:[%s6279_s28 + $0x30] sm:$0xff]  ;;  %v936_v3 = vunpack.c.l.b16 %v810_v1  ;;  %1053 = vmatpush.bf16.msra.mxu0 %v4213_v0  ;;  %v1049_v5 = vsel %vm1047_vm0, 65535, %v4570_v4  ;;  %v4235_v9 = vld [vmem:[%s6279_s28 + $0xe8] sm:$0xff]  ;;  %v4210_v10 = vld [vmem:[%s6279_s28 + $0x20] sm:$0xff]  ;;  %s6284_s22 = smov (!%p544_p3, %s3737_s22), 63  ;;  %vm998_vm1 = vcmask 793600  }
   0xf   : > { %v4234_v11 = vld [vmem:[%s6279_s28 + $0xe0] sm:$0xff]  ;;  %v4209_v12 = vld [vmem:[%s6279_s28 + $0x18] sm:$0xff]  ;;  %v4208_v14 = vld [vmem:[%s6279_s28 + $0x10] sm:$0xff]  ;;  %s4204_s23 = sshll.u32 %s6284_s22, 5  ;;  %vm2003_vm2 = vcmask 1043456   ;;  %vm2222_vm3 = vcmask 1041408  }
  0x10   : > { %v967_v6 = vpack.c.b16 %v936_v3, %v936_v3  ;;  %v4233_v13 = vld [vmem:[%s6279_s28 + $0xd8] sm:$0xff]  ;;  %v4232_v15 = vld [vmem:[%s6279_s28 + $0xd0] sm:$0xff]  ;;  %v4207_v16 = vld [vmem:[%s6279_s28 + $0x8] sm:$0xff]  ;;  %s4711_s25 = scalar_lea.vmem %s6280_s30, %s4204_s23  ;;  %vm1658_vm4 = vcmask 523264   ;;  %vm1906_vm5 = vcmask 97280   ;;  %vm2125_vm6 = vcmask 15360  }
  0x11   : > { %v4231_v17 = vld [vmem:[%s6279_s28 + $0xc8] sm:$0xff]  ;;  %v4206_v18 = vld [vmem:[%s6279_s28] sm:$0xff]  ;;  %v4221_v21 = vld [vmem:[%s6279_s28 + $0x78] sm:$0xff]  ;;  %s4205_s0 = sshll.u32 %s6284_s22, 4  ;;  %vm3609_vm7 = vcmask 793604  }
  0x12   : > { %4281 = vmatpush.bf16.msra.mxu1 %v4212_v2  ;;  %v1051_v8 = vand.u32 %v1049_v5, %v967_v6  ;;  %1054 = vmatpush.bf16.msra.mxu0 %v4212_v2  ;;  %v622_v19 = vld [vmem:[%s4711_s25 + $0x200] sm:$0xff]  ;;  %v561_v23 = vld [vmem:[%s4711_s25 + $0x18] sm:$0xff]  ;;  %v4220_v28 = vld [vmem:[%s6279_s28 + $0x70] sm:$0xff]  ;;  %s5871_s19 = scalar_lea.vmem %s6275_s17, %s4205_s0 }
  0x13   : > { %v626_v20 = vld [vmem:[%s4711_s25 + $0x220] sm:$0xff]  ;;  %v565_v24 = vld [vmem:[%s4711_s25 + $0x38] sm:$0xff]  ;;  %v4219_v29 = vld [vmem:[%s6279_s28 + $0x68] sm:$0xff] }
  0x14   : > { %1321 = vmatpush.bf16.msra.mxu3 %v1051_v8  ;;  %v4230_v22 = vld [vmem:[%s6279_s28 + $0xc0] sm:$0xff]  ;;  %v718_v25 = vpack.c.bf16 %v626_v20, %v622_v19  ;;  %v4243_v26 = vld [vmem:[%s6261_s3 + $0x38] sm:$0xff]  ;;  %v689_v27 = vpack.c.bf16 %v565_v24, %v561_v23  ;;  %v4242_v37 = vld [vmem:[%s6261_s3 + $0x30] sm:$0xff] }
  0x15   : > { %v630_v30 = vld [vmem:[%s4711_s25 + $0x240] sm:$0xff]  ;;  %v569_v32 = vld [vmem:[%s4711_s25 + $0x58] sm:$0xff]  ;;  %v4216_v51 = vld [vmem:[%s6279_s28 + $0x50] sm:$0xff] }
  0x16   : > { %4282 = vmatpush.bf16.msra.mxu1 %v4211_v7  ;;  %1055 = vmatpush.bf16.msra.mxu0 %v4211_v7  ;;  %v634_v31 = vld [vmem:[%s4711_s25 + $0x260] sm:$0xff]  ;;  %v573_v33 = vld [vmem:[%s4711_s25 + $0x78] sm:$0xff]  ;;  %v4241_v52 = vld [vmem:[%s6261_s3 + $0x28] sm:$0xff] }
  0x17   : > { %v722_v34 = vpack.c.bf16 %v634_v31, %v630_v30  ;;  %v693_v35 = vpack.c.bf16 %v573_v33, %v569_v32  ;;  %v4218_v36 = vld [vmem:[%s6279_s28 + $0x60] sm:$0xff]  ;;  %v577_v40 = vld [vmem:[%s4711_s25 + $0x98] sm:$0xff]  ;;  %v4228_v54 = vld [vmem:[%s6279_s28 + $0xb0] sm:$0xff] }
  0x18   : > { %1322 = vmatpush.bf16.msra.mxu3 %v4235_v9  ;;  %v638_v38 = vld [vmem:[%s4711_s25 + $0x280] sm:$0xff]  ;;  %v581_v41 = vld [vmem:[%s4711_s25 + $0xb8] sm:$0xff]  ;;  %v4227_v55 = vld [vmem:[%s6279_s28 + $0xa8] sm:$0xff] }
  0x19   : > { %v642_v39 = vld [vmem:[%s4711_s25 + $0x2a0] sm:$0xff]  ;;  %v697_v43 = vpack.c.bf16 %v581_v41, %v577_v40  ;;  %v4217_v44 = vld [vmem:[%s6279_s28 + $0x58] sm:$0xff]  ;;  %v4215_v63 = vld [vmem:[%s6279_s28 + $0x48] sm:$0xff] }
  0x1a   : > { %4283 = vmatpush.bf16.msra.mxu1 %v4210_v10  ;;  %1056 = vmatpush.bf16.msra.mxu0 %v4210_v10  ;;  %v726_v42 = vpack.c.bf16 %v642_v39, %v638_v38  ;;  %v646_v45 = vld [vmem:[%s4711_s25 + $0x2c0] sm:$0xff]  ;;  %v585_v47 = vld [vmem:[%s4711_s25 + $0xd8] sm:$0xff]  ;;  %v4224_v1 = vld [vmem:[%s6279_s28 + $0x90] sm:$0xff] }
  0x1b   : > { %v650_v46 = vld [vmem:[%s4711_s25 + $0x2e0] sm:$0xff]  ;;  %v589_v48 = vld [vmem:[%s4711_s25 + $0xf8] sm:$0xff]  ;;  %v4223_v4 = vld [vmem:[%s6279_s28 + $0x88] sm:$0xff] }
  0x1c   : > { %1323 = vmatpush.bf16.msra.mxu3 %v4234_v11  ;;  %v730_v49 = vpack.c.bf16 %v650_v46, %v646_v45  ;;  %v701_v50 = vpack.c.bf16 %v589_v48, %v585_v47  ;;  %v4229_v53 = vld [vmem:[%s6279_s28 + $0xb8] sm:$0xff]  ;;  %v654_v56 = vld [vmem:[%s4711_s25 + $0x300] sm:$0xff]  ;;  %v568_v24 = vld [vmem:[%s4711_s25 + $0x50] sm:$0xff] }
  0x1d   : > { %1231 = vmatpush.bf16.msra.mxu2 %v4229_v53  ;;  %v658_v57 = vld [vmem:[%s4711_s25 + $0x320] sm:$0xff]  ;;  %v593_v58 = vld [vmem:[%s4711_s25 + $0x118] sm:$0xff]  ;;  %v580_v38 = vld [vmem:[%s4711_s25 + $0xb0] sm:$0xff] }
  0x1e   : > { %4284 = vmatpush.bf16.msra.mxu1 %v4209_v12  ;;  %1057 = vmatpush.bf16.msra.mxu0 %v4209_v12  ;;  %v597_v59 = vld [vmem:[%s4711_s25 + $0x138] sm:$0xff]  ;;  %v734_v60 = vpack.c.bf16 %v658_v57, %v654_v56  ;;  %v4226_v62 = vld [vmem:[%s6279_s28 + $0xa0] sm:$0xff]  ;;  %v560_v12 = vld [vmem:[%s4711_s25 + $0x10] sm:$0xff] }
  0x1f   : > { %v705_v61 = vpack.c.bf16 %v597_v59, %v593_v58  ;;  %v4225_v0 = vld [vmem:[%s6279_s28 + $0x98] sm:$0xff]  ;;  %v662_v2 = vld [vmem:[%s4711_s25 + $0x340] sm:$0xff]  ;;  %v567_v58 = vld [vmem:[%s4711_s25 + $0x48] sm:$0xff] }
  0x20   : > { %1324 = vmatpush.bf16.msra.mxu3 %v4233_v13  ;;  %v666_v3 = vld [vmem:[%s4711_s25 + $0x360] sm:$0xff]  ;;  %v601_v5 = vld [vmem:[%s4711_s25 + $0x158] sm:$0xff]  ;;  %v564_v13 = vld [vmem:[%s4711_s25 + $0x30] sm:$0xff] }
  0x21   : > { %1232 = vmatpush.bf16.msra.mxu2 %v4228_v54  ;;  %v605_v6 = vld [vmem:[%s4711_s25 + $0x178] sm:$0xff]  ;;  %v738_v7 = vpack.c.bf16 %v666_v3, %v662_v2  ;;  %v4222_v9 = vld [vmem:[%s6279_s28 + $0x80] sm:$0xff]  ;;  %v571_v59 = vld [vmem:[%s4711_s25 + $0x68] sm:$0xff] }
  0x22   : > { %4285 = vmatpush.bf16.msra.mxu1 %v4208_v14  ;;  %1058 = vmatpush.bf16.msra.mxu0 %v4208_v14  ;;  %v709_v8 = vpack.c.bf16 %v605_v6, %v601_v5  ;;  %v4214_v10 = vld [vmem:[%s6279_s28 + $0x40] sm:$0xff]  ;;  %v609_v20 = vld [vmem:[%s4711_s25 + $0x198] sm:$0xff]  ;;  %v4238_v2 = vld [vmem:[%s6261_s3 + $0x10] sm:$0xff] }
  0x23   : > { %v4240_v11 = vld [vmem:[%s6261_s3 + $0x20] sm:$0xff]  ;;  %v617_v32 = vld [vmem:[%s4711_s25 + $0x1d8] sm:$0xff]  ;;  %v592_v3 = vld [vmem:[%s4711_s25 + $0x110] sm:$0xff] }
  0x24   : > { %1325 = vmatpush.bf16.msra.mxu3 %v4232_v15  ;;  %v558_v14 = vld [vmem:[%s4711_s25] sm:$0xff]  ;;  %v621_v33 = vld [vmem:[%s4711_s25 + $0x1f8] sm:$0xff]  ;;  %vm5997_vm8 = vmor %vm3609_vm7, %vm2003_vm2 }
  0x25   : > { %1233 = vmatpush.bf16.msra.mxu2 %v4227_v55  ;;  %v562_v15 = vld [vmem:[%s4711_s25 + $0x20] sm:$0xff]  ;;  %v625_v45 = vld [vmem:[%s4711_s25 + $0x218] sm:$0xff] }
  0x26   : > { %4286 = vmatpush.bf16.msra.mxu1 %v4207_v16  ;;  %1059 = vmatpush.bf16.msra.mxu0 %v4207_v16  ;;  %v688_v16 = vpack.c.bf16 %v564_v13, %v560_v12  ;;  %v674_v19 = vld [vmem:[%s4711_s25 + $0x3a0] sm:$0xff]  ;;  %v629_v46 = vld [vmem:[%s4711_s25 + $0x238] sm:$0xff]  ;;  %v579_v12 = vld [vmem:[%s4711_s25 + $0xa8] sm:$0xff] }
  0x27   : > { %v678_v30 = vld [vmem:[%s4711_s25 + $0x3c0] sm:$0xff]  ;;  %v641_v13 = vld [vmem:[%s4711_s25 + $0x298] sm:$0xff] }
  0x28   : > { %1326 = vmatpush.bf16.msra.mxu3 %v4231_v17  ;;  %v686_v17 = vpack.c.bf16 %v562_v15, %v558_v14  ;;  %v682_v31 = vld [vmem:[%s4711_s25 + $0x3e0] sm:$0xff]  ;;  %v645_v14 = vld [vmem:[%s4711_s25 + $0x2b8] sm:$0xff] }
  0x29   : > { %1234 = vmatpush.bf16.msra.mxu2 %v4226_v62  ;;  %v574_v40 = vld [vmem:[%s4711_s25 + $0x80] sm:$0xff]  ;;  %v691_v62 = vpack.c.bf16 %v571_v59, %v567_v58 }
  0x2a   : > { %4287 = vmatpush.bf16.msra.mxu1 %v4206_v18  ;;  %1060 = vmatpush.bf16.msra.mxu0 %v4206_v18  ;;  %v670_v18 = vld [vmem:[%s4711_s25 + $0x380] sm:$0xff] }
  0x2b   : > { %v578_v41 = vld [vmem:[%s4711_s25 + $0xa0] sm:$0xff] }
  0x2c   : > { %1327 = vmatpush.bf16.msra.mxu3 %v4230_v22  ;;  %v742_v22 = vpack.c.bf16 %v674_v19, %v670_v18  ;;  %v582_v53 = vld [vmem:[%s4711_s25 + $0xc0] sm:$0xff]  ;;  %v729_v18 = vpack.c.bf16 %v645_v14, %v641_v13  ;;  %v600_v19 = vld [vmem:[%s4711_s25 + $0x150] sm:$0xff] }
  0x2d   : > { %1101 = vmatmul.bf16.vlgmr.msra.gmra.mxu1 %v718_v25  ;;  %1235 = vmatpush.bf16.msra.mxu2 %v4225_v0  ;;  %v572_v25 = vld [vmem:[%s4711_s25 + $0x70] sm:$0xff]  ;;  %v586_v54 = vld [vmem:[%s4711_s25 + $0xe0] sm:$0xff] }
  0x2e   : > { %1142 = vmatpush.bf16.msrb.mxu1 %v4221_v21  ;;  %1061 = vmatmul.bf16.vlgmr.msra.gmra.mxu0 %v686_v17  ;;  %v613_v21 = vld [vmem:[%s4711_s25 + $0x1b8] sm:$0xff]  ;;  %v698_v55 = vpack.c.bf16 %v586_v54, %v582_v53  ;;  %v590_v6 = vld [vmem:[%s4711_s25 + $0x100] sm:$0xff]  ;;  %v616_v53 = vld [vmem:[%s4711_s25 + $0x1d0] sm:$0xff] }
  0x2f   : > { %3863 = vmatmul.msk.bf16.vlgmr.msra.gmra.mxu3 %vm998_vm1, %v689_v27  ;;  %v713_v23 = vpack.c.bf16 %v613_v21, %v609_v20  ;;  %v566_v27 = vld [vmem:[%s4711_s25 + $0x40] sm:$0xff]  ;;  %v604_v20 = vld [vmem:[%s4711_s25 + $0x170] sm:$0xff] }
  0x30   : > { %1525 = vmatpush.bf16.msrb.mxu3 %v4243_v26  ;;  %v692_v26 = vpack.c.bf16 %v572_v25, %v568_v24  ;;  %v708_v21 = vpack.c.bf16 %v604_v20, %v600_v19  ;;  %v620_v54 = vld [vmem:[%s4711_s25 + $0x1f0] sm:$0xff]  ;;  %v614_v58 = vld [vmem:[%s4711_s25 + $0x1c0] sm:$0xff]  ;;  %v607_v20 = vld [vmem:[%s4711_s25 + $0x188] sm:$0xff] }
  0x31   : > { %1236 = vmatpush.bf16.msra.mxu2 %v4224_v1  ;;  %v618_v59 = vld [vmem:[%s4711_s25 + $0x1e0] sm:$0xff]  ;;  %v628_v13 = vld [vmem:[%s4711_s25 + $0x230] sm:$0xff] }
  0x32   : > { %1143 = vmatpush.bf16.msrb.mxu1 %v4220_v28  ;;  %v570_v28 = vld [vmem:[%s4711_s25 + $0x60] sm:$0xff] }
  0x34   : > { %1526 = vmatpush.bf16.msrb.mxu3 %v4242_v37  ;;  %v576_v37 = vld [vmem:[%s4711_s25 + $0x90] sm:$0xff] }
  0x35   : > { %1237 = vmatpush.bf16.msra.mxu2 %v4223_v4  ;;  %v696_v39 = vpack.c.bf16 %v580_v38, %v576_v37  ;;  %v596_v4 = vld [vmem:[%s4711_s25 + $0x130] sm:$0xff] }
  0x36   : > { %1144 = vmatpush.bf16.msrb.mxu1 %v4219_v29  ;;  %v690_v29 = vpack.c.bf16 %v570_v28, %v566_v27  ;;  %v704_v5 = vpack.c.bf16 %v596_v4, %v592_v3  ;;  %v583_v27 = vld [vmem:[%s4711_s25 + $0xc8] sm:$0xff]  ;;  %v612_v37 = vld [vmem:[%s4711_s25 + $0x1b0] sm:$0xff]  ;;  %v665_v3 = vld [vmem:[%s4711_s25 + $0x358] sm:$0xff] }
  0x37   : > { %v587_v28 = vld [vmem:[%s4711_s25 + $0xe8] sm:$0xff]  ;;  %v669_v4 = vld [vmem:[%s4711_s25 + $0x378] sm:$0xff] }
  0x38   : > { %1527 = vmatpush.bf16.msrb.mxu3 %v4241_v52 }
  0x39   : > { %1238 = vmatpush.bf16.msra.mxu2 %v4222_v9 }
  0x3a   : > { %1145 = vmatpush.bf16.msrb.mxu1 %v4218_v36  ;;  %v4239_v36 = vld [vmem:[%s6261_s3 + $0x18] sm:$0xff] }
  0x3c   : > { %1528 = vmatpush.bf16.msrb.mxu3 %v4240_v11  ;;  %1239 = vmatmul.bf16.vlgmr.msra.gmra.mxu2 %v688_v16  ;;  %v575_v11 = vld [vmem:[%s4711_s25 + $0x88] sm:$0xff] }
  0x3d   : > { %1106 = vmatmul.bf16.gmra.mxu1 %v722_v34  ;;  %v746_v34 = vpack.c.bf16 %v682_v31, %v678_v30  ;;  %v695_v15 = vpack.c.bf16 %v579_v12, %v575_v11  ;;  %v653_v30 = vld [vmem:[%s4711_s25 + $0x2f8] sm:$0xff]  ;;  %v699_v31 = vpack.c.bf16 %v587_v28, %v583_v27  ;;  %v4236_v11 = vld [vmem:[%s6261_s3] sm:$0xff]  ;;  %v624_v12 = vld [vmem:[%s4711_s25 + $0x210] sm:$0xff] }
  0x3e   : > { %1146 = vmatpush.bf16.msrb.mxu1 %v4217_v44  ;;  %1066 = vmatmul.bf16.gmra.mxu0 %v690_v29  ;;  %v563_v44 = vld [vmem:[%s4711_s25 + $0x28] sm:$0xff]  ;;  %v649_v29 = vld [vmem:[%s4711_s25 + $0x2d8] sm:$0xff]  ;;  %v720_v14 = vpack.c.bf16 %v628_v13, %v624_v12 }
  0x3f   : > { %3864 = vmatmul.msk.bf16.gmra.mxu3 %vm998_vm1, %v693_v35  ;;  %v717_v35 = vpack.c.bf16 %v621_v33, %v617_v32  ;;  %v1653_v12 = vld [vmem:[%s6263_s5 + $0x38] sm:$0xff]  ;;  %v1901_v13 = vld [vmem:[%s6265_s7 + $0x8] sm:$0xf] }
  0x40   : > { %1529 = vmatpush.bf16.msrb.mxu3 %v4239_v36  ;;  %v608_v36 = vld [vmem:[%s4711_s25 + $0x190] sm:$0xff]  ;;  %1763 = vmatpush.msrb.mxu0 %v1653_v12 }
  0x41   : > { %v712_v38 = vpack.c.bf16 %v612_v37, %v608_v36 }
  0x42   : > { %1147 = vmatpush.bf16.msrb.mxu1 %v4216_v51  ;;  %v588_v51 = vld [vmem:[%s4711_s25 + $0xf0] sm:$0xff] }
  0x44   : > { %1530 = vmatpush.bf16.msrb.mxu3 %v4238_v2  ;;  %v603_v2 = vld [vmem:[%s4711_s25 + $0x168] sm:$0xff] }
  0x46   : > { %1148 = vmatpush.bf16.msrb.mxu1 %v4215_v63 }
  0x4a   : > { %1149 = vmatpush.bf16.msrb.mxu1 %v4214_v10 }
  0x4c   : > { %1244 = vmatmul.bf16.gmra.mxu2 %v692_v26 }
  0x4d   : > { %1111 = vmatmul.bf16.gmra.mxu1 %v726_v42  ;;  %v694_v42 = vpack.c.bf16 %v578_v41, %v574_v40  ;;  %v610_v40 = vld [vmem:[%s4711_s25 + $0x1a0] sm:$0xff] }
  0x4e   : > { %3943 = vmatpush.msk.msra.mxu1 %vm2003_vm2, %v1901_v13 }
  0x4f   : > { %3865 = vmatmul.msk.bf16.gmra.mxu3 %vm998_vm1, %v697_v43  ;;  %1071 = vmatmul.bf16.gmra.mxu0 %v694_v42  ;;  %v559_v43 = vld [vmem:[%s4711_s25 + $0x8] sm:$0xff] }
  0x50   : > { %v687_v47 = vpack.c.bf16 %v563_v44, %v559_v43  ;;  %v591_v44 = vld [vmem:[%s4711_s25 + $0x108] sm:$0xff] }
  0x5c   : > { %1249 = vmatmul.bf16.gmra.mxu2 %v696_v39  ;;  %v606_v39 = vld [vmem:[%s4711_s25 + $0x180] sm:$0xff] }
  0x5d   : > { %1116 = vmatmul.bf16.gmra.mxu1 %v730_v49  ;;  %v721_v49 = vpack.c.bf16 %v629_v46, %v625_v45  ;;  %v710_v41 = vpack.c.bf16 %v610_v40, %v606_v39  ;;  %v595_v45 = vld [vmem:[%s4711_s25 + $0x128] sm:$0xff]  ;;  %v657_v46 = vld [vmem:[%s4711_s25 + $0x318] sm:$0xff] }
  0x5f   : > { %3866 = vmatmul.msk.bf16.gmra.mxu3 %vm998_vm1, %v701_v50  ;;  %v584_v50 = vld [vmem:[%s4711_s25 + $0xd0] sm:$0xff]  ;;  %1076 = vmatmul.bf16.gmra.mxu0 %v698_v55  ;;  %v716_v55 = vpack.c.bf16 %v620_v54, %v616_v53 }
  0x60   : > { %v700_v52 = vpack.c.bf16 %v588_v51, %v584_v50 }
  0x6c   : > { %1254 = vmatmul.bf16.gmra.mxu2 %v700_v52 }
  0x6d   : > { %1121 = vmatmul.bf16.gmra.mxu1 %v734_v60  ;;  %v633_v60 = vld [vmem:[%s4711_s25 + $0x258] sm:$0xff] }
  0x6f   : > { %3867 = vmatmul.msk.bf16.gmra.mxu3 %vm998_vm1, %v705_v61  ;;  %v637_v61 = vld [vmem:[%s4711_s25 + $0x278] sm:$0xff] }
  0x70   : > { %v725_v1 = vpack.c.bf16 %v637_v61, %v633_v60  ;;  %v714_v60 = vpack.c.bf16 %v618_v59, %v614_v58  ;;  %v640_v58 = vld [vmem:[%s4711_s25 + $0x290] sm:$0xff] }
  0x71   : > { %v644_v59 = vld [vmem:[%s4711_s25 + $0x2b0] sm:$0xff] }
  0x7c   : > { %1259 = vmatmul.bf16.gmra.mxu2 %v704_v5 }
  0x7d   : > { %1126 = vmatmul.bf16.gmra.mxu1 %v738_v7  ;;  %v594_v7 = vld [vmem:[%s4711_s25 + $0x120] sm:$0xff] }
  0x7f   : > { %3868 = vmatmul.msk.bf16.gmra.mxu3 %vm998_vm1, %v709_v8  ;;  %v702_v8 = vpack.c.bf16 %v594_v7, %v590_v6 }
  0x81   : > { %1081 = vmatmul.bf16.gmra.mxu0 %v702_v8  ;;  %v741_v8 = vpack.c.bf16 %v669_v4, %v665_v3 }
  0x8c   : > { %1264 = vmatmul.bf16.gmra.mxu2 %v708_v21  ;;  %v611_v21 = vld [vmem:[%s4711_s25 + $0x1a8] sm:$0xff] }
  0x8d   : > { %1131 = vmatmul.bf16.gmra.mxu1 %v742_v22  ;;  %v598_v22 = vld [vmem:[%s4711_s25 + $0x140] sm:$0xff]  ;;  %v711_v27 = vpack.c.bf16 %v611_v21, %v607_v20 }
  0x8f   : > { %3869 = vmatmul.msk.bf16.gmra.mxu3 %vm998_vm1, %v713_v23  ;;  %v602_v23 = vld [vmem:[%s4711_s25 + $0x160] sm:$0xff] }
  0x90   : > { %v706_v24 = vpack.c.bf16 %v602_v23, %v598_v22  ;;  %v673_v23 = vld [vmem:[%s4711_s25 + $0x398] sm:$0xff] }
  0x92   : > { %1086 = vmatmul.bf16.gmra.mxu0 %v706_v24  ;;  %v677_v24 = vld [vmem:[%s4711_s25 + $0x3b8] sm:$0xff] }
  0x9c   : > { %1269 = vmatmul.bf16.gmra.mxu2 %v712_v38 }
  0x9d   : > { %1136 = vmatmul.bf16.gmra.mxu1 %v746_v34  ;;  %v733_v34 = vpack.c.bf16 %v653_v30, %v649_v29  ;;  %v745_v30 = vpack.c.bf16 %v677_v24, %v673_v23 }
  0x9f   : > { %3870 = vmatmul.msk.bf16.gmra.mxu3 %vm998_vm1, %v717_v35  ;;  %v4237_v35 = vld [vmem:[%s6261_s3 + $0x8] sm:$0xff] }
  0xa0   : > { %1531 = vmatpush.bf16.msrb.mxu3 %v4237_v35  ;;  %v636_v35 = vld [vmem:[%s4711_s25 + $0x270] sm:$0xff] }
  0xa2   : > { %1091 = vmatmul.bf16.gmra.mxu0 %v710_v41  ;;  %v615_v41 = vld [vmem:[%s4711_s25 + $0x1c8] sm:$0xff] }
  0xa4   : > { %1532 = vmatpush.bf16.msrb.mxu3 %v4236_v11  ;;  %v4985_v11 = vld [vmem:[%s6260_s2] ss:$0 sm:$0xff] }
  0xaa   : > { %v4841_v48 = vpop.f32.mrf.mxu1 }
  0xab   : > { %v1062_v22 = vpop.f32.mrf.mxu0 }
  0xac   : > { %1274 = vmatmul.bf16.gmra.mxu2 %v716_v55 }
  0xad   : > { %1150 = vmatmul.bf16.vlgmr.msrb.gmra.mxu1 %v687_v47  ;;  %v661_v47 = vld [vmem:[%s4711_s25 + $0x338] sm:$0xff] }
  0xae   : > { %v737_v52 = vpack.c.bf16 %v661_v47, %v657_v46  ;;  %v685_v46 = vld [vmem:[%s4711_s25 + $0x3f8] sm:$0xff] }
  0xaf   : > { %3871 = vmatmul.msk.bf16.gmra.mxu3 %vm998_vm1, %v721_v49  ;;  %v703_v49 = vpack.c.bf16 %v595_v45, %v591_v44  ;;  %v619_v44 = vld [vmem:[%s4711_s25 + $0x1e8] sm:$0xff]  ;;  %v681_v45 = vld [vmem:[%s4711_s25 + $0x3d8] sm:$0xff] }
  0xb0   : > { %v715_v47 = vpack.c.bf16 %v619_v44, %v615_v41  ;;  %v749_v53 = vpack.c.bf16 %v685_v46, %v681_v45 }
  0xb2   : > { %v4848_v56 = vpop.f32.mrf.mxu1  ;;  %v4850_v57 = vpop.f32.mrf.mxu3  ;;  %1096 = vmatmul.bf16.gmra.mxu0 %v714_v60  ;;  %v728_v60 = vpack.c.bf16 %v644_v59, %v640_v58  ;;  %v631_v59 = vld [vmem:[%s4711_s25 + $0x248] sm:$0xff] }
  0xb3   : > { %v1064_v37 = vpop.f32.mrf.mxu0 }
  0xb4   : > { %v1065_v41 = vadd.f32 %v4985_v11, %v1064_v37 }
  0xba   : > { %v4856_v63 = vpop.f32.mrf.mxu1  ;;  %v4858_v0 = vpop.f32.mrf.mxu3 }
  0xbb   : > { %v1067_v54 = vpop.f32.mrf.mxu0 }
  0xbc   : > { %1279 = vmatmul.bf16.gmra.mxu2 %v720_v14  ;;  %v1063_v14 = vadd.f32 %v4985_v11, %v1062_v22 }
  0xbd   : > { %1155 = vmatmul.bf16.gmra.mxu1 %v691_v62 }
  0xbf   : > { %3872 = vmatmul.msk.bf16.gmra.mxu3 %vm998_vm1, %v725_v1  ;;  %v599_v1 = vld [vmem:[%s4711_s25 + $0x148] sm:$0xff]  ;;  %v1240_v19 = vpop.f32.mrf.mxu2 }
  0xc0   : > { %v707_v5 = vpack.c.bf16 %v603_v2, %v599_v1 }
  0xc2   : > { %v4868_v9 = vpop.f32.mrf.mxu1  ;;  %v4870_v10 = vpop.f32.mrf.mxu3 }
  0xc3   : > { %v1069_v4 = vpop.f32.mrf.mxu0 }
  0xca   : > { %v4876_v16 = vpop.f32.mrf.mxu1  ;;  %v4878_v17 = vpop.f32.mrf.mxu3 }
  0xcd   : > { %1160 = vmatmul.bf16.gmra.mxu1 %v695_v15 }
  0xcf   : > { %3873 = vmatmul.msk.bf16.gmra.mxu3 %vm998_vm1, %v729_v18 }
  0xd2   : > { %v4885_v25 = vpop.f32.mrf.mxu1  ;;  %v4887_v26 = vpop.f32.mrf.mxu3 }
  0xda   : > { %v4893_v32 = vpop.f32.mrf.mxu1  ;;  %v4895_v33 = vpop.f32.mrf.mxu3 }
  0xdd   : > { %1165 = vmatmul.bf16.gmra.mxu1 %v699_v31  ;;  %v1242_v31 = vpop.f32.mrf.mxu2 }
  0xdf   : > { %3874 = vmatmul.msk.bf16.gmra.mxu3 %vm998_vm1, %v733_v34  ;;  %v632_v34 = vld [vmem:[%s4711_s25 + $0x250] sm:$0xff] }
  0xe0   : > { %v724_v36 = vpack.c.bf16 %v636_v35, %v632_v34  ;;  %v652_v34 = vld [vmem:[%s4711_s25 + $0x2f0] sm:$0xff]  ;;  %v1072_v35 = vpop.f32.mrf.mxu0 }
  0xe2   : > { %v4905_v42 = vpop.f32.mrf.mxu1  ;;  %v4907_v43 = vpop.f32.mrf.mxu3  ;;  %1284 = vmatmul.bf16.gmra.mxu2 %v724_v36 }
  0xe5   : > { %v4959_v40 = vpop.f32.mrf.mxu2 }
  0xea   : > { %v4913_v50 = vpop.f32.mrf.mxu1  ;;  %v4915_v51 = vpop.f32.mrf.mxu3 }
  0xed   : > { %1170 = vmatmul.bf16.gmra.mxu1 %v703_v49  ;;  %v4969_v55 = vpop.f32.mrf.mxu2 }
  0xef   : > { %3875 = vmatmul.msk.bf16.gmra.mxu3 %vm998_vm1, %v737_v52 }
  0xf2   : > { %v4922_v61 = vpop.f32.mrf.mxu1  ;;  %v4924_v62 = vpop.f32.mrf.mxu3  ;;  %1289 = vmatmul.bf16.gmra.mxu2 %v728_v60  ;;  %v635_v60 = vld [vmem:[%s4711_s25 + $0x268] sm:$0xff] }
  0xf3   : > { %v723_v13 = vpack.c.bf16 %v635_v60, %v631_v59  ;;  %v639_v60 = vld [vmem:[%s4711_s25 + $0x288] sm:$0xff] }
  0xf5   : > { %v4978_v3 = vpop.f32.mrf.mxu2 }
  0xfa   : > { %v4930_v6 = vpop.f32.mrf.mxu1  ;;  %v4932_v7 = vpop.f32.mrf.mxu3 }
  0xfd   : > { %1175 = vmatmul.bf16.gmra.mxu1 %v707_v5  ;;  %v623_v5 = vld [vmem:[%s4711_s25 + $0x208] sm:$0xff]  ;;  %v4997_v24 = vpop.f32.mrf.mxu2 }
  0xff   : > { %3876 = vmatmul.msk.bf16.gmra.mxu3 %vm998_vm1, %v741_v8  ;;  %v627_v8 = vld [vmem:[%s4711_s25 + $0x228] sm:$0xff] }
 0x100   : > { %v719_v20 = vpack.c.bf16 %v627_v8, %v623_v5  ;;  %v1068_v8 = vadd.f32 %v4985_v11, %v1067_v54 }
 0x102   : > { %v4940_v15 = vpop.f32.mrf.mxu1  ;;  %v4942_v18 = vpop.f32.mrf.mxu3 }
 0x10a   : > { %v4948_v28 = vpop.f32.mrf.mxu1  ;;  %v4950_v29 = vpop.f32.mrf.mxu3 }
 0x10d   : > { %1180 = vmatmul.bf16.gmra.mxu1 %v711_v27 }
 0x10f   : > { %3877 = vmatmul.msk.bf16.gmra.mxu3 %vm998_vm1, %v745_v30  ;;  %v648_v30 = vld [vmem:[%s4711_s25 + $0x2d0] sm:$0xff] }
 0x110   : > { %v732_v36 = vpack.c.bf16 %v652_v34, %v648_v30  ;;  %v660_v30 = vld [vmem:[%s4711_s25 + $0x330] sm:$0xff] }
 0x112   : > { %v4955_v38 = vpop.f32.mrf.mxu1  ;;  %v4957_v39 = vpop.f32.mrf.mxu3  ;;  %1294 = vmatmul.bf16.gmra.mxu2 %v732_v36  ;;  %v1070_v36 = vadd.f32 %v4985_v11, %v1069_v4 }
 0x11a   : > { %v4965_v49 = vpop.f32.mrf.mxu1  ;;  %v4967_v52 = vpop.f32.mrf.mxu3 }
 0x11d   : > { %1185 = vmatmul.bf16.gmra.mxu1 %v715_v47  ;;  %v5004_v47 = vpop.f32.mrf.mxu2 }
 0x11f   : > { %3878 = vmatmul.msk.bf16.gmra.mxu3 %vm998_vm1, %v749_v53 }
 0x122   : > { %v4974_v1 = vpop.f32.mrf.mxu1  ;;  %v4976_v2 = vpop.f32.mrf.mxu3 }
 0x12a   : > { %v1151_v21 = vpop.f32.mrf.mxu1  ;;  %v4995_v23 = vpop.f32.mrf.mxu3 }
 0x12b   : > { %v1152_v27 = vadd.f32 %v1151_v21, %v1063_v14  ;;  %v1074_v14 = vpop.f32.mrf.mxu0  ;;  %v5016_v21 = vpop.f32.mrf.mxu2 }
 0x12d   : > { %1190 = vmatmul.bf16.gmra.mxu1 %v719_v20  ;;  %v1241_v44 = vadd.f32 %v1240_v19, %v1152_v27  ;;  %v1652_v19 = vld [vmem:[%s6263_s5 + $0x30] sm:$0xff] }
 0x12e   : > { %1764 = vmatpush.msrb.mxu0 %v1652_v19 }
 0x12f   : > { %v1330_v53 = vadd.f32 %v4850_v57, %v1241_v44 }
 0x131   : > { %v1409_v37 = vmax.f32 %v1330_v53, 0.0 }
 0x132   : > { %v1153_v45 = vpop.f32.mrf.mxu1  ;;  %v5002_v22 = vpop.f32.mrf.mxu3 }
 0x133   : > { %v1154_v46 = vadd.f32 %v1153_v45, %v1065_v41  ;;  %v5024_v53 = vpop.f32.mrf.mxu2 }
 0x135   : > { %v1243_v58 = vadd.f32 %v1242_v31, %v1154_v46  ;;  %v1077_v46 = vpop.f32.mrf.mxu0 }
 0x137   : > { %v1332_v5 = vadd.f32 %v4858_v0, %v1243_v58  ;;  %v656_v0 = vld [vmem:[%s4711_s25 + $0x310] sm:$0xff] }
 0x138   : > { %v736_v34 = vpack.c.bf16 %v660_v30, %v656_v0  ;;  %v668_v0 = vld [vmem:[%s4711_s25 + $0x370] sm:$0xff] }
 0x139   : > { %v1410_v12 = vmax.f32 %v1332_v5, 0.0  ;;  %v643_v5 = vld [vmem:[%s4711_s25 + $0x2a8] sm:$0xff] }
 0x13a   : > { %v1156_v20 = vpop.f32.mrf.mxu1  ;;  %v5014_v57 = vpop.f32.mrf.mxu3  ;;  %1299 = vmatmul.bf16.gmra.mxu2 %v736_v34  ;;  %v1075_v34 = vadd.f32 %v4985_v11, %v1074_v14 }
 0x13b   : > { %v1458_v31 = vpack.c.bf16 %v1410_v12, %v1409_v37  ;;  %v1157_v27 = vadd.f32 %v1156_v20, %v1068_v8  ;;  %v1073_v37 = vadd.f32 %v4985_v11, %v1072_v35  ;;  %v727_v8 = vpack.c.bf16 %v643_v5, %v639_v60  ;;  %v5037_v20 = vpop.f32.mrf.mxu2  ;;  %v647_v60 = vld [vmem:[%s4711_s25 + $0x2c8] sm:$0xff] }
 0x13c   : > { %v651_v5 = vld [vmem:[%s4711_s25 + $0x2e8] sm:$0xff] }
 0x13d   : > { %1195 = vmatmul.bf16.gmra.mxu1 %v723_v13  ;;  %1533 = vmatmul.bf16.vlgmr.msrb.gmra.mxu3 %v1458_v31  ;;  %v1246_v54 = vadd.f32 %v4959_v40, %v1157_v27  ;;  %v1651_v40 = vld [vmem:[%s6263_s5 + $0x28] sm:$0xff]  ;;  %v664_v27 = vld [vmem:[%s4711_s25 + $0x350] sm:$0xff] }
 0x13e   : > { %1765 = vmatpush.msrb.mxu0 %v1651_v40  ;;  %v740_v30 = vpack.c.bf16 %v668_v0, %v664_v27 }
 0x13f   : > { %v1335_v58 = vadd.f32 %v4870_v10, %v1246_v54 }
 0x141   : > { %v1411_v4 = vmax.f32 %v1335_v58, 0.0 }
 0x142   : > { %v1158_v41 = vpop.f32.mrf.mxu1  ;;  %v5022_v44 = vpop.f32.mrf.mxu3 }
 0x143   : > { %v1159_v45 = vadd.f32 %v1158_v41, %v1070_v36 }
 0x145   : > { %v1248_v59 = vadd.f32 %v4969_v55, %v1159_v45  ;;  %v5045_v45 = vpop.f32.mrf.mxu2 }
 0x147   : > { %v1337_v19 = vadd.f32 %v4878_v17, %v1248_v59  ;;  %v1079_v17 = vpop.f32.mrf.mxu0 }
 0x148   : > { %v1080_v0 = vadd.f32 %v4985_v11, %v1079_v17 }
 0x149   : > { %v1412_v12 = vmax.f32 %v1337_v19, 0.0 }
 0x14a   : > { %v1161_v13 = vpop.f32.mrf.mxu1  ;;  %v5035_v10 = vpop.f32.mrf.mxu3  ;;  %1304 = vmatmul.bf16.gmra.mxu2 %v740_v30 }
 0x14b   : > { %v1459_v55 = vpack.c.bf16 %v1412_v12, %v1411_v4  ;;  %v1162_v31 = vadd.f32 %v1161_v13, %v1073_v37  ;;  %v1078_v4 = vadd.f32 %v4985_v11, %v1077_v46  ;;  %v731_v37 = vpack.c.bf16 %v651_v5, %v647_v60  ;;  %v659_v60 = vld [vmem:[%s4711_s25 + $0x328] sm:$0xff] }
 0x14d   : > { %1200 = vmatmul.bf16.gmra.mxu1 %v727_v8  ;;  %1538 = vmatmul.bf16.gmra.mxu3 %v1459_v55  ;;  %v1251_v35 = vadd.f32 %v4978_v3, %v1162_v31  ;;  %v1650_v3 = vld [vmem:[%s6263_s5 + $0x20] sm:$0xff]  ;;  %v5058_v13 = vpop.f32.mrf.mxu2  ;;  %v672_v55 = vld [vmem:[%s4711_s25 + $0x390] sm:$0xff] }
 0x14e   : > { %1766 = vmatpush.msrb.mxu0 %v1650_v3  ;;  %v676_v31 = vld [vmem:[%s4711_s25 + $0x3b0] sm:$0xff] }
 0x14f   : > { %v1340_v58 = vadd.f32 %v4887_v26, %v1251_v35  ;;  %v1082_v14 = vpop.f32.mrf.mxu0  ;;  %v744_v27 = vpack.c.bf16 %v676_v31, %v672_v55 }
 0x150   : > { %v1083_v3 = vadd.f32 %v4985_v11, %v1082_v14 }
 0x151   : > { %v1413_v40 = vmax.f32 %v1340_v58, 0.0 }
 0x152   : > { %v1163_v36 = vpop.f32.mrf.mxu1  ;;  %v5043_v54 = vpop.f32.mrf.mxu3 }
 0x153   : > { %v1164_v41 = vadd.f32 %v1163_v36, %v1075_v34 }
 0x155   : > { %v1253_v59 = vadd.f32 %v4997_v24, %v1164_v41  ;;  %v5070_v5 = vpop.f32.mrf.mxu2 }
 0x157   : > { %v1342_v19 = vadd.f32 %v4895_v33, %v1253_v59  ;;  %v1084_v30 = vpop.f32.mrf.mxu0  ;;  %v655_v59 = vld [vmem:[%s4711_s25 + $0x308] sm:$0xff] }
 0x158   : > { %v1085_v31 = vadd.f32 %v4985_v11, %v1084_v30  ;;  %v1648_v30 = vld [vmem:[%s6263_s5 + $0x10] sm:$0xff] }
 0x159   : > { %v1414_v8 = vmax.f32 %v1342_v19, 0.0 }
 0x15a   : > { %v1166_v26 = vpop.f32.mrf.mxu1  ;;  %v5056_v12 = vpop.f32.mrf.mxu3  ;;  %1309 = vmatmul.bf16.gmra.mxu2 %v744_v27 }
 0x15b   : > { %v1460_v24 = vpack.c.bf16 %v1414_v8, %v1413_v40  ;;  %v1167_v33 = vadd.f32 %v1166_v26, %v1078_v4  ;;  %v735_v40 = vpack.c.bf16 %v659_v60, %v655_v59  ;;  %v667_v59 = vld [vmem:[%s4711_s25 + $0x368] sm:$0xff] }
 0x15d   : > { %1205 = vmatmul.bf16.gmra.mxu1 %v731_v37  ;;  %1543 = vmatmul.bf16.gmra.mxu3 %v1460_v24  ;;  %v1256_v46 = vadd.f32 %v5004_v47, %v1167_v33  ;;  %v1649_v47 = vld [vmem:[%s6263_s5 + $0x18] sm:$0xff]  ;;  %v684_v24 = vld [vmem:[%s4711_s25 + $0x3f0] sm:$0xff]  ;;  %v1272_v55 = vpop.f32.mrf.mxu2 }
 0x15e   : > { %1767 = vmatpush.msrb.mxu0 %v1649_v47 }
 0x15f   : > { %v1345_v41 = vadd.f32 %v4907_v43, %v1256_v46  ;;  %v1087_v8 = vpop.f32.mrf.mxu0 }
 0x160   : > { %1768 = vmatpush.msrb.mxu0 %v1648_v30 }
 0x161   : > { %v1415_v19 = vmax.f32 %v1345_v41, 0.0 }
 0x162   : > { %v1168_v34 = vpop.f32.mrf.mxu1  ;;  %v5064_v35 = vpop.f32.mrf.mxu3 }
 0x163   : > { %v1169_v36 = vadd.f32 %v1168_v34, %v1080_v0 }
 0x165   : > { %v1258_v58 = vadd.f32 %v5016_v21, %v1169_v36 }
 0x167   : > { %v1347_v17 = vadd.f32 %v4915_v51, %v1258_v58  ;;  %v680_v51 = vld [vmem:[%s4711_s25 + $0x3d0] sm:$0xff]  ;;  %v1089_v41 = vpop.f32.mrf.mxu0  ;;  %v663_v58 = vld [vmem:[%s4711_s25 + $0x348] sm:$0xff] }
 0x168   : > { %v748_v33 = vpack.c.bf16 %v684_v24, %v680_v51 }
 0x169   : > { %v1416_v43 = vmax.f32 %v1347_v17, 0.0  ;;  %v739_v17 = vpack.c.bf16 %v667_v59, %v663_v58 }
 0x16a   : > { %v1171_v4 = vpop.f32.mrf.mxu1  ;;  %v5077_v21 = vpop.f32.mrf.mxu3  ;;  %1314 = vmatmul.bf16.gmra.mxu2 %v748_v33 }
 0x16b   : > { %v1461_v37 = vpack.c.bf16 %v1416_v43, %v1415_v19  ;;  %v1172_v26 = vadd.f32 %v1171_v4, %v1083_v3  ;;  %v1090_v4 = vadd.f32 %v4985_v11, %v1089_v41 }
 0x16d   : > { %1210 = vmatmul.bf16.gmra.mxu1 %v735_v40  ;;  %1548 = vmatmul.bf16.gmra.mxu3 %v1461_v37  ;;  %v1261_v14 = vadd.f32 %v5024_v53, %v1172_v26  ;;  %v1088_v53 = vadd.f32 %v4985_v11, %v1087_v8 }
 0x16f   : > { %v1350_v34 = vadd.f32 %v4924_v62, %v1261_v14  ;;  %v1275_v62 = vpop.f32.mrf.mxu2  ;;  %v671_v14 = vld [vmem:[%s4711_s25 + $0x388] sm:$0xff] }
 0x171   : > { %v1417_v47 = vmax.f32 %v1350_v34, 0.0  ;;  %v1647_v34 = vld [vmem:[%s6263_s5 + $0x8] sm:$0xff] }
 0x172   : > { %v1173_v27 = vpop.f32.mrf.mxu1  ;;  %v5083_v0 = vpop.f32.mrf.mxu3  ;;  %1769 = vmatpush.msrb.mxu0 %v1647_v34 }
 0x173   : > { %v1174_v46 = vadd.f32 %v1173_v27, %v1085_v31  ;;  %v675_v27 = vld [vmem:[%s4711_s25 + $0x3a8] sm:$0xff] }
 0x175   : > { %v1263_v36 = vadd.f32 %v5037_v20, %v1174_v46 }
 0x177   : > { %v1352_v60 = vadd.f32 %v4932_v7, %v1263_v36  ;;  %v1092_v7 = vpop.f32.mrf.mxu0  ;;  %v1277_v51 = vpop.f32.mrf.mxu2  ;;  %v743_v36 = vpack.c.bf16 %v675_v27, %v671_v14 }
 0x179   : > { %v1418_v19 = vmax.f32 %v1352_v60, 0.0 }
 0x17a   : > { %v1176_v3 = vpop.f32.mrf.mxu1  ;;  %v5094_v40 = vpop.f32.mrf.mxu3 }
 0x17b   : > { %v1462_v20 = vpack.c.bf16 %v1418_v19, %v1417_v47  ;;  %v1177_v43 = vadd.f32 %v1176_v3, %v1088_v53 }
 0x17d   : > { %1215 = vmatmul.bf16.gmra.mxu1 %v739_v17  ;;  %1553 = vmatmul.bf16.gmra.mxu3 %v1462_v20  ;;  %v1266_v37 = vadd.f32 %v5045_v45, %v1177_v43  ;;  %v1093_v45 = vadd.f32 %v4985_v11, %v1092_v7  ;;  %v679_v7 = vld [vmem:[%s4711_s25 + $0x3c8] sm:$0xff] }
 0x17f   : > { %v1355_v24 = vadd.f32 %v4942_v18, %v1266_v37  ;;  %v1094_v18 = vpop.f32.mrf.mxu0  ;;  %v1280_v30 = vpop.f32.mrf.mxu2 }
 0x180   : > { %v1095_v53 = vadd.f32 %v4985_v11, %v1094_v18 }
 0x181   : > { %v1419_v41 = vmax.f32 %v1355_v24, 0.0 }
 0x182   : > { %v1178_v26 = vpop.f32.mrf.mxu1  ;;  %v5100_v31 = vpop.f32.mrf.mxu3 }
 0x183   : > { %v1179_v8 = vadd.f32 %v1178_v26, %v1090_v4  ;;  %v683_v4 = vld [vmem:[%s4711_s25 + $0x3e8] sm:$0xff]  ;;  %v1646_v26 = vld [vmem:[%s6263_s5] sm:$0xff] }
 0x184   : > { %1770 = vmatpush.msrb.mxu0 %v1646_v26 }
 0x185   : > { %v1268_v33 = vadd.f32 %v5058_v13, %v1179_v8 }
 0x187   : > { %v1357_v46 = vadd.f32 %v4950_v29, %v1268_v33  ;;  %v1097_v3 = vpop.f32.mrf.mxu0  ;;  %v1282_v8 = vpop.f32.mrf.mxu2  ;;  %v747_v33 = vpack.c.bf16 %v683_v4, %v679_v7 }
 0x188   : > { %v1098_v24 = vadd.f32 %v4985_v11, %v1097_v3 }
 0x189   : > { %v1420_v58 = vmax.f32 %v1357_v46, 0.0 }
 0x18a   : > { %v1181_v13 = vpop.f32.mrf.mxu1  ;;  %v5109_v29 = vpop.f32.mrf.mxu3 }
 0x18b   : > { %v1463_v59 = vpack.c.bf16 %v1420_v58, %v1419_v41  ;;  %v1182_v60 = vadd.f32 %v1181_v13, %v1093_v45 }
 0x18d   : > { %1220 = vmatmul.bf16.gmra.mxu1 %v743_v36  ;;  %1558 = vmatmul.bf16.gmra.mxu3 %v1463_v59  ;;  %v1271_v17 = vadd.f32 %v5070_v5, %v1182_v60 }
 0x18f   : > { %v1360_v20 = vadd.f32 %v4957_v39, %v1271_v17  ;;  %v1099_v34 = vpop.f32.mrf.mxu0  ;;  %v1285_v41 = vpop.f32.mrf.mxu2  ;;  %v2120_v17 = vld [vmem:[%s6267_s9] sm:$0x3] }
 0x190   : > { %3976 = vmatpush.msk.msrb.mxu2 %vm2222_vm3, %v2120_v17 }
 0x191   : > { %v1421_v5 = vmax.f32 %v1360_v20, 0.0 }
 0x192   : > { %v1183_v47 = vpop.f32.mrf.mxu1  ;;  %v5121_v27 = vpop.f32.mrf.mxu3 }
 0x193   : > { %v1184_v19 = vadd.f32 %v1183_v47, %v1095_v53  ;;  %v1900_v53 = vld [vmem:[%s6265_s7] sm:$0xff] }
 0x194   : > { %2022 = vmatpush.msra.mxu1 %v1900_v53 }
 0x195   : > { %v1273_v43 = vadd.f32 %v1272_v55, %v1184_v19 }
 0x197   : > { %v1362_v37 = vadd.f32 %v4967_v52, %v1273_v43  ;;  %v1100_v52 = vadd.f32 %v4985_v11, %v1099_v34  ;;  %v1287_v3 = vpop.f32.mrf.mxu2  ;;  %v1105_v43 = vadd.f32 %v4985_v11, %v4848_v56  ;;  %v5149_v56 = vld [vmem:[%s6262_s4] ss:$0 sm:$0xff] }
 0x199   : > { %v1422_v14 = vmax.f32 %v1362_v37, 0.0 }
 0x19a   : > { %v1186_v46 = vpop.f32.mrf.mxu1  ;;  %v5124_v18 = vpop.f32.mrf.mxu3 }
 0x19b   : > { %v1464_v39 = vpack.c.bf16 %v1422_v14, %v1421_v5  ;;  %v1187_v55 = vadd.f32 %v1186_v46, %v1098_v24 }
 0x19d   : > { %1225 = vmatmul.bf16.gmra.mxu1 %v747_v33  ;;  %1563 = vmatmul.bf16.gmra.mxu3 %v1464_v39  ;;  %v1276_v45 = vadd.f32 %v1275_v62, %v1187_v55  ;;  %v1108_v55 = vadd.f32 %v4985_v11, %v4856_v63 }
 0x19f   : > { %v1365_v13 = vadd.f32 %v4976_v2, %v1276_v45  ;;  %v1103_v2 = vadd.f32 %v4985_v11, %v4841_v48  ;;  %v1290_v33 = vpop.f32.mrf.mxu2 }
 0x1a1   : > { %v1423_v62 = vmax.f32 %v1365_v13, 0.0 }
 0x1a2   : > { %v1188_v36 = vpop.f32.mrf.mxu1  ;;  %v5136_v20 = vpop.f32.mrf.mxu3 }
 0x1a3   : > { %v1189_v58 = vadd.f32 %v1188_v36, %v1100_v52 }
 0x1a5   : > { %v1278_v59 = vadd.f32 %v1277_v51, %v1189_v58 }
 0x1a7   : > { %v1367_v60 = vadd.f32 %v4995_v23, %v1278_v59 }
 0x1a9   : > { %v1424_v47 = vmax.f32 %v1367_v60, 0.0 }
 0x1aa   : > { %v1191_v19 = vpop.f32.mrf.mxu1  ;;  %v5142_v14 = vpop.f32.mrf.mxu3 }
 0x1ab   : > { %v1465_v51 = vpack.c.bf16 %v1424_v47, %v1423_v62  ;;  %v1192_v23 = vadd.f32 %v1191_v19, %v1103_v2  ;;  %v1113_v19 = vadd.f32 %v4985_v11, %v4876_v16 }
 0x1ad   : > { %1568 = vmatmul.bf16.gmra.mxu3 %v1465_v51  ;;  %v1281_v7 = vadd.f32 %v1280_v30, %v1192_v23  ;;  %v1292_v30 = vpop.f32.mrf.mxu2 }
 0x1af   : > { %v1370_v26 = vadd.f32 %v5002_v22, %v1281_v7 }
 0x1b1   : > { %v1425_v48 = vmax.f32 %v1370_v26, 0.0 }
 0x1b2   : > { %v1193_v4 = vpop.f32.mrf.mxu1 }
 0x1b3   : > { %v1194_v37 = vadd.f32 %v1193_v4, %v1105_v43 }
 0x1b5   : > { %v1283_v24 = vadd.f32 %v1282_v8, %v1194_v37 }
 0x1b7   : > { %v1372_v5 = vadd.f32 %v5014_v57, %v1283_v24  ;;  %v1110_v57 = vadd.f32 %v4985_v11, %v4868_v9 }
 0x1b9   : > { %v1426_v46 = vmax.f32 %v1372_v5, 0.0 }
 0x1ba   : > { %v1196_v39 = vpop.f32.mrf.mxu1 }
 0x1bb   : > { %v1466_v34 = vpack.c.bf16 %v1426_v46, %v1425_v48  ;;  %v1197_v52 = vadd.f32 %v1196_v39, %v1108_v55 }
 0x1bd   : > { %1573 = vmatmul.bf16.gmra.mxu3 %v1466_v34  ;;  %v1286_v8 = vadd.f32 %v1285_v41, %v1197_v52  ;;  %v1295_v41 = vpop.f32.mrf.mxu2 }
 0x1bf   : > { %v1375_v13 = vadd.f32 %v5022_v44, %v1286_v8 }
 0x1c0   : > { %v1534_v22 = vpop.f32.mrf.mxu3 }
 0x1c1   : > { %v1535_v45 = vadd.f32 %v5149_v56, %v1534_v22  ;;  %v1427_v62 = vmax.f32 %v1375_v13, 0.0 }
 0x1c2   : > { %v1198_v36 = vpop.f32.mrf.mxu1 }
 0x1c3   : > { %v1614_v58 = vmax.f32 %v1535_v45, 0.0  ;;  %v1199_v63 = vadd.f32 %v1198_v36, %v1110_v57 }
 0x1c5   : > { %v1288_v59 = vadd.f32 %v1287_v3, %v1199_v63  ;;  %3911 = vmatmul.msk.f32.vlgmr.msrb.gmra.mxu0 %vm1658_vm4, %v1614_v58  ;;  %v1297_v26 = vpop.f32.mrf.mxu2 }
 0x1c7   : > { %v1377_v60 = vadd.f32 %v5035_v10, %v1288_v59  ;;  %v1115_v10 = vadd.f32 %v4985_v11, %v4885_v25 }
 0x1c8   : > { %v1536_v53 = vpop.f32.mrf.mxu3 }
 0x1c9   : > { %v1537_v17 = vadd.f32 %v5149_v56, %v1536_v53  ;;  %v1428_v47 = vmax.f32 %v1377_v60, 0.0 }
 0x1ca   : > { %v1201_v9 = vpop.f32.mrf.mxu1 }
 0x1cb   : > { %v1615_v2 = vmax.f32 %v1537_v17, 0.0  ;;  %v1467_v51 = vpack.c.bf16 %v1428_v47, %v1427_v62  ;;  %v1202_v23 = vadd.f32 %v1201_v9, %v1113_v19  ;;  %v1123_v47 = vadd.f32 %v4985_v11, %v4913_v50 }
 0x1cd   : > { %1578 = vmatmul.bf16.gmra.mxu3 %v1467_v51  ;;  %3912 = vmatmul.msk.f32.gmra.mxu0 %vm1658_vm4, %v1615_v2  ;;  %v1291_v3 = vadd.f32 %v1290_v33, %v1202_v23  ;;  %v1118_v33 = vadd.f32 %v4985_v11, %v4893_v32 }
 0x1cf   : > { %v1380_v24 = vadd.f32 %v5043_v54, %v1291_v3  ;;  %v1300_v54 = vpop.f32.mrf.mxu2 }
 0x1d0   : > { %v1539_v44 = vpop.f32.mrf.mxu3 }
 0x1d1   : > { %v1540_v43 = vadd.f32 %v5149_v56, %v1539_v44  ;;  %v1429_v39 = vmax.f32 %v1380_v24, 0.0 }
 0x1d2   : > { %v1203_v7 = vpop.f32.mrf.mxu1 }
 0x1d3   : > { %v1616_v4 = vmax.f32 %v1540_v43, 0.0  ;;  %v1204_v37 = vadd.f32 %v1203_v7, %v1115_v10 }
 0x1d5   : > { %v1293_v16 = vadd.f32 %v1292_v30, %v1204_v37  ;;  %3913 = vmatmul.msk.f32.gmra.mxu0 %vm1658_vm4, %v1616_v4 }
 0x1d7   : > { %v1382_v5 = vadd.f32 %v5056_v12, %v1293_v16  ;;  %v1120_v12 = vadd.f32 %v4985_v11, %v4905_v42  ;;  %v1302_v60 = vpop.f32.mrf.mxu2  ;;  %v1128_v16 = vadd.f32 %v4985_v11, %v4930_v6 }
 0x1d8   : > { %v1541_v48 = vpop.f32.mrf.mxu3 }
 0x1d9   : > { %v1542_v46 = vadd.f32 %v5149_v56, %v1541_v48  ;;  %v1430_v55 = vmax.f32 %v1382_v5, 0.0 }
 0x1da   : > { %v1206_v25 = vpop.f32.mrf.mxu1 }
 0x1db   : > { %v1617_v34 = vmax.f32 %v1542_v46, 0.0  ;;  %v1468_v52 = vpack.c.bf16 %v1430_v55, %v1429_v39  ;;  %v1207_v22 = vadd.f32 %v1206_v25, %v1118_v33 }
 0x1dd   : > { %1583 = vmatmul.bf16.gmra.mxu3 %v1468_v52  ;;  %3914 = vmatmul.msk.f32.gmra.mxu0 %vm1658_vm4, %v1617_v34  ;;  %v1296_v57 = vadd.f32 %v1295_v41, %v1207_v22 }
 0x1df   : > { %v1385_v63 = vadd.f32 %v5064_v35, %v1296_v57  ;;  %v1305_v44 = vpop.f32.mrf.mxu2 }
 0x1e0   : > { %v1544_v30 = vpop.f32.mrf.mxu3 }
 0x1e1   : > { %v1545_v8 = vadd.f32 %v5149_v56, %v1544_v30  ;;  %v1431_v17 = vmax.f32 %v1385_v63, 0.0 }
 0x1e2   : > { %v1208_v45 = vpop.f32.mrf.mxu1 }
 0x1e3   : > { %v1618_v36 = vmax.f32 %v1545_v8, 0.0  ;;  %v1209_v58 = vadd.f32 %v1208_v45, %v1120_v12 }
 0x1e5   : > { %v1298_v32 = vadd.f32 %v1297_v26, %v1209_v58  ;;  %3915 = vmatmul.msk.f32.gmra.mxu0 %vm1658_vm4, %v1618_v36  ;;  %v1133_v36 = vadd.f32 %v4985_v11, %v4948_v28 }
 0x1e7   : > { %v1387_v13 = vadd.f32 %v5077_v21, %v1298_v32  ;;  %v1125_v21 = vadd.f32 %v4985_v11, %v4922_v61  ;;  %v1307_v46 = vpop.f32.mrf.mxu2 }
 0x1e8   : > { %v1546_v59 = vpop.f32.mrf.mxu3 }
 0x1e9   : > { %v1547_v53 = vadd.f32 %v5149_v56, %v1546_v59  ;;  %v1432_v62 = vmax.f32 %v1387_v13, 0.0 }
 0x1ea   : > { %v1211_v42 = vpop.f32.mrf.mxu1 }
 0x1eb   : > { %v1619_v9 = vmax.f32 %v1547_v53, 0.0  ;;  %v1469_v41 = vpack.c.bf16 %v1432_v62, %v1431_v17  ;;  %v1212_v19 = vadd.f32 %v1211_v42, %v1123_v47 }
 0x1ed   : > { %1588 = vmatmul.bf16.gmra.mxu3 %v1469_v41  ;;  %3916 = vmatmul.msk.f32.gmra.mxu0 %vm1658_vm4, %v1619_v9  ;;  %v1301_v2 = vadd.f32 %v1300_v54, %v1212_v19 }
 0x1ef   : > { %v1390_v43 = vadd.f32 %v5083_v0, %v1301_v2  ;;  %v1310_v54 = vpop.f32.mrf.mxu2  ;;  %v1138_v2 = vadd.f32 %v4985_v11, %v4965_v49 }
 0x1f0   : > { %v1549_v35 = vpop.f32.mrf.mxu3 }
 0x1f1   : > { %v1550_v51 = vadd.f32 %v5149_v56, %v1549_v35  ;;  %v1433_v26 = vmax.f32 %v1390_v43, 0.0 }
 0x1f2   : > { %v1213_v23 = vpop.f32.mrf.mxu1 }
 0x1f3   : > { %v1620_v10 = vmax.f32 %v1550_v51, 0.0  ;;  %v1214_v3 = vadd.f32 %v1213_v23, %v1125_v21 }
 0x1f5   : > { %v1303_v50 = vadd.f32 %v1302_v60, %v1214_v3  ;;  %3917 = vmatmul.msk.f32.gmra.mxu0 %vm1658_vm4, %v1620_v10 }
 0x1f7   : > { %v1392_v7 = vadd.f32 %v5094_v40, %v1303_v50  ;;  %v1130_v40 = vadd.f32 %v4985_v11, %v4940_v15 }
 0x1f8   : > { %v1551_v4 = vpop.f32.mrf.mxu3 }
 0x1f9   : > { %v1552_v37 = vadd.f32 %v5149_v56, %v1551_v4  ;;  %v1434_v24 = vmax.f32 %v1392_v7, 0.0 }
 0x1fa   : > { %v1216_v61 = vpop.f32.mrf.mxu1 }
 0x1fb   : > { %v1621_v5 = vmax.f32 %v1552_v37, 0.0  ;;  %v1470_v48 = vpack.c.bf16 %v1434_v24, %v1433_v26  ;;  %v1217_v39 = vadd.f32 %v1216_v61, %v1128_v16 }
 0x1fd   : > { %1593 = vmatmul.bf16.gmra.mxu3 %v1470_v48  ;;  %3918 = vmatmul.msk.f32.gmra.mxu0 %vm1658_vm4, %v1621_v5  ;;  %v1306_v55 = vadd.f32 %v1305_v44, %v1217_v39 }
 0x1ff   : > { %v1395_v22 = vadd.f32 %v5100_v31, %v1306_v55  ;;  %v1312_v31 = vpop.f32.mrf.mxu2 }
 0x200   : > { %v1554_v0 = vpop.f32.mrf.mxu3 }
 0x201   : > { %v1555_v25 = vadd.f32 %v5149_v56, %v1554_v0  ;;  %v1435_v8 = vmax.f32 %v1395_v22, 0.0 }
 0x202   : > { %v1218_v33 = vpop.f32.mrf.mxu1 }
 0x203   : > { %v1622_v34 = vmax.f32 %v1555_v25, 0.0  ;;  %v1219_v52 = vadd.f32 %v1218_v33, %v1130_v40  ;;  %v5226_v40 = vld [vmem:[%s6264_s6] ss:$0 sm:$0xff] }
 0x205   : > { %v1308_v6 = vadd.f32 %v1307_v46, %v1219_v52  ;;  %3919 = vmatmul.msk.f32.gmra.mxu0 %vm1658_vm4, %v1622_v34 }
 0x207   : > { %v1397_v30 = vadd.f32 %v5109_v29, %v1308_v6  ;;  %v1135_v29 = vadd.f32 %v4985_v11, %v4955_v38  ;;  %v1315_v21 = vpop.f32.mrf.mxu2 }
 0x208   : > { %v1556_v12 = vpop.f32.mrf.mxu3 }
 0x209   : > { %v1557_v57 = vadd.f32 %v5149_v56, %v1556_v12  ;;  %v1436_v45 = vmax.f32 %v1397_v30, 0.0 }
 0x20a   : > { %v1221_v15 = vpop.f32.mrf.mxu1 }
 0x20b   : > { %v1623_v58 = vmax.f32 %v1557_v57, 0.0  ;;  %v1471_v63 = vpack.c.bf16 %v1436_v45, %v1435_v8  ;;  %v1222_v32 = vadd.f32 %v1221_v15, %v1133_v36 }
 0x20d   : > { %1598 = vmatmul.bf16.gmra.mxu3 %v1471_v63  ;;  %3920 = vmatmul.msk.f32.gmra.mxu0 %vm1658_vm4, %v1623_v58  ;;  %v1311_v59 = vadd.f32 %v1310_v54, %v1222_v32 }
 0x20f   : > { %v1400_v42 = vadd.f32 %v5121_v27, %v1311_v59  ;;  %v1317_v4 = vpop.f32.mrf.mxu2 }
 0x210   : > { %v1559_v13 = vpop.f32.mrf.mxu3 }
 0x211   : > { %v1560_v60 = vadd.f32 %v5149_v56, %v1559_v13  ;;  %v1437_v19 = vmax.f32 %v1400_v42, 0.0 }
 0x212   : > { %v1223_v53 = vpop.f32.mrf.mxu1 }
 0x213   : > { %v1624_v17 = vmax.f32 %v1560_v60, 0.0  ;;  %v1224_v62 = vadd.f32 %v1223_v53, %v1135_v29 }
 0x215   : > { %v1313_v28 = vadd.f32 %v1312_v31, %v1224_v62  ;;  %3921 = vmatmul.msk.f32.gmra.mxu0 %vm1658_vm4, %v1624_v17 }
 0x217   : > { %v1402_v47 = vadd.f32 %v5124_v18, %v1313_v28  ;;  %v1140_v18 = vadd.f32 %v4985_v11, %v4974_v1 }
 0x218   : > { %v1561_v9 = vpop.f32.mrf.mxu3 }
 0x219   : > { %v1562_v41 = vadd.f32 %v5149_v56, %v1561_v9  ;;  %v1438_v35 = vmax.f32 %v1402_v47, 0.0 }
 0x21a   : > { %v1226_v38 = vpop.f32.mrf.mxu1 }
 0x21b   : > { %v1625_v51 = vmax.f32 %v1562_v41, 0.0  ;;  %v1472_v23 = vpack.c.bf16 %v1438_v35, %v1437_v19  ;;  %v1227_v44 = vadd.f32 %v1226_v38, %v1138_v2 }
 0x21d   : > { %1603 = vmatmul.bf16.gmra.mxu3 %v1472_v23  ;;  %3922 = vmatmul.msk.f32.gmra.mxu0 %vm1658_vm4, %v1625_v51  ;;  %v1316_v10 = vadd.f32 %v1315_v21, %v1227_v44 }
 0x21f   : > { %v1405_v37 = vadd.f32 %v5136_v20, %v1316_v10 }
 0x220   : > { %v1564_v27 = vpop.f32.mrf.mxu3 }
 0x221   : > { %v1565_v3 = vadd.f32 %v5149_v56, %v1564_v27  ;;  %v1439_v16 = vmax.f32 %v1405_v37, 0.0 }
 0x222   : > { %v1228_v43 = vpop.f32.mrf.mxu1 }
 0x223   : > { %v1626_v50 = vmax.f32 %v1565_v3, 0.0  ;;  %v1229_v7 = vadd.f32 %v1228_v43, %v1140_v18 }
 0x225   : > { %v1318_v49 = vadd.f32 %v1317_v4, %v1229_v7  ;;  %3923 = vmatmul.msk.f32.gmra.mxu0 %vm1658_vm4, %v1626_v50 }
 0x227   : > { %v1407_v26 = vadd.f32 %v5142_v14, %v1318_v49 }
 0x228   : > { %v1566_v24 = vpop.f32.mrf.mxu3 }
 0x229   : > { %v1567_v61 = vadd.f32 %v5149_v56, %v1566_v24  ;;  %v1440_v5 = vmax.f32 %v1407_v26, 0.0 }
 0x22b   : > { %v1627_v1 = vmax.f32 %v1567_v61, 0.0  ;;  %v1473_v11 = vpack.c.bf16 %v1440_v5, %v1439_v16 }
 0x22d   : > { %1608 = vmatmul.bf16.gmra.mxu3 %v1473_v11  ;;  %3924 = vmatmul.msk.f32.gmra.mxu0 %vm1658_vm4, %v1627_v1 }
 0x230   : > { %v1569_v48 = vpop.f32.mrf.mxu3 }
 0x231   : > { %v1570_v46 = vadd.f32 %v5149_v56, %v1569_v48 }
 0x233   : > { %v1628_v39 = vmax.f32 %v1570_v46, 0.0 }
 0x235   : > { %3925 = vmatmul.msk.f32.gmra.mxu0 %vm1658_vm4, %v1628_v39 }
 0x238   : > { %v1571_v20 = vpop.f32.mrf.mxu3 }
 0x239   : > { %v1572_v0 = vadd.f32 %v5149_v56, %v1571_v20 }
 0x23b   : > { %v1629_v14 = vmax.f32 %v1572_v0, 0.0 }
 0x23d   : > { %3926 = vmatmul.msk.f32.gmra.mxu0 %vm1658_vm4, %v1629_v14 }
 0x240   : > { %v1574_v55 = vpop.f32.mrf.mxu3 }
 0x241   : > { %v1575_v25 = vadd.f32 %v5149_v56, %v1574_v55 }
 0x242   : > { %v1772_v33 = vpop.f32.mrf.mxu0 }
 0x243   : > { %v1630_v34 = vmax.f32 %v1575_v25, 0.0  ;;  %v1773_v52 = vadd.f32 %v5226_v40, %v1772_v33 }
 0x245   : > { %v1868_v22 = vmax.f32 %v1773_v52, 0.0  ;;  %3927 = vmatmul.msk.f32.gmra.mxu0 %vm1658_vm4, %v1630_v34 }
 0x247   : > { %3944 = vmatmul.msk.f32.vlgmr.msra.gmra.mxu1 %vm1906_vm5, %v1868_v22 }
 0x248   : > { %v1576_v6 = vpop.f32.mrf.mxu3 }
 0x249   : > { %v1577_v54 = vadd.f32 %v5149_v56, %v1576_v6 }
 0x24a   : > { %v1775_v30 = vpop.f32.mrf.mxu0 }
 0x24b   : > { %v1631_v12 = vmax.f32 %v1577_v54, 0.0  ;;  %v1776_v57 = vadd.f32 %v5226_v40, %v1775_v30 }
 0x24d   : > { %v1869_v8 = vmax.f32 %v1776_v57, 0.0  ;;  %3928 = vmatmul.msk.f32.gmra.mxu0 %vm1658_vm4, %v1631_v12 }
 0x24f   : > { %3945 = vmatmul.msk.f32.gmra.mxu1 %vm1906_vm5, %v1869_v8 }
 0x250   : > { %v1579_v45 = vpop.f32.mrf.mxu3 }
 0x251   : > { %v1580_v15 = vadd.f32 %v5149_v56, %v1579_v45 }
 0x252   : > { %v1778_v36 = vpop.f32.mrf.mxu0 }
 0x253   : > { %v1632_v58 = vmax.f32 %v1580_v15, 0.0  ;;  %v1779_v63 = vadd.f32 %v5226_v40, %v1778_v36 }
 0x255   : > { %v1870_v32 = vmax.f32 %v1779_v63, 0.0  ;;  %3929 = vmatmul.msk.f32.gmra.mxu0 %vm1658_vm4, %v1632_v58  ;;  %v2372_v63 = vld [vmem:[%s6269_s11 + $0x8] sm:$0xf] }
 0x256   : > { %4009 = vmatpush.msk.msra.mxu2 %vm2003_vm2, %v2372_v63  ;;  %4288 = vmatpush.msk.msra.mxu3 %vm2003_vm2, %v2372_v63 }
 0x257   : > { %3946 = vmatmul.msk.f32.gmra.mxu1 %vm1906_vm5, %v1870_v32 }
 0x258   : > { %v1581_v31 = vpop.f32.mrf.mxu3 }
 0x259   : > { %v1582_v13 = vadd.f32 %v5149_v56, %v1581_v31 }
 0x25a   : > { %v1781_v29 = vpop.f32.mrf.mxu0 }
 0x25b   : > { %v1633_v59 = vmax.f32 %v1582_v13, 0.0  ;;  %v1782_v60 = vadd.f32 %v5226_v40, %v1781_v29 }
 0x25d   : > { %v1871_v53 = vmax.f32 %v1782_v60, 0.0  ;;  %3930 = vmatmul.msk.f32.gmra.mxu0 %vm1658_vm4, %v1633_v59 }
 0x25f   : > { %3947 = vmatmul.msk.f32.gmra.mxu1 %vm1906_vm5, %v1871_v53 }
 0x260   : > { %v1584_v17 = vpop.f32.mrf.mxu3 }
 0x261   : > { %v1585_v62 = vadd.f32 %v5149_v56, %v1584_v17 }
 0x262   : > { %v1784_v42 = vpop.f32.mrf.mxu0 }
 0x263   : > { %v1634_v28 = vmax.f32 %v1585_v62, 0.0  ;;  %v1785_v47 = vadd.f32 %v5226_v40, %v1784_v42 }
 0x265   : > { %v1872_v9 = vmax.f32 %v1785_v47, 0.0  ;;  %3931 = vmatmul.msk.f32.gmra.mxu0 %vm1658_vm4, %v1634_v28 }
 0x267   : > { %3948 = vmatmul.msk.f32.gmra.mxu1 %vm1906_vm5, %v1872_v9 }
 0x268   : > { %v1586_v41 = vpop.f32.mrf.mxu3 }
 0x269   : > { %v1587_v19 = vadd.f32 %v5149_v56, %v1586_v41 }
 0x26a   : > { %v1787_v35 = vpop.f32.mrf.mxu0 }
 0x26b   : > { %v1635_v21 = vmax.f32 %v1587_v19, 0.0  ;;  %v1788_v38 = vadd.f32 %v5226_v40, %v1787_v35 }
 0x26d   : > { %v1873_v2 = vmax.f32 %v1788_v38, 0.0  ;;  %3932 = vmatmul.msk.f32.gmra.mxu0 %vm1658_vm4, %v1635_v21 }
 0x26f   : > { %3949 = vmatmul.msk.f32.gmra.mxu1 %vm1906_vm5, %v1873_v2  ;;  %v5300_v2 = vld [vmem:[%s6266_s8] ss:$0 sm:$0xff] }
 0x270   : > { %v1589_v51 = vpop.f32.mrf.mxu3 }
 0x271   : > { %v1590_v23 = vadd.f32 %v5149_v56, %v1589_v51 }
 0x272   : > { %v1790_v44 = vpop.f32.mrf.mxu0 }
 0x273   : > { %v1636_v27 = vmax.f32 %v1590_v23, 0.0  ;;  %v1791_v18 = vadd.f32 %v5226_v40, %v1790_v44 }
 0x275   : > { %v1874_v10 = vmax.f32 %v1791_v18, 0.0  ;;  %3933 = vmatmul.msk.f32.gmra.mxu0 %vm1658_vm4, %v1636_v27 }
 0x277   : > { %3950 = vmatmul.msk.f32.gmra.mxu1 %vm1906_vm5, %v1874_v10 }
 0x278   : > { %v1591_v3 = vpop.f32.mrf.mxu3 }
 0x279   : > { %v1592_v43 = vadd.f32 %v5149_v56, %v1591_v3 }
 0x27a   : > { %v1793_v50 = vpop.f32.mrf.mxu0 }
 0x27b   : > { %v1637_v7 = vmax.f32 %v1592_v43, 0.0  ;;  %v1794_v4 = vadd.f32 %v5226_v40, %v1793_v50 }
 0x27d   : > { %v1875_v37 = vmax.f32 %v1794_v4, 0.0  ;;  %3934 = vmatmul.msk.f32.gmra.mxu0 %vm1658_vm4, %v1637_v7 }
 0x27f   : > { %3951 = vmatmul.msk.f32.gmra.mxu1 %vm1906_vm5, %v1875_v37 }
 0x280   : > { %v1594_v49 = vpop.f32.mrf.mxu3 }
 0x281   : > { %v1595_v26 = vadd.f32 %v5149_v56, %v1594_v49 }
 0x282   : > { %v1796_v24 = vpop.f32.mrf.mxu0 }
 0x283   : > { %v1638_v61 = vmax.f32 %v1595_v26, 0.0  ;;  %v1797_v16 = vadd.f32 %v5226_v40, %v1796_v24 }
 0x285   : > { %v1876_v5 = vmax.f32 %v1797_v16, 0.0  ;;  %3935 = vmatmul.msk.f32.gmra.mxu0 %vm1658_vm4, %v1638_v61 }
 0x287   : > { %3952 = vmatmul.msk.f32.gmra.mxu1 %vm1906_vm5, %v1876_v5 }
 0x288   : > { %v1596_v1 = vpop.f32.mrf.mxu3 }
 0x289   : > { %v1597_v11 = vadd.f32 %v5149_v56, %v1596_v1 }
 0x28a   : > { %v1799_v48 = vpop.f32.mrf.mxu0 }
 0x28b   : > { %v1639_v46 = vmax.f32 %v1597_v11, 0.0  ;;  %v1800_v39 = vadd.f32 %v5226_v40, %v1799_v48 }
 0x28d   : > { %v1877_v20 = vmax.f32 %v1800_v39, 0.0  ;;  %3936 = vmatmul.msk.f32.gmra.mxu0 %vm1658_vm4, %v1639_v46 }
 0x28f   : > { %3953 = vmatmul.msk.f32.gmra.mxu1 %vm1906_vm5, %v1877_v20 }
 0x290   : > { %v1599_v0 = vpop.f32.mrf.mxu3 }
 0x291   : > { %v1600_v14 = vadd.f32 %v5149_v56, %v1599_v0 }
 0x292   : > { %v1802_v55 = vpop.f32.mrf.mxu0 }
 0x293   : > { %v1640_v25 = vmax.f32 %v1600_v14, 0.0  ;;  %v1803_v33 = vadd.f32 %v5226_v40, %v1802_v55 }
 0x295   : > { %v1878_v34 = vmax.f32 %v1803_v33, 0.0  ;;  %3937 = vmatmul.msk.f32.gmra.mxu0 %vm1658_vm4, %v1640_v25 }
 0x297   : > { %3954 = vmatmul.msk.f32.gmra.mxu1 %vm1906_vm5, %v1878_v34 }
 0x298   : > { %v1601_v52 = vpop.f32.mrf.mxu3 }
 0x299   : > { %v1602_v22 = vadd.f32 %v5149_v56, %v1601_v52 }
 0x29a   : > { %v1805_v6 = vpop.f32.mrf.mxu0 }
 0x29b   : > { %v1641_v54 = vmax.f32 %v1602_v22, 0.0  ;;  %v1806_v30 = vadd.f32 %v5226_v40, %v1805_v6 }
 0x29d   : > { %v1879_v12 = vmax.f32 %v1806_v30, 0.0  ;;  %3938 = vmatmul.msk.f32.gmra.mxu0 %vm1658_vm4, %v1641_v54 }
 0x29f   : > { %3955 = vmatmul.msk.f32.gmra.mxu1 %vm1906_vm5, %v1879_v12 }
 0x2a0   : > { %v1604_v57 = vpop.f32.mrf.mxu3 }
 0x2a1   : > { %v1605_v8 = vadd.f32 %v5149_v56, %v1604_v57 }
 0x2a2   : > { %v1808_v45 = vpop.f32.mrf.mxu0 }
 0x2a3   : > { %v1642_v15 = vmax.f32 %v1605_v8, 0.0  ;;  %v1809_v36 = vadd.f32 %v5226_v40, %v1808_v45 }
 0x2a5   : > { %v1880_v58 = vmax.f32 %v1809_v36, 0.0  ;;  %3939 = vmatmul.msk.f32.gmra.mxu0 %vm1658_vm4, %v1642_v15 }
 0x2a7   : > { %3956 = vmatmul.msk.f32.gmra.mxu1 %vm1906_vm5, %v1880_v58 }
 0x2a8   : > { %v1606_v32 = vpop.f32.mrf.mxu3 }
 0x2a9   : > { %v1607_v31 = vadd.f32 %v5149_v56, %v1606_v32 }
 0x2aa   : > { %v1811_v13 = vpop.f32.mrf.mxu0 }
 0x2ab   : > { %v1643_v29 = vmax.f32 %v1607_v31, 0.0  ;;  %v1812_v59 = vadd.f32 %v5226_v40, %v1811_v13 }
 0x2ad   : > { %v1881_v60 = vmax.f32 %v1812_v59, 0.0  ;;  %3940 = vmatmul.msk.f32.gmra.mxu0 %vm1658_vm4, %v1643_v29 }
 0x2af   : > { %3957 = vmatmul.msk.f32.gmra.mxu1 %vm1906_vm5, %v1881_v60 }
 0x2b0   : > { %v1609_v53 = vpop.f32.mrf.mxu3 }
 0x2b1   : > { %v1610_v17 = vadd.f32 %v5149_v56, %v1609_v53 }
 0x2b2   : > { %v1814_v62 = vpop.f32.mrf.mxu0 }
 0x2b3   : > { %v1644_v42 = vmax.f32 %v1610_v17, 0.0  ;;  %v1815_v28 = vadd.f32 %v5226_v40, %v1814_v62 }
 0x2b5   : > { %v1882_v47 = vmax.f32 %v1815_v28, 0.0  ;;  %3941 = vmatmul.msk.f32.gmra.mxu0 %vm1658_vm4, %v1644_v42 }
 0x2b7   : > { %3958 = vmatmul.msk.f32.gmra.mxu1 %vm1906_vm5, %v1882_v47 }
 0x2b8   : > { %v1611_v9 = vpop.f32.mrf.mxu3 }
 0x2b9   : > { %v1612_v41 = vadd.f32 %v5149_v56, %v1611_v9 }
 0x2ba   : > { %v1817_v19 = vpop.f32.mrf.mxu0 }
 0x2bb   : > { %v1645_v35 = vmax.f32 %v1612_v41, 0.0  ;;  %v1818_v21 = vadd.f32 %v5226_v40, %v1817_v19 }
 0x2bd   : > { %v1883_v38 = vmax.f32 %v1818_v21, 0.0  ;;  %3942 = vmatmul.msk.f32.gmra.mxu0 %vm1658_vm4, %v1645_v35 }
 0x2bf   : > { %3959 = vmatmul.msk.f32.gmra.mxu1 %vm1906_vm5, %v1883_v38 }
 0x2c2   : > { %v1820_v51 = vpop.f32.mrf.mxu0 }
 0x2c3   : > { %v1821_v23 = vadd.f32 %v5226_v40, %v1820_v51 }
 0x2c4   : > { %v2024_v44 = vpop.f32.mrf.mxu1 }
 0x2c5   : > { %v1884_v56 = vmax.f32 %v1821_v23, 0.0  ;;  %v2025_v27 = vadd.f32 %v5300_v2, %v2024_v44 }
 0x2c7   : > { %3960 = vmatmul.msk.f32.gmra.mxu1 %vm1906_vm5, %v1884_v56  ;;  %3977 = vmatmul.msk.f32.vlgmr.msrb.gmra.mxu2 %vm2125_vm6, %v2025_v27  ;;  %v2371_v56 = vld [vmem:[%s6269_s11] sm:$0xff] }
 0x2c8   : > { %2491 = vmatpush.msra.mxu2 %v2371_v56  ;;  %4289 = vmatpush.msra.mxu3 %v2371_v56 }
 0x2ca   : > { %v1823_v18 = vpop.f32.mrf.mxu0 }
 0x2cb   : > { %v1824_v10 = vadd.f32 %v5226_v40, %v1823_v18 }
 0x2cc   : > { %v2027_v3 = vpop.f32.mrf.mxu1 }
 0x2cd   : > { %v1885_v43 = vmax.f32 %v1824_v10, 0.0  ;;  %v2028_v50 = vadd.f32 %v5300_v2, %v2027_v3 }
 0x2cf   : > { %3961 = vmatmul.msk.f32.gmra.mxu1 %vm1906_vm5, %v1885_v43  ;;  %3978 = vmatmul.msk.f32.gmra.mxu2 %vm2125_vm6, %v2028_v50 }
 0x2d2   : > { %v1826_v7 = vpop.f32.mrf.mxu0 }
 0x2d3   : > { %v1827_v4 = vadd.f32 %v5226_v40, %v1826_v7 }
 0x2d4   : > { %v2030_v37 = vpop.f32.mrf.mxu1 }
 0x2d5   : > { %v1886_v49 = vmax.f32 %v1827_v4, 0.0  ;;  %v2031_v26 = vadd.f32 %v5300_v2, %v2030_v37 }
 0x2d7   : > { %3962 = vmatmul.msk.f32.gmra.mxu1 %vm1906_vm5, %v1886_v49  ;;  %3979 = vmatmul.msk.f32.gmra.mxu2 %vm2125_vm6, %v2031_v26  ;;  %v4247_v26 = vld [vmem:[%s6271_s13 + $0x18] sm:$0xff] }
 0x2d8   : > { %2725 = vmatpush.bf16.msra.mxu0 %v4247_v26 }
 0x2da   : > { %v1829_v24 = vpop.f32.mrf.mxu0 }
 0x2db   : > { %v1830_v61 = vadd.f32 %v5226_v40, %v1829_v24 }
 0x2dc   : > { %v2033_v16 = vpop.f32.mrf.mxu1 }
 0x2dd   : > { %v1887_v5 = vmax.f32 %v1830_v61, 0.0  ;;  %v2034_v1 = vadd.f32 %v5300_v2, %v2033_v16 }
 0x2df   : > { %3963 = vmatmul.msk.f32.gmra.mxu1 %vm1906_vm5, %v1887_v5  ;;  %3980 = vmatmul.msk.f32.gmra.mxu2 %vm2125_vm6, %v2034_v1 }
 0x2e2   : > { %v1832_v11 = vpop.f32.mrf.mxu0 }
 0x2e3   : > { %v1833_v48 = vadd.f32 %v5226_v40, %v1832_v11 }
 0x2e4   : > { %v2036_v46 = vpop.f32.mrf.mxu1 }
 0x2e5   : > { %v1888_v39 = vmax.f32 %v1833_v48, 0.0  ;;  %v2037_v20 = vadd.f32 %v5300_v2, %v2036_v46 }
 0x2e7   : > { %3964 = vmatmul.msk.f32.gmra.mxu1 %vm1906_vm5, %v1888_v39  ;;  %3981 = vmatmul.msk.f32.gmra.mxu2 %vm2125_vm6, %v2037_v20 }
 0x2ea   : > { %v1835_v0 = vpop.f32.mrf.mxu0 }
 0x2eb   : > { %v1836_v14 = vadd.f32 %v5226_v40, %v1835_v0 }
 0x2ec   : > { %v2039_v55 = vpop.f32.mrf.mxu1 }
 0x2ed   : > { %v1889_v25 = vmax.f32 %v1836_v14, 0.0  ;;  %v2040_v33 = vadd.f32 %v5300_v2, %v2039_v55 }
 0x2ef   : > { %3965 = vmatmul.msk.f32.gmra.mxu1 %vm1906_vm5, %v1889_v25  ;;  %3982 = vmatmul.msk.f32.gmra.mxu2 %vm2125_vm6, %v2040_v33 }
 0x2f2   : > { %v1838_v34 = vpop.f32.mrf.mxu0 }
 0x2f3   : > { %v1839_v52 = vadd.f32 %v5226_v40, %v1838_v34 }
 0x2f4   : > { %v2042_v22 = vpop.f32.mrf.mxu1 }
 0x2f5   : > { %v1890_v6 = vmax.f32 %v1839_v52, 0.0  ;;  %v2043_v54 = vadd.f32 %v5300_v2, %v2042_v22 }
 0x2f7   : > { %3966 = vmatmul.msk.f32.gmra.mxu1 %vm1906_vm5, %v1890_v6  ;;  %3983 = vmatmul.msk.f32.gmra.mxu2 %vm2125_vm6, %v2043_v54 }
 0x2fa   : > { %v1841_v30 = vpop.f32.mrf.mxu0 }
 0x2fb   : > { %v1842_v12 = vadd.f32 %v5226_v40, %v1841_v30 }
 0x2fc   : > { %v2045_v57 = vpop.f32.mrf.mxu1 }
 0x2fd   : > { %v1891_v8 = vmax.f32 %v1842_v12, 0.0  ;;  %v2046_v45 = vadd.f32 %v5300_v2, %v2045_v57 }
 0x2ff   : > { %3967 = vmatmul.msk.f32.gmra.mxu1 %vm1906_vm5, %v1891_v8  ;;  %3984 = vmatmul.msk.f32.gmra.mxu2 %vm2125_vm6, %v2046_v45  ;;  %v4246_v45 = vld [vmem:[%s6271_s13 + $0x10] sm:$0xff] }
 0x300   : > { %2726 = vmatpush.bf16.msra.mxu0 %v4246_v45 }
 0x302   : > { %v1844_v15 = vpop.f32.mrf.mxu0 }
 0x303   : > { %v1845_v36 = vadd.f32 %v5226_v40, %v1844_v15 }
 0x304   : > { %v2048_v58 = vpop.f32.mrf.mxu1 }
 0x305   : > { %v1892_v63 = vmax.f32 %v1845_v36, 0.0  ;;  %v2049_v32 = vadd.f32 %v5300_v2, %v2048_v58 }
 0x307   : > { %3968 = vmatmul.msk.f32.gmra.mxu1 %vm1906_vm5, %v1892_v63  ;;  %3985 = vmatmul.msk.f32.gmra.mxu2 %vm2125_vm6, %v2049_v32 }
 0x30a   : > { %v1847_v31 = vpop.f32.mrf.mxu0 }
 0x30b   : > { %v1848_v13 = vadd.f32 %v5226_v40, %v1847_v31 }
 0x30c   : > { %v2051_v29 = vpop.f32.mrf.mxu1 }
 0x30d   : > { %v1893_v59 = vmax.f32 %v1848_v13, 0.0  ;;  %v2052_v60 = vadd.f32 %v5300_v2, %v2051_v29 }
 0x30f   : > { %3969 = vmatmul.msk.f32.gmra.mxu1 %vm1906_vm5, %v1893_v59  ;;  %3986 = vmatmul.msk.f32.gmra.mxu2 %vm2125_vm6, %v2052_v60 }
 0x312   : > { %v1850_v53 = vpop.f32.mrf.mxu0 }
 0x313   : > { %v1851_v17 = vadd.f32 %v5226_v40, %v1850_v53 }
 0x314   : > { %v2054_v62 = vpop.f32.mrf.mxu1 }
 0x315   : > { %v1894_v42 = vmax.f32 %v1851_v17, 0.0  ;;  %v2055_v28 = vadd.f32 %v5300_v2, %v2054_v62 }
 0x317   : > { %3970 = vmatmul.msk.f32.gmra.mxu1 %vm1906_vm5, %v1894_v42  ;;  %3987 = vmatmul.msk.f32.gmra.mxu2 %vm2125_vm6, %v2055_v28 }
 0x31a   : > { %v1853_v47 = vpop.f32.mrf.mxu0 }
 0x31b   : > { %v1854_v9 = vadd.f32 %v5226_v40, %v1853_v47 }
 0x31c   : > { %v2057_v41 = vpop.f32.mrf.mxu1 }
 0x31d   : > { %v1895_v19 = vmax.f32 %v1854_v9, 0.0  ;;  %v2058_v35 = vadd.f32 %v5300_v2, %v2057_v41 }
 0x31f   : > { %3971 = vmatmul.msk.f32.gmra.mxu1 %vm1906_vm5, %v1895_v19  ;;  %3988 = vmatmul.msk.f32.gmra.mxu2 %vm2125_vm6, %v2058_v35 }
 0x322   : > { %v1856_v21 = vpop.f32.mrf.mxu0 }
 0x323   : > { %v1857_v38 = vadd.f32 %v5226_v40, %v1856_v21 }
 0x324   : > { %v2060_v51 = vpop.f32.mrf.mxu1 }
 0x325   : > { %v1896_v23 = vmax.f32 %v1857_v38, 0.0  ;;  %v2061_v44 = vadd.f32 %v5300_v2, %v2060_v51 }
 0x327   : > { %3972 = vmatmul.msk.f32.gmra.mxu1 %vm1906_vm5, %v1896_v23  ;;  %3989 = vmatmul.msk.f32.gmra.mxu2 %vm2125_vm6, %v2061_v44  ;;  %v4245_v44 = vld [vmem:[%s6271_s13 + $0x8] sm:$0xff] }
 0x328   : > { %2727 = vmatpush.bf16.msra.mxu0 %v4245_v44 }
 0x32a   : > { %v1859_v27 = vpop.f32.mrf.mxu0 }
 0x32b   : > { %v1860_v18 = vadd.f32 %v5226_v40, %v1859_v27 }
 0x32c   : > { %v2063_v10 = vpop.f32.mrf.mxu1 }
 0x32d   : > { %v1897_v3 = vmax.f32 %v1860_v18, 0.0  ;;  %v2064_v43 = vadd.f32 %v5300_v2, %v2063_v10  ;;  %v5441_v18 = vld [vmem:[%s6268_s10] ss:$0 sm:$0xff] }
 0x32f   : > { %3973 = vmatmul.msk.f32.gmra.mxu1 %vm1906_vm5, %v1897_v3  ;;  %3990 = vmatmul.msk.f32.gmra.mxu2 %vm2125_vm6, %v2064_v43 }
 0x332   : > { %v1862_v50 = vpop.f32.mrf.mxu0 }
 0x333   : > { %v1863_v7 = vadd.f32 %v5226_v40, %v1862_v50 }
 0x334   : > { %v2066_v4 = vpop.f32.mrf.mxu1 }
 0x335   : > { %v1898_v37 = vmax.f32 %v1863_v7, 0.0  ;;  %v2067_v49 = vadd.f32 %v5300_v2, %v2066_v4 }
 0x337   : > { %3974 = vmatmul.msk.f32.gmra.mxu1 %vm1906_vm5, %v1898_v37  ;;  %3991 = vmatmul.msk.f32.gmra.mxu2 %vm2125_vm6, %v2067_v49 }
 0x33a   : > { %v1865_v24 = vpop.f32.mrf.mxu0 }
 0x33b   : > { %v1866_v61 = vadd.f32 %v5226_v40, %v1865_v24 }
 0x33c   : > { %v2069_v16 = vpop.f32.mrf.mxu1 }
 0x33d   : > { %v1899_v5 = vmax.f32 %v1866_v61, 0.0  ;;  %v2070_v1 = vadd.f32 %v5300_v2, %v2069_v16 }
 0x33f   : > { %3975 = vmatmul.msk.f32.gmra.mxu1 %vm1906_vm5, %v1899_v5  ;;  %3992 = vmatmul.msk.f32.gmra.mxu2 %vm2125_vm6, %v2070_v1 }
 0x344   : > { %v2072_v11 = vpop.f32.mrf.mxu1 }
 0x345   : > { %v2073_v48 = vadd.f32 %v5300_v2, %v2072_v11 }
 0x347   : > { %3993 = vmatmul.msk.f32.gmra.mxu2 %vm2125_vm6, %v2073_v48 }
 0x34a   : > { %v5374_v46 = vpop.f32.mrf.mxu2 }
 0x34b   : > { %v2244_v3 = vadd.f32 %v5441_v18, %v5374_v46 }
 0x34c   : > { %v2075_v39 = vpop.f32.mrf.mxu1 }
 0x34d   : > { %v2076_v20 = vadd.f32 %v5300_v2, %v2075_v39  ;;  %v2339_v7 = vmax.f32 %v2244_v3, 0.0 }
 0x34f   : > { %3994 = vmatmul.msk.f32.gmra.mxu2 %vm2125_vm6, %v2076_v20 }
 0x352   : > { %v5378_v40 = vpop.f32.mrf.mxu2 }
 0x353   : > { %v2247_v37 = vadd.f32 %v5441_v18, %v5378_v40 }
 0x354   : > { %v2078_v0 = vpop.f32.mrf.mxu1 }
 0x355   : > { %v2079_v14 = vadd.f32 %v5300_v2, %v2078_v0  ;;  %v2340_v26 = vmax.f32 %v2247_v37, 0.0 }
 0x357   : > { %3995 = vmatmul.msk.f32.gmra.mxu2 %vm2125_vm6, %v2079_v14 }
 0x35a   : > { %v5382_v55 = vpop.f32.mrf.mxu2 }
 0x35b   : > { %v2250_v61 = vadd.f32 %v5441_v18, %v5382_v55 }
 0x35c   : > { %v2081_v25 = vpop.f32.mrf.mxu1 }
 0x35d   : > { %v2082_v33 = vadd.f32 %v5300_v2, %v2081_v25  ;;  %v2341_v1 = vmax.f32 %v2250_v61, 0.0 }
 0x35f   : > { %3996 = vmatmul.msk.f32.gmra.mxu2 %vm2125_vm6, %v2082_v33 }
 0x362   : > { %v5386_v34 = vpop.f32.mrf.mxu2 }
 0x363   : > { %v2253_v48 = vadd.f32 %v5441_v18, %v5386_v34 }
 0x364   : > { %v2084_v52 = vpop.f32.mrf.mxu1 }
 0x365   : > { %v2085_v22 = vadd.f32 %v5300_v2, %v2084_v52  ;;  %v2342_v20 = vmax.f32 %v2253_v48, 0.0  ;;  %v4278_v48 = vld [vmem:[%s6273_s15 + $0xec] sm:$0xf0] }
 0x367   : > { %3997 = vmatmul.msk.f32.gmra.mxu2 %vm2125_vm6, %v2085_v22 }
 0x36a   : > { %v5390_v6 = vpop.f32.mrf.mxu2 }
 0x36b   : > { %v2256_v0 = vadd.f32 %v5441_v18, %v5390_v6 }
 0x36c   : > { %v2087_v54 = vpop.f32.mrf.mxu1 }
 0x36d   : > { %v2088_v30 = vadd.f32 %v5300_v2, %v2087_v54  ;;  %v2343_v25 = vmax.f32 %v2256_v0, 0.0 }
 0x36f   : > { %3998 = vmatmul.msk.f32.gmra.mxu2 %vm2125_vm6, %v2088_v30 }
 0x372   : > { %v5394_v12 = vpop.f32.mrf.mxu2 }
 0x373   : > { %v2259_v34 = vadd.f32 %v5441_v18, %v5394_v12  ;;  %v4244_v12 = vld [vmem:[%s6271_s13] sm:$0xff] }
 0x374   : > { %v2090_v57 = vpop.f32.mrf.mxu1  ;;  %2728 = vmatpush.bf16.msra.mxu0 %v4244_v12 }
 0x375   : > { %v2091_v8 = vadd.f32 %v5300_v2, %v2090_v57  ;;  %v2344_v54 = vmax.f32 %v2259_v34, 0.0 }
 0x377   : > { %3999 = vmatmul.msk.f32.gmra.mxu2 %vm2125_vm6, %v2091_v8 }
 0x37a   : > { %v5401_v15 = vpop.f32.mrf.mxu2 }
 0x37b   : > { %v2262_v6 = vadd.f32 %v5441_v18, %v5401_v15 }
 0x37c   : > { %v2093_v36 = vpop.f32.mrf.mxu1 }
 0x37d   : > { %v2094_v58 = vadd.f32 %v5300_v2, %v2093_v36  ;;  %v2345_v45 = vmax.f32 %v2262_v6, 0.0 }
 0x37f   : > { %4000 = vmatmul.msk.f32.gmra.mxu2 %vm2125_vm6, %v2094_v58 }
 0x382   : > { %v5405_v63 = vpop.f32.mrf.mxu2 }
 0x383   : > { %v2265_v58 = vadd.f32 %v5441_v18, %v5405_v63 }
 0x384   : > { %v2096_v32 = vpop.f32.mrf.mxu1 }
 0x385   : > { %v2097_v31 = vadd.f32 %v5300_v2, %v2096_v32 }
 0x387   : > { %4001 = vmatmul.msk.f32.gmra.mxu2 %vm2125_vm6, %v2097_v31  ;;  %v2346_v31 = vmax.f32 %v2265_v58, 0.0 }
 0x38a   : > { %v5409_v13 = vpop.f32.mrf.mxu2 }
 0x38c   : > { %v2099_v29 = vpop.f32.mrf.mxu1 }
 0x38d   : > { %v2100_v59 = vadd.f32 %v5300_v2, %v2099_v29 }
 0x38f   : > { %4002 = vmatmul.msk.f32.gmra.mxu2 %vm2125_vm6, %v2100_v59  ;;  %v2268_v59 = vadd.f32 %v5441_v18, %v5409_v13 }
 0x392   : > { %v5413_v60 = vpop.f32.mrf.mxu2 }
 0x393   : > { %v2271_v63 = vadd.f32 %v5441_v18, %v5413_v60 }
 0x394   : > { %v2102_v53 = vpop.f32.mrf.mxu1 }
 0x395   : > { %v2103_v17 = vadd.f32 %v5300_v2, %v2102_v53 }
 0x397   : > { %4003 = vmatmul.msk.f32.gmra.mxu2 %vm2125_vm6, %v2103_v17 }
 0x39a   : > { %v5417_v62 = vpop.f32.mrf.mxu2 }
 0x39b   : > { %v2274_v13 = vadd.f32 %v5441_v18, %v5417_v62 }
 0x39c   : > { %v2105_v42 = vpop.f32.mrf.mxu1 }
 0x39d   : > { %v2106_v28 = vadd.f32 %v5300_v2, %v2105_v42  ;;  %v2347_v42 = vmax.f32 %v2268_v59, 0.0  ;;  %v2349_v44 = vmax.f32 %v2274_v13, 0.0 }
 0x39f   : > { %4004 = vmatmul.msk.f32.gmra.mxu2 %vm2125_vm6, %v2106_v28 }
 0x3a2   : > { %v5421_v47 = vpop.f32.mrf.mxu2 }
 0x3a3   : > { %v2277_v60 = vadd.f32 %v5441_v18, %v5421_v47 }
 0x3a4   : > { %v2108_v9 = vpop.f32.mrf.mxu1 }
 0x3a5   : > { %v2109_v41 = vadd.f32 %v5300_v2, %v2108_v9 }
 0x3a7   : > { %4005 = vmatmul.msk.f32.gmra.mxu2 %vm2125_vm6, %v2109_v41 }
 0x3aa   : > { %v5425_v19 = vpop.f32.mrf.mxu2 }
 0x3ab   : > { %v2280_v62 = vadd.f32 %v5441_v18, %v5425_v19 }
 0x3ac   : > { %v2111_v35 = vpop.f32.mrf.mxu1 }
 0x3ad   : > { %v2112_v21 = vadd.f32 %v5300_v2, %v2111_v35  ;;  %v2348_v35 = vmax.f32 %v2271_v63, 0.0  ;;  %v2351_v37 = vmax.f32 %v2280_v62, 0.0 }
 0x3af   : > { %4006 = vmatmul.msk.f32.gmra.mxu2 %vm2125_vm6, %v2112_v21 }
 0x3b2   : > { %v5429_v38 = vpop.f32.mrf.mxu2 }
 0x3b3   : > { %v2283_v47 = vadd.f32 %v5441_v18, %v5429_v38  ;;  %v4188_v38 = vld [vmem:[%s6273_s15 + $0xe0] sm:$0xf] }
 0x3b4   : > { %v2114_v51 = vpop.f32.mrf.mxu1 }
 0x3b5   : > { %v2115_v23 = vadd.f32 %v5300_v2, %v2114_v51 }
 0x3b7   : > { %4007 = vmatmul.msk.f32.gmra.mxu2 %vm2125_vm6, %v2115_v23 }
 0x3ba   : > { %v5436_v56 = vpop.f32.mrf.mxu2 }
 0x3bb   : > { %v2286_v19 = vadd.f32 %v5441_v18, %v5436_v56  ;;  %v4277_v56 = vld [vmem:[%s6273_s15 + $0xec] sm:$0xf] }
 0x3bc   : > { %v2117_v27 = vpop.f32.mrf.mxu1 }
 0x3bd   : > { %v2118_v10 = vadd.f32 %v5300_v2, %v2117_v27 }
 0x3bf   : > { %4008 = vmatmul.msk.f32.gmra.mxu2 %vm2125_vm6, %v2118_v10 }
 0x3c2   : > { %v2288_v43 = vpop.f32.mrf.mxu2 }
 0x3c3   : > { %v2289_v50 = vadd.f32 %v5441_v18, %v2288_v43  ;;  %v2350_v43 = vmax.f32 %v2277_v60, 0.0 }
 0x3c5   : > { %v2354_v4 = vmax.f32 %v2289_v50, 0.0 }
 0x3c7   : > { %4010 = vmatmul.msk.f32.vlgmr.msra.gmra.mxu2 %vm1906_vm5, %v2339_v7  ;;  %4025 = vmatmul.msk.f32.vlgmr.msra.gmra.mxu3 %vm1906_vm5, %v2354_v4 }
 0x3ca   : > { %v2291_v49 = vpop.f32.mrf.mxu2 }
 0x3cb   : > { %v2292_v2 = vadd.f32 %v5441_v18, %v2291_v49 }
 0x3cd   : > { %v2355_v24 = vmax.f32 %v2292_v2, 0.0 }
 0x3cf   : > { %4011 = vmatmul.msk.f32.gmra.mxu2 %vm1906_vm5, %v2340_v26  ;;  %4026 = vmatmul.msk.f32.gmra.mxu3 %vm1906_vm5, %v2355_v24  ;;  %v2352_v24 = vmax.f32 %v2283_v47, 0.0 }
 0x3d2   : > { %v2294_v16 = vpop.f32.mrf.mxu2 }
 0x3d3   : > { %v2295_v5 = vadd.f32 %v5441_v18, %v2294_v16 }
 0x3d5   : > { %v2356_v11 = vmax.f32 %v2295_v5, 0.0 }
 0x3d7   : > { %4012 = vmatmul.msk.f32.gmra.mxu2 %vm1906_vm5, %v2341_v1  ;;  %4027 = vmatmul.msk.f32.gmra.mxu3 %vm1906_vm5, %v2356_v11  ;;  %v2353_v1 = vmax.f32 %v2286_v19, 0.0 }
 0x3da   : > { %v2297_v46 = vpop.f32.mrf.mxu2 }
 0x3db   : > { %v2298_v39 = vadd.f32 %v5441_v18, %v2297_v46 }
 0x3dd   : > { %v2357_v40 = vmax.f32 %v2298_v39, 0.0  ;;  %v4189_v39 = vor.u32 %v4278_v48, %v4188_v38  ;;  %v4150_v48 = vld [vmem:[%s6273_s15 + $0x98] sm:$0xf0] }
 0x3df   : > { %4013 = vmatmul.msk.f32.gmra.mxu2 %vm1906_vm5, %v2342_v20  ;;  %4028 = vmatmul.msk.f32.gmra.mxu3 %vm1906_vm5, %v2357_v40  ;;  %v4198_v20 = vld [vmem:[%s6273_s15 + $0xf8] sm:$0xf0] }
 0x3e0   : > { %v4201_v0 = vor.u32 %v4277_v56, %v4198_v20  ;;  %3060 = vmatpush.bf16.msrb.mxu1 %v4189_v39 }
 0x3e2   : > { %v2300_v14 = vpop.f32.mrf.mxu2  ;;  %3327 = vmatpush.bf16.msrb.mxu0 %v4201_v0  ;;  %v4276_v0 = vld [vmem:[%s6273_s15 + $0xe4] sm:$0xf] }
 0x3e3   : > { %v2301_v55 = vadd.f32 %v5441_v18, %v2300_v14 }
 0x3e5   : > { %v2358_v33 = vmax.f32 %v2301_v55, 0.0 }
 0x3e7   : > { %4014 = vmatmul.msk.f32.gmra.mxu2 %vm1906_vm5, %v2343_v25  ;;  %4029 = vmatmul.msk.f32.gmra.mxu3 %vm1906_vm5, %v2358_v33 }
 0x3ea   : > { %v2303_v52 = vpop.f32.mrf.mxu2 }
 0x3eb   : > { %v2304_v22 = vadd.f32 %v5441_v18, %v2303_v52  ;;  %v5542_v52 = vld [vmem:[%s6270_s12] ss:$0 sm:$0xff] }
 0x3ed   : > { %v2359_v30 = vmax.f32 %v2304_v22, 0.0 }
 0x3ef   : > { %4015 = vmatmul.msk.f32.gmra.mxu2 %vm1906_vm5, %v2344_v54  ;;  %4030 = vmatmul.msk.f32.gmra.mxu3 %vm1906_vm5, %v2359_v30 }
 0x3f2   : > { %v2306_v57 = vpop.f32.mrf.mxu2 }
 0x3f3   : > { %v2307_v8 = vadd.f32 %v5441_v18, %v2306_v57 }
 0x3f5   : > { %v2360_v36 = vmax.f32 %v2307_v8, 0.0 }
 0x3f7   : > { %4016 = vmatmul.msk.f32.gmra.mxu2 %vm1906_vm5, %v2345_v45  ;;  %4031 = vmatmul.msk.f32.gmra.mxu3 %vm1906_vm5, %v2360_v36  ;;  %v4274_v45 = vld [vmem:[%s6273_s15 + $0xcc] sm:$0xf0]  ;;  %v4273_v36 = vld [vmem:[%s6273_s15 + $0xcc] sm:$0xf] }
 0x3fa   : > { %v2309_v32 = vpop.f32.mrf.mxu2 }
 0x3fb   : > { %v2310_v15 = vadd.f32 %v5441_v18, %v2309_v32  ;;  %v4182_v32 = vld [vmem:[%s6273_s15 + $0xd8] sm:$0xf0] }
 0x3fd   : > { %v2361_v29 = vmax.f32 %v2310_v15, 0.0  ;;  %v4185_v15 = vor.u32 %v4273_v36, %v4182_v32  ;;  %v4275_v36 = vld [vmem:[%s6273_s15 + $0xd4] sm:$0xf0]  ;;  %v4268_v32 = vld [vmem:[%s6273_s15 + $0xa4] sm:$0xf] }
 0x3ff   : > { %4017 = vmatmul.msk.f32.gmra.mxu2 %vm1906_vm5, %v2346_v31  ;;  %4032 = vmatmul.msk.f32.gmra.mxu3 %vm1906_vm5, %v2361_v29 }
 0x400   : > { %3328 = vmatpush.bf16.msrb.mxu0 %v4185_v15  ;;  %v4158_v15 = vld [vmem:[%s6273_s15 + $0xb0] sm:$0xf0] }
 0x402   : > { %v2312_v53 = vpop.f32.mrf.mxu2 }
 0x403   : > { %v2313_v17 = vadd.f32 %v5441_v18, %v2312_v53 }
 0x405   : > { %v2362_v28 = vmax.f32 %v2313_v17, 0.0 }
 0x407   : > { %4018 = vmatmul.msk.f32.gmra.mxu2 %vm1906_vm5, %v2347_v42  ;;  %4033 = vmatmul.msk.f32.gmra.mxu3 %vm1906_vm5, %v2362_v28 }
 0x40a   : > { %v2315_v9 = vpop.f32.mrf.mxu2 }
 0x40b   : > { %v2316_v41 = vadd.f32 %v5441_v18, %v2315_v9 }
 0x40d   : > { %v2363_v21 = vmax.f32 %v2316_v41, 0.0 }
 0x40f   : > { %4019 = vmatmul.msk.f32.gmra.mxu2 %vm1906_vm5, %v2348_v35  ;;  %4034 = vmatmul.msk.f32.gmra.mxu3 %vm1906_vm5, %v2363_v21 }
 0x412   : > { %v2318_v51 = vpop.f32.mrf.mxu2 }
 0x413   : > { %v2319_v23 = vadd.f32 %v5441_v18, %v2318_v51  ;;  %v4156_v51 = vld [vmem:[%s6273_s15 + $0xa0] sm:$0xf] }
 0x415   : > { %v2364_v27 = vmax.f32 %v2319_v23, 0.0  ;;  %v4270_v23 = vld [vmem:[%s6273_s15 + $0xac] sm:$0xf0] }
 0x416   : > { %v4157_v60 = vor.u32 %v4270_v23, %v4156_v51  ;;  %v4124_v23 = vld [vmem:[%s6273_s15 + $0x60] sm:$0xf] }
 0x417   : > { %4020 = vmatmul.msk.f32.gmra.mxu2 %vm1906_vm5, %v2349_v44  ;;  %4035 = vmatmul.msk.f32.gmra.mxu3 %vm1906_vm5, %v2364_v27  ;;  %v4269_v44 = vld [vmem:[%s6273_s15 + $0xac] sm:$0xf] }
 0x41a   : > { %v2321_v10 = vpop.f32.mrf.mxu2 }
 0x41b   : > { %v2322_v3 = vadd.f32 %v5441_v18, %v2321_v10  ;;  %v4166_v10 = vld [vmem:[%s6273_s15 + $0xb8] sm:$0xf0] }
 0x41d   : > { %v2365_v50 = vmax.f32 %v2322_v3, 0.0  ;;  %v4169_v3 = vor.u32 %v4269_v44, %v4166_v10  ;;  %v4262_v44 = vld [vmem:[%s6273_s15 + $0x6c] sm:$0xf0]  ;;  %v4126_v10 = vld [vmem:[%s6273_s15 + $0x70] sm:$0xf0] }
 0x41f   : > { %4021 = vmatmul.msk.f32.gmra.mxu2 %vm1906_vm5, %v2350_v43  ;;  %4036 = vmatmul.msk.f32.gmra.mxu3 %vm1906_vm5, %v2365_v50 }
 0x420   : > { %3329 = vmatpush.bf16.msrb.mxu0 %v4169_v3  ;;  %v4132_v3 = vld [vmem:[%s6273_s15 + $0x68] sm:$0xf] }
 0x422   : > { %v2324_v7 = vpop.f32.mrf.mxu2 }
 0x423   : > { %v2325_v4 = vadd.f32 %v5441_v18, %v2324_v7 }
 0x425   : > { %v2366_v49 = vmax.f32 %v2325_v4, 0.0 }
 0x427   : > { %4022 = vmatmul.msk.f32.gmra.mxu2 %vm1906_vm5, %v2351_v37  ;;  %4037 = vmatmul.msk.f32.gmra.mxu3 %vm1906_vm5, %v2366_v49 }
 0x42a   : > { %v2327_v2 = vpop.f32.mrf.mxu2 }
 0x42b   : > { %v2328_v26 = vadd.f32 %v5441_v18, %v2327_v2 }
 0x42d   : > { %v2367_v61 = vmax.f32 %v2328_v26, 0.0 }
 0x42f   : > { %4023 = vmatmul.msk.f32.gmra.mxu2 %vm1906_vm5, %v2352_v24  ;;  %4038 = vmatmul.msk.f32.gmra.mxu3 %vm1906_vm5, %v2367_v61 }
 0x432   : > { %v2330_v16 = vpop.f32.mrf.mxu2 }
 0x433   : > { %v2331_v5 = vadd.f32 %v5441_v18, %v2330_v16  ;;  %v4140_v16 = vld [vmem:[%s6273_s15 + $0x80] sm:$0xf] }
 0x435   : > { %v2368_v11 = vmax.f32 %v2331_v5, 0.0  ;;  %v4266_v5 = vld [vmem:[%s6273_s15 + $0x8c] sm:$0xf0] }
 0x436   : > { %v4141_v38 = vor.u32 %v4266_v5, %v4140_v16  ;;  %v4261_v16 = vld [vmem:[%s6273_s15 + $0x6c] sm:$0xf]  ;;  %v4134_v5 = vld [vmem:[%s6273_s15 + $0x78] sm:$0xf0] }
 0x437   : > { %4024 = vmatmul.msk.f32.gmra.mxu2 %vm1906_vm5, %v2353_v1  ;;  %4039 = vmatmul.msk.f32.gmra.mxu3 %vm1906_vm5, %v2368_v11  ;;  %v4265_v1 = vld [vmem:[%s6273_s15 + $0x8c] sm:$0xf] }
 0x438   : > { %v4153_v56 = vor.u32 %v4265_v1, %v4150_v48  ;;  %v4137_v48 = vor.u32 %v4261_v16, %v4134_v5 }
 0x43a   : > { %v2333_v46 = vpop.f32.mrf.mxu2  ;;  %3330 = vmatpush.bf16.msrb.mxu0 %v4153_v56  ;;  %v4092_v56 = vld [vmem:[%s6273_s15 + $0x20] sm:$0xf] }
 0x43b   : > { %v2334_v40 = vadd.f32 %v5441_v18, %v2333_v46 }
 0x43d   : > { %v2369_v14 = vmax.f32 %v2334_v40, 0.0 }
 0x43e   : > { %3331 = vmatpush.bf16.msrb.mxu0 %v4137_v48 }
 0x43f   : > { %4040 = vmatmul.msk.f32.gmra.mxu3 %vm1906_vm5, %v2369_v14  ;;  %v4190_v14 = vld [vmem:[%s6273_s15 + $0xf0] sm:$0xf0] }
 0x442   : > { %v2336_v55 = vpop.f32.mrf.mxu2 }
 0x443   : > { %v2337_v25 = vadd.f32 %v5441_v18, %v2336_v55  ;;  %v4172_v18 = vld [vmem:[%s6273_s15 + $0xc0] sm:$0xf]  ;;  %v4196_v55 = vld [vmem:[%s6273_s15 + $0xe8] sm:$0xf] }
 0x444   : > { %v4173_v58 = vor.u32 %v4274_v45, %v4172_v18  ;;  %v4180_v18 = vld [vmem:[%s6273_s15 + $0xc8] sm:$0xf] }
 0x445   : > { %v2370_v33 = vmax.f32 %v2337_v25, 0.0  ;;  %v4193_v25 = vor.u32 %v4276_v0, %v4190_v14  ;;  %v4094_v14 = vld [vmem:[%s6273_s15 + $0x30] sm:$0xf0] }
 0x446   : > { %3061 = vmatpush.bf16.msrb.mxu1 %v4173_v58 }
 0x447   : > { %4041 = vmatmul.msk.f32.gmra.mxu3 %vm1906_vm5, %v2370_v33  ;;  %v4279_v33 = vld [vmem:[%s6273_s15 + $0xf4] sm:$0xf0]  ;;  %3149 = vmatpush.bf16.msrb.mxu2 %v4193_v25 }
 0x448   : > { %v4255_v25 = vld [vmem:[%s6273_s15 + $0x34] sm:$0xf0] }
 0x44a   : > { %v2493_v34 = vpop.f32.mrf.mxu2  ;;  %3062 = vmatpush.bf16.msrb.mxu1 %v4157_v60  ;;  %v5595_v46 = vpop.f32.mrf.mxu3  ;;  %v4125_v60 = vor.u32 %v4262_v44, %v4124_v23 }
 0x44b   : > { %v2494_v22 = vadd.f32 %v5542_v52, %v2493_v34 }
 0x44d   : > { %v2589_v6 = vmax.f32 %v2494_v22, 0.0 }
 0x44e   : > { %3063 = vmatpush.bf16.msrb.mxu1 %v4141_v38 }
 0x452   : > { %v2496_v54 = vpop.f32.mrf.mxu2  ;;  %3064 = vmatpush.bf16.msrb.mxu1 %v4125_v60 }
 0x453   : > { %v2497_v30 = vadd.f32 %v5542_v52, %v2496_v54  ;;  %v4197_v54 = vor.u32 %v4279_v33, %v4196_v55  ;;  %v4100_v55 = vld [vmem:[%s6273_s15 + $0x28] sm:$0xf] }
 0x455   : > { %v2590_v57 = vmax.f32 %v2497_v30, 0.0  ;;  %v5611_v30 = vpop.f32.mrf.mxu3  ;;  %3238 = vmatpush.bf16.msrb.mxu3 %v4197_v54  ;;  %v4076_v54 = vld [vmem:[%s6273_s15] sm:$0xf] }
 0x457   : > { %v2630_v8 = vpack.c.bf16 %v2590_v57, %v2589_v6  ;;  %v4272_v57 = vld [vmem:[%s6273_s15 + $0xc4] sm:$0xf] }
 0x459   : > { %4058 = vmatmul.msk.bf16.vlgmr.msra.gmra.mxu0 %vm1658_vm4, %v2630_v8  ;;  %v4174_v8 = vld [vmem:[%s6273_s15 + $0xd0] sm:$0xf0] }
 0x45a   : > { %v2499_v12 = vpop.f32.mrf.mxu2  ;;  %v4177_v45 = vor.u32 %v4272_v57, %v4174_v8  ;;  %v4248_v57 = vld [vmem:[%s6273_s15 + $0x4] sm:$0xf] }
 0x45b   : > { %v2500_v31 = vadd.f32 %v5542_v52, %v2499_v12  ;;  %v4181_v12 = vor.u32 %v4275_v36, %v4180_v18  ;;  %v4078_v18 = vld [vmem:[%s6273_s15 + $0x10] sm:$0xf0]  ;;  %v4251_v36 = vld [vmem:[%s6273_s15 + $0x14] sm:$0xf0] }
 0x45c   : > { %3150 = vmatpush.bf16.msrb.mxu2 %v4177_v45  ;;  %v4084_v45 = vld [vmem:[%s6273_s15 + $0x8] sm:$0xf] }
 0x45d   : > { %v2591_v53 = vmax.f32 %v2500_v31, 0.0  ;;  %3239 = vmatpush.bf16.msrb.mxu3 %v4181_v12  ;;  %v4164_v31 = vld [vmem:[%s6273_s15 + $0xa8] sm:$0xf]  ;;  %v2539_v12 = vadd.f32 %v5542_v52, %v5595_v46 }
 0x462   : > { %v2502_v29 = vpop.f32.mrf.mxu2 }
 0x463   : > { %v2503_v59 = vadd.f32 %v5542_v52, %v2502_v29  ;;  %v4161_v29 = vor.u32 %v4268_v32, %v4158_v15  ;;  %v4085_v32 = vor.u32 %v4251_v36, %v4084_v45 }
 0x465   : > { %v2592_v17 = vmax.f32 %v2503_v59, 0.0  ;;  %v4271_v59 = vld [vmem:[%s6273_s15 + $0xb4] sm:$0xf0]  ;;  %3151 = vmatpush.bf16.msrb.mxu2 %v4161_v29  ;;  %v2604_v29 = vmax.f32 %v2539_v12, 0.0 }
 0x467   : > { %v2631_v42 = vpack.c.bf16 %v2592_v17, %v2591_v53  ;;  %v4165_v53 = vor.u32 %v4271_v59, %v4164_v31  ;;  %v4264_v17 = vld [vmem:[%s6273_s15 + $0x84] sm:$0xf] }
 0x469   : > { %4059 = vmatmul.msk.bf16.gmra.mxu0 %vm1658_vm4, %v2631_v42  ;;  %3240 = vmatpush.bf16.msrb.mxu3 %v4165_v53  ;;  %v4142_v42 = vld [vmem:[%s6273_s15 + $0x90] sm:$0xf0] }
 0x46a   : > { %v2505_v28 = vpop.f32.mrf.mxu2 }
 0x46b   : > { %v2506_v63 = vadd.f32 %v5542_v52, %v2505_v28  ;;  %v4148_v28 = vld [vmem:[%s6273_s15 + $0x88] sm:$0xf] }
 0x46d   : > { %v2593_v35 = vmax.f32 %v2506_v63, 0.0  ;;  %v5647_v63 = vpop.f32.mrf.mxu3 }
 0x472   : > { %v2508_v9 = vpop.f32.mrf.mxu2 }
 0x473   : > { %v2509_v41 = vadd.f32 %v5542_v52, %v2508_v9  ;;  %v4145_v9 = vor.u32 %v4264_v17, %v4142_v42  ;;  %v2545_v17 = vadd.f32 %v5542_v52, %v5647_v63  ;;  %v2542_v42 = vadd.f32 %v5542_v52, %v5611_v30  ;;  %v4118_v30 = vld [vmem:[%s6273_s15 + $0x58] sm:$0xf0] }
 0x475   : > { %v2594_v21 = vmax.f32 %v2509_v41, 0.0  ;;  %v4267_v41 = vld [vmem:[%s6273_s15 + $0x94] sm:$0xf0]  ;;  %3152 = vmatpush.bf16.msrb.mxu2 %v4145_v9  ;;  %v2547_v38 = vpop.f32.mrf.mxu3  ;;  %v2605_v46 = vmax.f32 %v2542_v42, 0.0 }
 0x476   : > { %v2548_v60 = vadd.f32 %v5542_v52, %v2547_v38 }
 0x477   : > { %v2632_v13 = vpack.c.bf16 %v2594_v21, %v2593_v35  ;;  %v4149_v21 = vor.u32 %v4267_v41, %v4148_v28  ;;  %v2606_v28 = vmax.f32 %v2545_v17, 0.0 }
 0x479   : > { %4060 = vmatmul.msk.bf16.gmra.mxu0 %vm1658_vm4, %v2632_v13  ;;  %3241 = vmatpush.bf16.msrb.mxu3 %v4149_v21  ;;  %v2638_v41 = vpack.c.bf16 %v2606_v28, %v2605_v46  ;;  %v5744_v21 = vld [vmem:[%s6272_s14] ss:$0 sm:$0xff] }
 0x47a   : > { %v2511_v27 = vpop.f32.mrf.mxu2 }
 0x47b   : > { %v2512_v43 = vadd.f32 %v5542_v52, %v2511_v27  ;;  %v4260_v27 = vld [vmem:[%s6273_s15 + $0x64] sm:$0xf] }
 0x47d   : > { %v2595_v7 = vmax.f32 %v2512_v43, 0.0  ;;  %v4263_v43 = vld [vmem:[%s6273_s15 + $0x74] sm:$0xf0]  ;;  %v2550_v31 = vpop.f32.mrf.mxu3 }
 0x47e   : > { %v2551_v44 = vadd.f32 %v5542_v52, %v2550_v31 }
 0x482   : > { %v2514_v50 = vpop.f32.mrf.mxu2 }
 0x483   : > { %v2515_v62 = vadd.f32 %v5542_v52, %v2514_v50 }
 0x485   : > { %v2596_v4 = vmax.f32 %v2515_v62, 0.0  ;;  %v2553_v53 = vpop.f32.mrf.mxu3 }
 0x487   : > { %v2633_v37 = vpack.c.bf16 %v2596_v4, %v2595_v7  ;;  %v4129_v7 = vor.u32 %v4260_v27, %v4126_v10  ;;  %v4133_v4 = vor.u32 %v4263_v43, %v4132_v3 }
 0x489   : > { %4061 = vmatmul.msk.bf16.gmra.mxu0 %vm1658_vm4, %v2633_v37  ;;  %3153 = vmatpush.bf16.msrb.mxu2 %v4129_v7  ;;  %v2607_v7 = vmax.f32 %v2548_v60, 0.0 }
 0x48a   : > { %v2517_v49 = vpop.f32.mrf.mxu2  ;;  %3242 = vmatpush.bf16.msrb.mxu3 %v4133_v4 }
 0x48b   : > { %v2518_v47 = vadd.f32 %v5542_v52, %v2517_v49  ;;  %v4108_v49 = vld [vmem:[%s6273_s15 + $0x40] sm:$0xf] }
 0x48d   : > { %v2597_v24 = vmax.f32 %v2518_v47, 0.0  ;;  %v4258_v47 = vld [vmem:[%s6273_s15 + $0x4c] sm:$0xf0] }
 0x492   : > { %v2520_v2 = vpop.f32.mrf.mxu2 }
 0x493   : > { %v2521_v26 = vadd.f32 %v5542_v52, %v2520_v2  ;;  %v4256_v2 = vld [vmem:[%s6273_s15 + $0x44] sm:$0xf] }
 0x495   : > { %v2598_v61 = vmax.f32 %v2521_v26, 0.0  ;;  %v4109_v26 = vor.u32 %v4258_v47, %v4108_v49 }
 0x497   : > { %v2634_v19 = vpack.c.bf16 %v2598_v61, %v2597_v24  ;;  %v4110_v24 = vld [vmem:[%s6273_s15 + $0x50] sm:$0xf0]  ;;  %v4116_v61 = vld [vmem:[%s6273_s15 + $0x48] sm:$0xf]  ;;  %3065 = vmatpush.bf16.msrb.mxu1 %v4109_v26 }
 0x498   : > { %v4113_v1 = vor.u32 %v4256_v2, %v4110_v24 }
 0x499   : > { %4062 = vmatmul.msk.bf16.gmra.mxu0 %vm1658_vm4, %v2634_v19  ;;  %v4259_v19 = vld [vmem:[%s6273_s15 + $0x54] sm:$0xf0] }
 0x49a   : > { %v2523_v11 = vpop.f32.mrf.mxu2  ;;  %3154 = vmatpush.bf16.msrb.mxu2 %v4113_v1 }
 0x49b   : > { %v2524_v39 = vadd.f32 %v5542_v52, %v2523_v11  ;;  %v4117_v11 = vor.u32 %v4259_v19, %v4116_v61  ;;  %v2554_v61 = vadd.f32 %v5542_v52, %v2553_v53 }
 0x49d   : > { %v2599_v34 = vmax.f32 %v2524_v39, 0.0  ;;  %3243 = vmatpush.bf16.msrb.mxu3 %v4117_v11  ;;  %v4254_v39 = vld [vmem:[%s6273_s15 + $0x2c] sm:$0xf0]  ;;  %v2609_v11 = vmax.f32 %v2554_v61, 0.0 }
 0x49e   : > { %v4093_v0 = vor.u32 %v4254_v39, %v4092_v56  ;;  %v4253_v39 = vld [vmem:[%s6273_s15 + $0x2c] sm:$0xf] }
 0x4a0   : > { %3066 = vmatpush.bf16.msrb.mxu1 %v4093_v0 }
 0x4a2   : > { %v2526_v20 = vpop.f32.mrf.mxu2 }
 0x4a3   : > { %v2527_v40 = vadd.f32 %v5542_v52, %v2526_v20  ;;  %v4252_v20 = vld [vmem:[%s6273_s15 + $0x24] sm:$0xf] }
 0x4a4   : > { %v4097_v33 = vor.u32 %v4252_v20, %v4094_v14  ;;  %v4102_v20 = vld [vmem:[%s6273_s15 + $0x38] sm:$0xf0] }
 0x4a5   : > { %v2600_v22 = vmax.f32 %v2527_v40, 0.0 }
 0x4a6   : > { %3155 = vmatpush.bf16.msrb.mxu2 %v4097_v33 }
 0x4a7   : > { %v2635_v6 = vpack.c.bf16 %v2600_v22, %v2599_v34  ;;  %v4101_v34 = vor.u32 %v4255_v25, %v4100_v55 }
 0x4a9   : > { %4063 = vmatmul.msk.bf16.gmra.mxu0 %vm1658_vm4, %v2635_v6  ;;  %3244 = vmatpush.bf16.msrb.mxu3 %v4101_v34  ;;  %v4250_v6 = vld [vmem:[%s6273_s15 + $0xc] sm:$0xf0] }
 0x4aa   : > { %v2529_v58 = vpop.f32.mrf.mxu2  ;;  %v4077_v8 = vor.u32 %v4250_v6, %v4076_v54 }
 0x4ab   : > { %v2530_v35 = vadd.f32 %v5542_v52, %v2529_v58  ;;  %v4081_v58 = vor.u32 %v4248_v57, %v4078_v18 }
 0x4ac   : > { %3067 = vmatpush.bf16.msrb.mxu1 %v4077_v8 }
 0x4ad   : > { %v2601_v50 = vmax.f32 %v2530_v35, 0.0  ;;  %3156 = vmatpush.bf16.msrb.mxu2 %v4081_v58  ;;  %3245 = vmatpush.bf16.msrb.mxu3 %v4085_v32  ;;  %v2556_v35 = vpop.f32.mrf.mxu3 }
 0x4ae   : > { %v2557_v26 = vadd.f32 %v5542_v52, %v2556_v35  ;;  %v4086_v35 = vld [vmem:[%s6273_s15 + $0x18] sm:$0xf0] }
 0x4b0   : > { %v2610_v5 = vmax.f32 %v2557_v26, 0.0 }
 0x4b2   : > { %v2532_v13 = vpop.f32.mrf.mxu2  ;;  %v2640_v56 = vpack.c.bf16 %v2610_v5, %v2609_v11 }
 0x4b3   : > { %v2533_v51 = vadd.f32 %v5542_v52, %v2532_v13  ;;  %v4257_v13 = vld [vmem:[%s6273_s15 + $0x4c] sm:$0xf] }
 0x4b4   : > { %v4121_v63 = vor.u32 %v4257_v13, %v4118_v30 }
 0x4b5   : > { %v2602_v62 = vmax.f32 %v2533_v51, 0.0  ;;  %v2559_v43 = vpop.f32.mrf.mxu3 }
 0x4b6   : > { %3332 = vmatpush.bf16.msrb.mxu0 %v4121_v63  ;;  %v2560_v34 = vadd.f32 %v5542_v52, %v2559_v43 }
 0x4b7   : > { %v2636_v37 = vpack.c.bf16 %v2602_v62, %v2601_v50  ;;  %v2608_v50 = vmax.f32 %v2551_v44, 0.0 }
 0x4b8   : > { %v2611_v8 = vmax.f32 %v2560_v34, 0.0 }
 0x4b9   : > { %4064 = vmatmul.msk.bf16.gmra.mxu0 %vm1658_vm4, %v2636_v37  ;;  %v2639_v37 = vpack.c.bf16 %v2608_v50, %v2607_v7 }
 0x4ba   : > { %v2535_v40 = vpop.f32.mrf.mxu2 }
 0x4bb   : > { %v2536_v22 = vadd.f32 %v5542_v52, %v2535_v40  ;;  %v4105_v40 = vor.u32 %v4253_v39, %v4102_v20 }
 0x4bd   : > { %v2603_v15 = vmax.f32 %v2536_v22, 0.0  ;;  %v2562_v49 = vpop.f32.mrf.mxu3  ;;  %3333 = vmatpush.bf16.msrb.mxu0 %v4105_v40 }
 0x4be   : > { %v2563_v55 = vadd.f32 %v5542_v52, %v2562_v49 }
 0x4bf   : > { %v2637_v59 = vpack.c.bf16 %v2604_v29, %v2603_v15 }
 0x4c0   : > { %v2612_v6 = vmax.f32 %v2563_v55, 0.0 }
 0x4c2   : > { %v2641_v45 = vpack.c.bf16 %v2612_v6, %v2611_v8 }
 0x4c5   : > { %v2565_v38 = vpop.f32.mrf.mxu3 }
 0x4c6   : > { %v2566_v31 = vadd.f32 %v5542_v52, %v2565_v38 }
 0x4c8   : > { %v2613_v28 = vmax.f32 %v2566_v31, 0.0 }
 0x4c9   : > { %4065 = vmatmul.msk.bf16.gmra.mxu0 %vm1658_vm4, %v2637_v59 }
 0x4cd   : > { %v2568_v33 = vpop.f32.mrf.mxu3 }
 0x4ce   : > { %v2569_v32 = vadd.f32 %v5542_v52, %v2568_v33 }
 0x4d0   : > { %v2614_v53 = vmax.f32 %v2569_v32, 0.0 }
 0x4d5   : > { %v2571_v36 = vpop.f32.mrf.mxu3 }
 0x4d6   : > { %v2730_v9 = vpop.f32.mrf.mxu0 }
 0x4d7   : > { %v2731_v51 = vadd.f32 %v5744_v21, %v2730_v9  ;;  %v2642_v9 = vpack.c.bf16 %v2614_v53, %v2613_v28 }
 0x4d9   : > { %4066 = vmatmul.msk.bf16.gmra.mxu0 %vm1658_vm4, %v2638_v41  ;;  %v2810_v10 = vmax.f32 %v2731_v51, 0.0  ;;  %v4249_v41 = vld [vmem:[%s6273_s15 + $0xc] sm:$0xf] }
 0x4da   : > { %v4089_v13 = vor.u32 %v4249_v41, %v4086_v35 }
 0x4dc   : > { %3334 = vmatpush.bf16.msrb.mxu0 %v4089_v13 }
 0x4dd   : > { %v2574_v42 = vpop.f32.mrf.mxu3 }
 0x4de   : > { %v2732_v23 = vpop.f32.mrf.mxu0 }
 0x4df   : > { %v2733_v27 = vadd.f32 %v5744_v21, %v2732_v23  ;;  %v2575_v23 = vadd.f32 %v5542_v52, %v2574_v42 }
 0x4e1   : > { %v2811_v3 = vmax.f32 %v2733_v27, 0.0  ;;  %v2572_v27 = vadd.f32 %v5542_v52, %v2571_v36 }
 0x4e3   : > { %v5757_v62 = vpack.c.bf16 %v2811_v3, %v2810_v10  ;;  %v2616_v3 = vmax.f32 %v2575_v23, 0.0  ;;  %v2615_v50 = vmax.f32 %v2572_v27, 0.0 }
 0x4e5   : > { %3068 = vmatmul.bf16.vlgmr.msrb.gmra.mxu1 %v5757_v62  ;;  %3157 = vmatmul.bf16.vlgmr.msrb.gmra.mxu2 %v5757_v62  ;;  %v2577_v63 = vpop.f32.mrf.mxu3 }
 0x4e6   : > { %3246 = vmatmul.bf16.vlgmr.msrb.gmra.mxu3 %v5757_v62  ;;  %v2735_v4 = vpop.f32.mrf.mxu0 }
 0x4e7   : > { %v2736_v47 = vadd.f32 %v5744_v21, %v2735_v4  ;;  %v2643_v4 = vpack.c.bf16 %v2616_v3, %v2615_v50 }
 0x4e9   : > { %4067 = vmatmul.msk.bf16.gmra.mxu0 %vm1658_vm4, %v2639_v37  ;;  %v2812_v19 = vmax.f32 %v2736_v47, 0.0 }
 0x4ed   : > { %v2580_v37 = vpop.f32.mrf.mxu3 }
 0x4ee   : > { %v2737_v2 = vpop.f32.mrf.mxu0 }
 0x4ef   : > { %v2738_v24 = vadd.f32 %v5744_v21, %v2737_v2  ;;  %v2581_v2 = vadd.f32 %v5542_v52, %v2580_v37 }
 0x4f1   : > { %v2813_v16 = vmax.f32 %v2738_v24, 0.0  ;;  %v2578_v24 = vadd.f32 %v5542_v52, %v2577_v63  ;;  %v2618_v5 = vmax.f32 %v2581_v2, 0.0 }
 0x4f3   : > { %v5767_v1 = vpack.c.bf16 %v2813_v16, %v2812_v19  ;;  %v2617_v38 = vmax.f32 %v2578_v24, 0.0 }
 0x4f5   : > { %3073 = vmatmul.bf16.gmra.mxu1 %v5767_v1  ;;  %3162 = vmatmul.bf16.gmra.mxu2 %v5767_v1  ;;  %v2583_v16 = vpop.f32.mrf.mxu3 }
 0x4f6   : > { %3251 = vmatmul.bf16.gmra.mxu3 %v5767_v1  ;;  %v2740_v48 = vpop.f32.mrf.mxu0  ;;  %v2584_v55 = vadd.f32 %v5542_v52, %v2583_v16 }
 0x4f7   : > { %v2741_v0 = vadd.f32 %v5744_v21, %v2740_v48 }
 0x4f9   : > { %4068 = vmatmul.msk.bf16.gmra.mxu0 %vm1658_vm4, %v2640_v56  ;;  %v2814_v22 = vmax.f32 %v2741_v0, 0.0  ;;  %v2644_v56 = vpack.c.bf16 %v2618_v5, %v2617_v38 }
 0x4fd   : > { %v2586_v39 = vpop.f32.mrf.mxu3 }
 0x4fe   : > { %v2742_v14 = vpop.f32.mrf.mxu0  ;;  %v2587_v0 = vadd.f32 %v5542_v52, %v2586_v39 }
 0x4ff   : > { %v2743_v25 = vadd.f32 %v5744_v21, %v2742_v14 }
 0x500   : > { %v2620_v34 = vmax.f32 %v2587_v0, 0.0 }
 0x501   : > { %v2815_v54 = vmax.f32 %v2743_v25, 0.0 }
 0x503   : > { %v5783_v57 = vpack.c.bf16 %v2815_v54, %v2814_v22  ;;  %v2619_v54 = vmax.f32 %v2584_v55, 0.0 }
 0x505   : > { %3078 = vmatmul.bf16.gmra.mxu1 %v5783_v57  ;;  %3167 = vmatmul.bf16.gmra.mxu2 %v5783_v57  ;;  %v2645_v8 = vpack.c.bf16 %v2620_v34, %v2619_v54 }
 0x506   : > { %3256 = vmatmul.bf16.gmra.mxu3 %v5783_v57  ;;  %v2745_v18 = vpop.f32.mrf.mxu0 }
 0x507   : > { %v2746_v12 = vadd.f32 %v5744_v21, %v2745_v18 }
 0x509   : > { %4069 = vmatmul.msk.bf16.gmra.mxu0 %vm1658_vm4, %v2641_v45  ;;  %v2816_v29 = vmax.f32 %v2746_v12, 0.0 }
 0x50e   : > { %v2747_v58 = vpop.f32.mrf.mxu0 }
 0x50f   : > { %v2748_v15 = vadd.f32 %v5744_v21, %v2747_v58 }
 0x511   : > { %v2817_v59 = vmax.f32 %v2748_v15, 0.0 }
 0x513   : > { %v5793_v17 = vpack.c.bf16 %v2817_v59, %v2816_v29  ;;  %v5848_v59 = vld [vmem:[%s6274_s16] sm:$0xf] }
 0x514   : > { %v5851_v28 = vperm.slane %v5848_v59, 0 }
 0x515   : > { %3083 = vmatmul.bf16.gmra.mxu1 %v5793_v17  ;;  %3172 = vmatmul.bf16.gmra.mxu2 %v5793_v17 }
 0x516   : > { %3261 = vmatmul.bf16.gmra.mxu3 %v5793_v17  ;;  %v2750_v46 = vpop.f32.mrf.mxu0 }
 0x517   : > { %v2751_v30 = vadd.f32 %v5744_v21, %v2750_v46 }
 0x519   : > { %4070 = vmatmul.msk.bf16.gmra.mxu0 %vm1658_vm4, %v2642_v9  ;;  %v2818_v60 = vmax.f32 %v2751_v30, 0.0 }
 0x51e   : > { %v2752_v51 = vpop.f32.mrf.mxu0 }
 0x51f   : > { %v2753_v44 = vadd.f32 %v5744_v21, %v2752_v51 }
 0x521   : > { %v2819_v10 = vmax.f32 %v2753_v44, 0.0 }
 0x523   : > { %v5809_v43 = vpack.c.bf16 %v2819_v10, %v2818_v60 }
 0x525   : > { %3088 = vmatmul.bf16.gmra.mxu1 %v5809_v43  ;;  %3177 = vmatmul.bf16.gmra.mxu2 %v5809_v43 }
 0x526   : > { %3266 = vmatmul.bf16.gmra.mxu3 %v5809_v43  ;;  %v2755_v7 = vpop.f32.mrf.mxu0 }
 0x527   : > { %v2756_v49 = vadd.f32 %v5744_v21, %v2755_v7 }
 0x529   : > { %4071 = vmatmul.msk.bf16.gmra.mxu0 %vm1658_vm4, %v2643_v4  ;;  %v2820_v61 = vmax.f32 %v2756_v49, 0.0 }
 0x52e   : > { %v2757_v47 = vpop.f32.mrf.mxu0 }
 0x52f   : > { %v2758_v26 = vadd.f32 %v5744_v21, %v2757_v47 }
 0x531   : > { %v2821_v19 = vmax.f32 %v2758_v26, 0.0 }
 0x533   : > { %v5819_v11 = vpack.c.bf16 %v2821_v19, %v2820_v61 }
 0x535   : > { %3093 = vmatmul.bf16.gmra.mxu1 %v5819_v11  ;;  %3182 = vmatmul.bf16.gmra.mxu2 %v5819_v11 }
 0x536   : > { %3271 = vmatmul.bf16.gmra.mxu3 %v5819_v11  ;;  %v2760_v48 = vpop.f32.mrf.mxu0 }
 0x537   : > { %v2761_v20 = vadd.f32 %v5744_v21, %v2760_v48 }
 0x539   : > { %4072 = vmatmul.msk.bf16.gmra.mxu0 %vm1658_vm4, %v2644_v56  ;;  %v2822_v25 = vmax.f32 %v2761_v20, 0.0 }
 0x53e   : > { %v2762_v40 = vpop.f32.mrf.mxu0 }
 0x53f   : > { %v2763_v14 = vadd.f32 %v5744_v21, %v2762_v40 }
 0x541   : > { %v2823_v33 = vmax.f32 %v2763_v14, 0.0 }
 0x543   : > { %v5829_v22 = vpack.c.bf16 %v2823_v33, %v2822_v25 }
 0x545   : > { %3098 = vmatmul.bf16.gmra.mxu1 %v5829_v22  ;;  %3187 = vmatmul.bf16.gmra.mxu2 %v5829_v22 }
 0x546   : > { %3276 = vmatmul.bf16.gmra.mxu3 %v5829_v22  ;;  %v2765_v6 = vpop.f32.mrf.mxu0 }
 0x547   : > { %v2766_v18 = vadd.f32 %v5744_v21, %v2765_v6 }
 0x549   : > { %4073 = vmatmul.msk.bf16.gmra.mxu0 %vm1658_vm4, %v2645_v8  ;;  %v2824_v36 = vmax.f32 %v2766_v18, 0.0 }
 0x54e   : > { %v2767_v45 = vpop.f32.mrf.mxu0 }
 0x54f   : > { %v2768_v52 = vadd.f32 %v5744_v21, %v2767_v45 }
 0x551   : > { %v2825_v12 = vmax.f32 %v2768_v52, 0.0 }
 0x553   : > { %v5837_v58 = vpack.c.bf16 %v2825_v12, %v2824_v36 }
 0x555   : > { %3103 = vmatmul.bf16.gmra.mxu1 %v5837_v58  ;;  %3192 = vmatmul.bf16.gmra.mxu2 %v5837_v58 }
 0x556   : > { %3281 = vmatmul.bf16.gmra.mxu3 %v5837_v58  ;;  %v2770_v32 = vpop.f32.mrf.mxu0 }
 0x557   : > { %v2771_v15 = vadd.f32 %v5744_v21, %v2770_v32 }
 0x559   : > { %3335 = vmatmul.bf16.vlgmr.msrb.gmra.mxu0 %v5757_v62  ;;  %v2826_v53 = vmax.f32 %v2771_v15, 0.0  ;;  %v5858_v62 = vperm.slane %v5848_v59, 1 }
 0x55e   : > { %v2772_v31 = vpop.f32.mrf.mxu0 }
 0x55f   : > { %v2773_v29 = vadd.f32 %v5744_v21, %v2772_v31 }
 0x561   : > { %v2827_v42 = vmax.f32 %v2773_v29, 0.0 }
 0x562   : > { %v3069_v46 = vpop.f32.mrf.mxu1 }
 0x563   : > { %v5853_v9 = vpack.c.bf16 %v2827_v42, %v2826_v53  ;;  %v3070_v41 = vadd.f32 %v3069_v46, %v5851_v28 }
 0x565   : > { %3108 = vmatmul.bf16.gmra.mxu1 %v5853_v9  ;;  %3197 = vmatmul.bf16.gmra.mxu2 %v5853_v9  ;;  %4306 = vtanh.f32 %v3070_v41 }
 0x566   : > { %3286 = vmatmul.bf16.gmra.mxu3 %v5853_v9  ;;  %v2775_v35 = vpop.f32.mrf.mxu0 }
 0x567   : > { %v2776_v51 = vadd.f32 %v5744_v21, %v2775_v35 }
 0x568   : > { %v3158_v13 = vpop.f32.mrf.mxu2 }
 0x569   : > { %v3159_v30 = vadd.f32 %v3158_v13, %v5858_v62  ;;  %3340 = vmatmul.bf16.gmra.mxu0 %v5767_v1  ;;  %v2828_v50 = vmax.f32 %v2776_v51, 0.0  ;;  %v5901_v42 = vpop.f32.mrf.mxu3 }
 0x56a   : > { %v3071_v63 = vpop.f32.mrf.mxu1 }
 0x56b   : > { %4308 = vtanh.f32 %v3159_v30  ;;  %v3072_v23 = vadd.f32 %v3071_v63, %v5851_v28  ;;  %v4307_v60 = vpop.eup %4306 }
 0x56d   : > { %4310 = vtanh.f32 %v3072_v23 }
 0x56e   : > { %v2777_v44 = vpop.f32.mrf.mxu0 }
 0x56f   : > { %v2778_v27 = vadd.f32 %v5744_v21, %v2777_v44 }
 0x570   : > { %v3160_v10 = vpop.f32.mrf.mxu2 }
 0x571   : > { %v4309_v3 = vpop.eup %4308  ;;  %v2829_v1 = vmax.f32 %v2778_v27, 0.0  ;;  %v3161_v7 = vadd.f32 %v3160_v10, %v5858_v62 }
 0x572   : > { %v3544_v4 = vpack.c.bf16 %v4309_v3, %v4307_v60  ;;  %v3074_v37 = vpop.f32.mrf.mxu1 }
 0x573   : > { %v5874_v49 = vpack.c.bf16 %v2829_v1, %v2828_v50  ;;  %4312 = vtanh.f32 %v3161_v7  ;;  %v3075_v47 = vadd.f32 %v3074_v37, %v5851_v28  ;;  %v4311_v26 = vpop.eup %4310  ;;  %v5913_v50 = vpop.f32.mrf.mxu3 }
 0x574   : > { %3608 = vst [vmem:[%s5871_s19] sm:$0xff] %v3544_v4 }
 0x575   : > { %3113 = vmatmul.bf16.gmra.mxu1 %v5874_v49  ;;  %3202 = vmatmul.bf16.gmra.mxu2 %v5874_v49  ;;  %4314 = vtanh.f32 %v3075_v47 }
 0x576   : > { %3291 = vmatmul.bf16.gmra.mxu3 %v5874_v49  ;;  %v2780_v2 = vpop.f32.mrf.mxu0 }
 0x577   : > { %v2781_v38 = vadd.f32 %v5744_v21, %v2780_v2 }
 0x578   : > { %v3163_v24 = vpop.f32.mrf.mxu2 }
 0x579   : > { %v4313_v61 = vpop.eup %4312  ;;  %v3164_v19 = vadd.f32 %v3163_v24, %v5858_v62  ;;  %3345 = vmatmul.bf16.gmra.mxu0 %v5783_v57  ;;  %v2830_v14 = vmax.f32 %v2781_v38, 0.0 }
 0x57a   : > { %v3546_v16 = vpack.c.bf16 %v4313_v61, %v4311_v26  ;;  %v3076_v5 = vpop.f32.mrf.mxu1 }
 0x57b   : > { %4316 = vtanh.f32 %v3164_v19  ;;  %v3077_v48 = vadd.f32 %v3076_v5, %v5851_v28  ;;  %v4315_v20 = vpop.eup %4314 }
 0x57c   : > { %3612 = vst [vmem:[%s5871_s19 + $0x10] sm:$0xff] %v3546_v16 }
 0x57d   : > { %4318 = vtanh.f32 %v3077_v48 }
 0x57e   : > { %v2782_v56 = vpop.f32.mrf.mxu0 }
 0x57f   : > { %v2783_v39 = vadd.f32 %v5744_v21, %v2782_v56  ;;  %v5922_v56 = vpop.f32.mrf.mxu3 }
 0x580   : > { %v3165_v40 = vpop.f32.mrf.mxu2 }
 0x581   : > { %v4317_v0 = vpop.eup %4316  ;;  %v2831_v55 = vmax.f32 %v2783_v39, 0.0  ;;  %v3166_v57 = vadd.f32 %v3165_v40, %v5858_v62 }
 0x582   : > { %v3548_v25 = vpack.c.bf16 %v4317_v0, %v4315_v20  ;;  %v3079_v33 = vpop.f32.mrf.mxu1 }
 0x583   : > { %v5888_v34 = vpack.c.bf16 %v2831_v55, %v2830_v14  ;;  %4320 = vtanh.f32 %v3166_v57  ;;  %v3080_v54 = vadd.f32 %v3079_v33, %v5851_v28  ;;  %v4319_v8 = vpop.eup %4318 }
 0x584   : > { %3614 = vst [vmem:[%s5871_s19 + $0x20] sm:$0xff] %v3548_v25 }
 0x585   : > { %3118 = vmatmul.bf16.gmra.mxu1 %v5888_v34  ;;  %3207 = vmatmul.bf16.gmra.mxu2 %v5888_v34  ;;  %4322 = vtanh.f32 %v3080_v54 }
 0x586   : > { %3296 = vmatmul.bf16.gmra.mxu3 %v5888_v34  ;;  %v2785_v6 = vpop.f32.mrf.mxu0 }
 0x587   : > { %v2786_v32 = vadd.f32 %v5744_v21, %v2785_v6  ;;  %v5933_v54 = vpop.f32.mrf.mxu3 }
 0x588   : > { %v3168_v18 = vpop.f32.mrf.mxu2 }
 0x589   : > { %v4321_v45 = vpop.eup %4320  ;;  %v3169_v52 = vadd.f32 %v3168_v18, %v5858_v62  ;;  %3350 = vmatmul.bf16.gmra.mxu0 %v5793_v17  ;;  %v2832_v35 = vmax.f32 %v2786_v32, 0.0 }
 0x58a   : > { %v3550_v36 = vpack.c.bf16 %v4321_v45, %v4319_v8  ;;  %v3081_v12 = vpop.f32.mrf.mxu1 }
 0x58b   : > { %4324 = vtanh.f32 %v3169_v52  ;;  %v3082_v15 = vadd.f32 %v3081_v12, %v5851_v28  ;;  %v4323_v53 = vpop.eup %4322 }
 0x58c   : > { %3616 = vst [vmem:[%s5871_s19 + $0x30] sm:$0xff] %v3550_v36 }
 0x58d   : > { %4326 = vtanh.f32 %v3082_v15 }
 0x58e   : > { %v2787_v31 = vpop.f32.mrf.mxu0 }
 0x58f   : > { %v2788_v29 = vadd.f32 %v5744_v21, %v2787_v31 }
 0x590   : > { %v3170_v46 = vpop.f32.mrf.mxu2 }
 0x591   : > { %v4325_v41 = vpop.eup %4324  ;;  %v2833_v17 = vmax.f32 %v2788_v29, 0.0  ;;  %v3171_v13 = vadd.f32 %v3170_v46, %v5858_v62 }
 0x592   : > { %v3552_v30 = vpack.c.bf16 %v4325_v41, %v4323_v53  ;;  %v3084_v63 = vpop.f32.mrf.mxu1 }
 0x593   : > { %v5904_v51 = vpack.c.bf16 %v2833_v17, %v2832_v35  ;;  %4328 = vtanh.f32 %v3171_v13  ;;  %v3085_v23 = vadd.f32 %v3084_v63, %v5851_v28  ;;  %v4327_v27 = vpop.eup %4326  ;;  %v5945_v35 = vpop.f32.mrf.mxu3 }
 0x594   : > { %3618 = vst [vmem:[%s5871_s19 + $0x40] sm:$0xff] %v3552_v30 }
 0x595   : > { %3123 = vmatmul.bf16.gmra.mxu1 %v5904_v51  ;;  %3212 = vmatmul.bf16.gmra.mxu2 %v5904_v51  ;;  %4330 = vtanh.f32 %v3085_v23 }
 0x596   : > { %3301 = vmatmul.bf16.gmra.mxu3 %v5904_v51  ;;  %v2790_v44 = vpop.f32.mrf.mxu0 }
 0x597   : > { %v2791_v4 = vadd.f32 %v5744_v21, %v2790_v44 }
 0x598   : > { %v3173_v60 = vpop.f32.mrf.mxu2 }
 0x599   : > { %v4329_v10 = vpop.eup %4328  ;;  %v3174_v3 = vadd.f32 %v3173_v60, %v5858_v62  ;;  %3355 = vmatmul.bf16.gmra.mxu0 %v5809_v43  ;;  %v2834_v19 = vmax.f32 %v2791_v4, 0.0 }
 0x59a   : > { %v3554_v1 = vpack.c.bf16 %v4329_v10, %v4327_v27  ;;  %v3086_v7 = vpop.f32.mrf.mxu1 }
 0x59b   : > { %4332 = vtanh.f32 %v3174_v3  ;;  %v3087_v37 = vadd.f32 %v3086_v7, %v5851_v28  ;;  %v4331_v26 = vpop.eup %4330 }
 0x59c   : > { %3620 = vst [vmem:[%s5871_s19 + $0x50] sm:$0xff] %v3554_v1 }
 0x59d   : > { %4334 = vtanh.f32 %v3087_v37 }
 0x59e   : > { %v2792_v47 = vpop.f32.mrf.mxu0 }
 0x59f   : > { %v2793_v2 = vadd.f32 %v5744_v21, %v2792_v47  ;;  %v5954_v47 = vpop.f32.mrf.mxu3 }
 0x5a0   : > { %v3175_v24 = vpop.f32.mrf.mxu2 }
 0x5a1   : > { %v4333_v61 = vpop.eup %4332  ;;  %v2835_v43 = vmax.f32 %v2793_v2, 0.0  ;;  %v3176_v16 = vadd.f32 %v3175_v24, %v5858_v62 }
 0x5a2   : > { %v3556_v5 = vpack.c.bf16 %v4333_v61, %v4331_v26  ;;  %v3089_v38 = vpop.f32.mrf.mxu1 }
 0x5a3   : > { %v5920_v48 = vpack.c.bf16 %v2835_v43, %v2834_v19  ;;  %4336 = vtanh.f32 %v3176_v16  ;;  %v3090_v39 = vadd.f32 %v3089_v38, %v5851_v28  ;;  %v4335_v40 = vpop.eup %4334 }
 0x5a4   : > { %3622 = vst [vmem:[%s5871_s19 + $0x60] sm:$0xff] %v3556_v5 }
 0x5a5   : > { %3128 = vmatmul.bf16.gmra.mxu1 %v5920_v48  ;;  %3217 = vmatmul.bf16.gmra.mxu2 %v5920_v48  ;;  %4338 = vtanh.f32 %v3090_v39 }
 0x5a6   : > { %3306 = vmatmul.bf16.gmra.mxu3 %v5920_v48  ;;  %v2795_v20 = vpop.f32.mrf.mxu0 }
 0x5a7   : > { %v2796_v33 = vadd.f32 %v5744_v21, %v2795_v20 }
 0x5a8   : > { %v3178_v0 = vpop.f32.mrf.mxu2 }
 0x5a9   : > { %v4337_v14 = vpop.eup %4336  ;;  %v3179_v55 = vadd.f32 %v3178_v0, %v5858_v62  ;;  %3360 = vmatmul.bf16.gmra.mxu0 %v5819_v11  ;;  %v2836_v12 = vmax.f32 %v2796_v33, 0.0  ;;  %v5972_v33 = vperm.slane %v5848_v59, 2 }
 0x5aa   : > { %v3558_v57 = vpack.c.bf16 %v4337_v14, %v4335_v40  ;;  %v3091_v25 = vpop.f32.mrf.mxu1  ;;  %v5965_v40 = vpop.f32.mrf.mxu3 }
 0x5ab   : > { %4340 = vtanh.f32 %v3179_v55  ;;  %v3092_v6 = vadd.f32 %v3091_v25, %v5851_v28  ;;  %v4339_v45 = vpop.eup %4338 }
 0x5ac   : > { %3624 = vst [vmem:[%s5871_s19 + $0x70] sm:$0xff] %v3558_v57 }
 0x5ad   : > { %4342 = vtanh.f32 %v3092_v6 }
 0x5ae   : > { %v2797_v8 = vpop.f32.mrf.mxu0 }
 0x5af   : > { %v2798_v18 = vadd.f32 %v5744_v21, %v2797_v8 }
 0x5b0   : > { %v3180_v52 = vpop.f32.mrf.mxu2 }
 0x5b1   : > { %v4341_v36 = vpop.eup %4340  ;;  %v2837_v11 = vmax.f32 %v2798_v18, 0.0  ;;  %v3181_v32 = vadd.f32 %v3180_v52, %v5858_v62 }
 0x5b2   : > { %v3560_v15 = vpack.c.bf16 %v4341_v36, %v4339_v45  ;;  %v3094_v31 = vpop.f32.mrf.mxu1 }
 0x5b3   : > { %v5938_v29 = vpack.c.bf16 %v2837_v11, %v2836_v12  ;;  %4344 = vtanh.f32 %v3181_v32  ;;  %v3095_v53 = vadd.f32 %v3094_v31, %v5851_v28  ;;  %v4343_v41 = vpop.eup %4342  ;;  %v5978_v11 = vperm.slane %v5848_v59, 3  ;;  %v5985_v32 = vpop.f32.mrf.mxu3 }
 0x5b4   : > { %3626 = vst [vmem:[%s5871_s19 + $0x80] sm:$0xff] %v3560_v15 }
 0x5b5   : > { %3133 = vmatmul.bf16.gmra.mxu1 %v5938_v29  ;;  %3222 = vmatmul.bf16.gmra.mxu2 %v5938_v29  ;;  %4346 = vtanh.f32 %v3095_v53 }
 0x5b6   : > { %3311 = vmatmul.bf16.gmra.mxu3 %v5938_v29  ;;  %v2800_v46 = vpop.f32.mrf.mxu0 }
 0x5b7   : > { %v2801_v44 = vadd.f32 %v5744_v21, %v2800_v46 }
 0x5b8   : > { %v3183_v17 = vpop.f32.mrf.mxu2 }
 0x5b9   : > { %v4345_v13 = vpop.eup %4344  ;;  %v3184_v30 = vadd.f32 %v3183_v17, %v5858_v62  ;;  %3365 = vmatmul.bf16.gmra.mxu0 %v5829_v22  ;;  %v2838_v4 = vmax.f32 %v2801_v44, 0.0 }
 0x5ba   : > { %v3562_v63 = vpack.c.bf16 %v4345_v13, %v4343_v41  ;;  %v3096_v23 = vpop.f32.mrf.mxu1 }
 0x5bb   : > { %4348 = vtanh.f32 %v3184_v30  ;;  %v3097_v27 = vadd.f32 %v3096_v23, %v5851_v28  ;;  %v4347_v3 = vpop.eup %4346  ;;  %v3250_v30 = vadd.f32 %v5913_v50, %v5972_v33 }
 0x5bc   : > { %3628 = vst [vmem:[%s5871_s19 + $0x90] sm:$0xff] %v3562_v63 }
 0x5bd   : > { %4350 = vtanh.f32 %v3097_v27 }
 0x5be   : > { %v2802_v60 = vpop.f32.mrf.mxu0 }
 0x5bf   : > { %v2803_v10 = vadd.f32 %v5744_v21, %v2802_v60 }
 0x5c0   : > { %v3185_v1 = vpop.f32.mrf.mxu2 }
 0x5c1   : > { %v4349_v7 = vpop.eup %4348  ;;  %v2839_v37 = vmax.f32 %v2803_v10, 0.0  ;;  %v3186_v22 = vadd.f32 %v3185_v1, %v5858_v62 }
 0x5c2   : > { %v3564_v2 = vpack.c.bf16 %v4349_v7, %v4347_v3  ;;  %v3099_v26 = vpop.f32.mrf.mxu1 }
 0x5c3   : > { %v5956_v24 = vpack.c.bf16 %v2839_v37, %v2838_v4  ;;  %4352 = vtanh.f32 %v3186_v22  ;;  %v3100_v61 = vadd.f32 %v3099_v26, %v5851_v28  ;;  %v4351_v43 = vpop.eup %4350  ;;  %v6006_v22 = vpop.f32.mrf.mxu3 }
 0x5c4   : > { %3630 = vst [vmem:[%s5871_s19 + $0xa0] sm:$0xff] %v3564_v2  ;;  %v3253_v2 = vadd.f32 %v5922_v56, %v5972_v33 }
 0x5c5   : > { %3138 = vmatmul.bf16.gmra.mxu1 %v5956_v24  ;;  %3227 = vmatmul.bf16.gmra.mxu2 %v5956_v24  ;;  %4354 = vtanh.f32 %v3100_v61 }
 0x5c6   : > { %3316 = vmatmul.bf16.gmra.mxu3 %v5956_v24  ;;  %v2805_v19 = vpop.f32.mrf.mxu0 }
 0x5c7   : > { %v2806_v0 = vadd.f32 %v5744_v21, %v2805_v19 }
 0x5c8   : > { %v3188_v16 = vpop.f32.mrf.mxu2 }
 0x5c9   : > { %v4353_v5 = vpop.eup %4352  ;;  %v3189_v38 = vadd.f32 %v3188_v16, %v5858_v62  ;;  %3370 = vmatmul.bf16.gmra.mxu0 %v5837_v58  ;;  %v2840_v8 = vmax.f32 %v2806_v0, 0.0 }
 0x5ca   : > { %v3566_v39 = vpack.c.bf16 %v4353_v5, %v4351_v43  ;;  %v3101_v20 = vpop.f32.mrf.mxu1 }
 0x5cb   : > { %4356 = vtanh.f32 %v3189_v38  ;;  %v3102_v14 = vadd.f32 %v3101_v20, %v5851_v28  ;;  %v4355_v25 = vpop.eup %4354 }
 0x5cc   : > { %3632 = vst [vmem:[%s5871_s19 + $0xb0] sm:$0xff] %v3566_v39 }
 0x5cd   : > { %4358 = vtanh.f32 %v3102_v14 }
 0x5ce   : > { %v2807_v55 = vpop.f32.mrf.mxu0 }
 0x5cf   : > { %v2808_v57 = vadd.f32 %v5744_v21, %v2807_v55  ;;  %v3248_v21 = vadd.f32 %v5901_v42, %v5972_v33  ;;  %v3255_v55 = vadd.f32 %v5933_v54, %v5972_v33 }
 0x5d0   : > { %v3190_v58 = vpop.f32.mrf.mxu2 }
 0x5d1   : > { %v4357_v6 = vpop.eup %4356  ;;  %v2841_v18 = vmax.f32 %v2808_v57, 0.0  ;;  %v3191_v45 = vadd.f32 %v3190_v58, %v5858_v62  ;;  %v6021_v57 = vpop.f32.mrf.mxu3 }
 0x5d2   : > { %v3568_v52 = vpack.c.bf16 %v4357_v6, %v4355_v25  ;;  %v3104_v36 = vpop.f32.mrf.mxu1 }
 0x5d3   : > { %v5975_v12 = vpack.c.bf16 %v2841_v18, %v2840_v8  ;;  %4360 = vtanh.f32 %v3191_v45  ;;  %v3105_v15 = vadd.f32 %v3104_v36, %v5851_v28  ;;  %v4359_v59 = vpop.eup %4358 }
 0x5d4   : > { %3634 = vst [vmem:[%s5871_s19 + $0xc0] sm:$0xff] %v3568_v52  ;;  %4362 = vtanh.f32 %v3248_v21 }
 0x5d5   : > { %3143 = vmatmul.bf16.gmra.mxu1 %v5975_v12  ;;  %3232 = vmatmul.bf16.gmra.mxu2 %v5975_v12 }
 0x5d6   : > { %3321 = vmatmul.bf16.gmra.mxu3 %v5975_v12  ;;  %v3336_v31 = vpop.f32.mrf.mxu0 }
 0x5d7   : > { %v3337_v53 = vadd.f32 %v3336_v31, %v5978_v11  ;;  %v3258_v31 = vadd.f32 %v5945_v35, %v5972_v33 }
 0x5d8   : > { %v3193_v46 = vpop.f32.mrf.mxu2 }
 0x5d9   : > { %v4361_v41 = vpop.eup %4360  ;;  %4364 = vtanh.f32 %v3337_v53  ;;  %v3194_v42 = vadd.f32 %v3193_v46, %v5858_v62  ;;  %3375 = vmatmul.bf16.gmra.mxu0 %v5853_v9 }
 0x5da   : > { %v3570_v17 = vpack.c.bf16 %v4361_v41, %v4359_v59  ;;  %4366 = vtanh.f32 %v3105_v15  ;;  %v3106_v13 = vpop.f32.mrf.mxu1  ;;  %v4363_v63 = vpop.eup %4362 }
 0x5db   : > { %4368 = vtanh.f32 %v3194_v42  ;;  %v3107_v23 = vadd.f32 %v3106_v13, %v5851_v28  ;;  %v6033_v42 = vpop.f32.mrf.mxu3 }
 0x5dc   : > { %3636 = vst [vmem:[%s5871_s19 + $0xd0] sm:$0xff] %v3570_v17  ;;  %4370 = vtanh.f32 %v3250_v30 }
 0x5de   : > { %v3338_v44 = vpop.f32.mrf.mxu0 }
 0x5df   : > { %v4365_v27 = vpop.eup %4364  ;;  %v3339_v9 = vadd.f32 %v3338_v44, %v5978_v11 }
 0x5e0   : > { %v4367_v10 = vpop.eup %4366  ;;  %v3545_v3 = vpack.c.bf16 %v4365_v27, %v4363_v63  ;;  %v3195_v1 = vpop.f32.mrf.mxu2 }
 0x5e1   : > { %v4369_v7 = vpop.eup %4368  ;;  %4372 = vtanh.f32 %v3339_v9  ;;  %v3196_v50 = vadd.f32 %v3195_v1, %v5858_v62  ;;  %v3260_v9 = vadd.f32 %v5954_v47, %v5972_v33 }
 0x5e2   : > { %3611 = vst.msk [vmem:[%s5871_s19 + $0x8] sm:$0xff] %vm5997_vm8, %v3545_v3  ;;  %v3572_v4 = vpack.c.bf16 %v4369_v7, %v4367_v10  ;;  %4374 = vtanh.f32 %v3107_v23  ;;  %v3109_v37 = vpop.f32.mrf.mxu1  ;;  %v4371_v26 = vpop.eup %4370 }
 0x5e3   : > { %4376 = vtanh.f32 %v3196_v50  ;;  %v3110_v61 = vadd.f32 %v3109_v37, %v5851_v28 }
 0x5e4   : > { %3638 = vst [vmem:[%s5871_s19 + $0xe0] sm:$0xff] %v3572_v4  ;;  %4378 = vtanh.f32 %v3253_v2 }
 0x5e6   : > { %v3341_v19 = vpop.f32.mrf.mxu0 }
 0x5e7   : > { %v4373_v43 = vpop.eup %4372  ;;  %v3342_v16 = vadd.f32 %v3341_v19, %v5978_v11 }
 0x5e8   : > { %v4375_v5 = vpop.eup %4374  ;;  %v3547_v38 = vpack.c.bf16 %v4373_v43, %v4371_v26  ;;  %v3198_v39 = vpop.f32.mrf.mxu2  ;;  %v3263_v43 = vadd.f32 %v5965_v40, %v5972_v33 }
 0x5e9   : > { %v4377_v20 = vpop.eup %4376  ;;  %4380 = vtanh.f32 %v3342_v16  ;;  %v3199_v0 = vadd.f32 %v3198_v39, %v5858_v62  ;;  %3380 = vmatmul.bf16.gmra.mxu0 %v5874_v49  ;;  %v6046_v26 = vpop.f32.mrf.mxu3 }
 0x5ea   : > { %3613 = vst.msk [vmem:[%s5871_s19 + $0x18] sm:$0xff] %vm5997_vm8, %v3547_v38  ;;  %v3574_v56 = vpack.c.bf16 %v4377_v20, %v4375_v5  ;;  %4382 = vtanh.f32 %v3110_v61  ;;  %v3111_v14 = vpop.f32.mrf.mxu1  ;;  %v4379_v25 = vpop.eup %4378 }
 0x5eb   : > { %4384 = vtanh.f32 %v3199_v0  ;;  %v3112_v58 = vadd.f32 %v3111_v14, %v5851_v28 }
 0x5ec   : > { %3640 = vst [vmem:[%s5871_s19 + $0xf0] sm:$0xff] %v3574_v56  ;;  %4386 = vtanh.f32 %v3255_v55 }
 0x5ee   : > { %v3343_v6 = vpop.f32.mrf.mxu0 }
 0x5ef   : > { %v4381_v49 = vpop.eup %4380  ;;  %v3344_v8 = vadd.f32 %v3343_v6, %v5978_v11 }
 0x5f0   : > { %v4383_v18 = vpop.eup %4382  ;;  %v3549_v45 = vpack.c.bf16 %v4381_v49, %v4379_v25  ;;  %v3200_v52 = vpop.f32.mrf.mxu2  ;;  %v3265_v49 = vadd.f32 %v5985_v32, %v5972_v33 }
 0x5f1   : > { %v4385_v36 = vpop.eup %4384  ;;  %4388 = vtanh.f32 %v3344_v8  ;;  %v3201_v21 = vadd.f32 %v3200_v52, %v5858_v62  ;;  %v6062_v6 = vpop.f32.mrf.mxu3 }
 0x5f2   : > { %3615 = vst.msk [vmem:[%s5871_s19 + $0x28] sm:$0xff] %vm5997_vm8, %v3549_v45  ;;  %v3576_v54 = vpack.c.bf16 %v4385_v36, %v4383_v18  ;;  %4390 = vtanh.f32 %v3112_v58  ;;  %v3114_v15 = vpop.f32.mrf.mxu1  ;;  %v4387_v53 = vpop.eup %4386 }
 0x5f3   : > { %4392 = vtanh.f32 %v3201_v21  ;;  %v3115_v59 = vadd.f32 %v3114_v15, %v5851_v28 }
 0x5f4   : > { %3642 = vst [vmem:[%s5871_s19 + $0x100] sm:$0xff] %v3576_v54  ;;  %4394 = vtanh.f32 %v3258_v31 }
 0x5f6   : > { %v3346_v46 = vpop.f32.mrf.mxu0 }
 0x5f7   : > { %v4389_v41 = vpop.eup %4388  ;;  %v3347_v17 = vadd.f32 %v3346_v46, %v5978_v11 }
 0x5f8   : > { %v4391_v13 = vpop.eup %4390  ;;  %v3551_v30 = vpack.c.bf16 %v4389_v41, %v4387_v53  ;;  %v3203_v63 = vpop.f32.mrf.mxu2 }
 0x5f9   : > { %v4393_v23 = vpop.eup %4392  ;;  %4396 = vtanh.f32 %v3347_v17  ;;  %v3204_v35 = vadd.f32 %v3203_v63, %v5858_v62  ;;  %3385 = vmatmul.bf16.gmra.mxu0 %v5888_v34  ;;  %v6076_v46 = vpop.f32.mrf.mxu3 }
 0x5fa   : > { %3617 = vst.msk [vmem:[%s5871_s19 + $0x38] sm:$0xff] %vm5997_vm8, %v3551_v30  ;;  %v3578_v44 = vpack.c.bf16 %v4393_v23, %v4391_v13  ;;  %4398 = vtanh.f32 %v3115_v59  ;;  %v3116_v27 = vpop.f32.mrf.mxu1  ;;  %v4395_v10 = vpop.eup %4394  ;;  %v3268_v59 = vadd.f32 %v6006_v22, %v5972_v33 }
 0x5fb   : > { %4400 = vtanh.f32 %v3204_v35  ;;  %v3117_v3 = vadd.f32 %v3116_v27, %v5851_v28 }
 0x5fc   : > { %3644 = vst [vmem:[%s5871_s19 + $0x110] sm:$0xff] %v3578_v44  ;;  %4402 = vtanh.f32 %v3260_v9 }
 0x5fe   : > { %v3348_v1 = vpop.f32.mrf.mxu0 }
 0x5ff   : > { %v4397_v7 = vpop.eup %4396  ;;  %v3349_v34 = vadd.f32 %v3348_v1, %v5978_v11 }
 0x600   : > { %v4399_v50 = vpop.eup %4398  ;;  %v3553_v4 = vpack.c.bf16 %v4397_v7, %v4395_v10  ;;  %v3205_v37 = vpop.f32.mrf.mxu2 }
 0x601   : > { %v4401_v2 = vpop.eup %4400  ;;  %4404 = vtanh.f32 %v3349_v34  ;;  %v3206_v61 = vadd.f32 %v3205_v37, %v5858_v62 }
 0x602   : > { %3619 = vst.msk [vmem:[%s5871_s19 + $0x48] sm:$0xff] %vm5997_vm8, %v3553_v4  ;;  %v3580_v47 = vpack.c.bf16 %v4401_v2, %v4399_v50  ;;  %4406 = vtanh.f32 %v3117_v3  ;;  %v3119_v19 = vpop.f32.mrf.mxu1  ;;  %v4403_v16 = vpop.eup %4402  ;;  %v3270_v3 = vadd.f32 %v6021_v57, %v5972_v33 }
 0x603   : > { %4408 = vtanh.f32 %v3206_v61  ;;  %v3120_v5 = vadd.f32 %v3119_v19, %v5851_v28  ;;  %v6089_v4 = vpop.f32.mrf.mxu3 }
 0x604   : > { %3646 = vst [vmem:[%s5871_s19 + $0x120] sm:$0xff] %v3580_v47  ;;  %4410 = vtanh.f32 %v3263_v43 }
 0x606   : > { %v3351_v38 = vpop.f32.mrf.mxu0 }
 0x607   : > { %v4405_v39 = vpop.eup %4404  ;;  %v3352_v20 = vadd.f32 %v3351_v38, %v5978_v11 }
 0x608   : > { %v4407_v0 = vpop.eup %4406  ;;  %v3555_v56 = vpack.c.bf16 %v4405_v39, %v4403_v16  ;;  %v3208_v14 = vpop.f32.mrf.mxu2  ;;  %v3273_v16 = vadd.f32 %v6033_v42, %v5972_v33 }
 0x609   : > { %v4409_v55 = vpop.eup %4408  ;;  %4412 = vtanh.f32 %v3352_v20  ;;  %v3209_v25 = vadd.f32 %v3208_v14, %v5858_v62  ;;  %3390 = vmatmul.bf16.gmra.mxu0 %v5904_v51 }
 0x60a   : > { %3621 = vst.msk [vmem:[%s5871_s19 + $0x58] sm:$0xff] %vm5997_vm8, %v3555_v56  ;;  %v3582_v40 = vpack.c.bf16 %v4409_v55, %v4407_v0  ;;  %4414 = vtanh.f32 %v3120_v5  ;;  %v3121_v58 = vpop.f32.mrf.mxu1  ;;  %v4411_v8 = vpop.eup %4410 }
 0x60b   : > { %4416 = vtanh.f32 %v3209_v25  ;;  %v3122_v18 = vadd.f32 %v3121_v58, %v5851_v28 }
 0x60c   : > { %3648 = vst [vmem:[%s5871_s19 + $0x130] sm:$0xff] %v3582_v40  ;;  %4418 = vtanh.f32 %v3265_v49  ;;  %v6101_v40 = vpop.f32.mrf.mxu3 }
 0x60e   : > { %v3353_v45 = vpop.f32.mrf.mxu0 }
 0x60f   : > { %v4413_v51 = vpop.eup %4412  ;;  %v3354_v52 = vadd.f32 %v3353_v45, %v5978_v11 }
 0x610   : > { %v4415_v36 = vpop.eup %4414  ;;  %v3557_v21 = vpack.c.bf16 %v4413_v51, %v4411_v8  ;;  %v3210_v54 = vpop.f32.mrf.mxu2  ;;  %v3275_v8 = vadd.f32 %v6046_v26, %v5972_v33 }
 0x611   : > { %v4417_v15 = vpop.eup %4416  ;;  %4420 = vtanh.f32 %v3354_v52  ;;  %v3211_v31 = vadd.f32 %v3210_v54, %v5858_v62 }
 0x612   : > { %3623 = vst.msk [vmem:[%s5871_s19 + $0x68] sm:$0xff] %vm5997_vm8, %v3557_v21  ;;  %v3584_v32 = vpack.c.bf16 %v4417_v15, %v4415_v36  ;;  %4422 = vtanh.f32 %v3122_v18  ;;  %v3124_v53 = vpop.f32.mrf.mxu1  ;;  %v4419_v41 = vpop.eup %4418 }
 0x613   : > { %4424 = vtanh.f32 %v3211_v31  ;;  %v3125_v17 = vadd.f32 %v3124_v53, %v5851_v28 }
 0x614   : > { %3650 = vst [vmem:[%s5871_s19 + $0x140] sm:$0xff] %v3584_v32  ;;  %4426 = vtanh.f32 %v3268_v59  ;;  %v6117_v53 = vpop.f32.mrf.mxu3  ;;  %v3278_v59 = vadd.f32 %v6062_v6, %v5972_v33 }
 0x616   : > { %v3356_v13 = vpop.f32.mrf.mxu0 }
 0x617   : > { %v4421_v30 = vpop.eup %4420  ;;  %v3357_v63 = vadd.f32 %v3356_v13, %v5978_v11 }
 0x618   : > { %v4423_v23 = vpop.eup %4422  ;;  %v3559_v35 = vpack.c.bf16 %v4421_v30, %v4419_v41  ;;  %v3213_v44 = vpop.f32.mrf.mxu2 }
 0x619   : > { %v4425_v27 = vpop.eup %4424  ;;  %4428 = vtanh.f32 %v3357_v63  ;;  %v3214_v22 = vadd.f32 %v3213_v44, %v5858_v62  ;;  %3395 = vmatmul.bf16.gmra.mxu0 %v5920_v48 }
 0x61a   : > { %3625 = vst.msk [vmem:[%s5871_s19 + $0x78] sm:$0xff] %vm5997_vm8, %v3559_v35  ;;  %v3586_v9 = vpack.c.bf16 %v4425_v27, %v4423_v23  ;;  %4430 = vtanh.f32 %v3125_v17  ;;  %v3126_v10 = vpop.f32.mrf.mxu1  ;;  %v4427_v1 = vpop.eup %4426 }
 0x61b   : > { %4432 = vtanh.f32 %v3214_v22  ;;  %v3127_v7 = vadd.f32 %v3126_v10, %v5851_v28  ;;  %v3280_v10 = vadd.f32 %v6076_v46, %v5972_v33 }
 0x61c   : > { %3652 = vst [vmem:[%s5871_s19 + $0x150] sm:$0xff] %v3586_v9  ;;  %4434 = vtanh.f32 %v3270_v3  ;;  %v6132_v3 = vpop.f32.mrf.mxu3 }
 0x61e   : > { %v3358_v34 = vpop.f32.mrf.mxu0 }
 0x61f   : > { %v4429_v50 = vpop.eup %4428  ;;  %v3359_v48 = vadd.f32 %v3358_v34, %v5978_v11 }
 0x620   : > { %v4431_v37 = vpop.eup %4430  ;;  %v3561_v2 = vpack.c.bf16 %v4429_v50, %v4427_v1  ;;  %v3215_v61 = vpop.f32.mrf.mxu2 }
 0x621   : > { %v4433_v47 = vpop.eup %4432  ;;  %4436 = vtanh.f32 %v3359_v48  ;;  %v3216_v19 = vadd.f32 %v3215_v61, %v5858_v62 }
 0x622   : > { %3627 = vst.msk [vmem:[%s5871_s19 + $0x88] sm:$0xff] %vm5997_vm8, %v3561_v2  ;;  %v3588_v57 = vpack.c.bf16 %v4433_v47, %v4431_v37  ;;  %4438 = vtanh.f32 %v3127_v7  ;;  %v3129_v43 = vpop.f32.mrf.mxu1  ;;  %v4435_v5 = vpop.eup %4434 }
 0x623   : > { %4440 = vtanh.f32 %v3216_v19  ;;  %v3130_v38 = vadd.f32 %v3129_v43, %v5851_v28 }
 0x624   : > { %3654 = vst [vmem:[%s5871_s19 + $0x160] sm:$0xff] %v3588_v57  ;;  %4442 = vtanh.f32 %v3273_v16  ;;  %v3283_v57 = vadd.f32 %v6089_v4, %v5972_v33 }
 0x626   : > { %v3361_v39 = vpop.f32.mrf.mxu0 }
 0x627   : > { %v4437_v20 = vpop.eup %4436  ;;  %v3362_v0 = vadd.f32 %v3361_v39, %v5978_v11  ;;  %v6144_v39 = vpop.f32.mrf.mxu3 }
 0x628   : > { %v4439_v56 = vpop.eup %4438  ;;  %v3563_v14 = vpack.c.bf16 %v4437_v20, %v4435_v5  ;;  %v3218_v55 = vpop.f32.mrf.mxu2 }
 0x629   : > { %v4441_v25 = vpop.eup %4440  ;;  %4444 = vtanh.f32 %v3362_v0  ;;  %v3219_v42 = vadd.f32 %v3218_v55, %v5858_v62  ;;  %3400 = vmatmul.bf16.gmra.mxu0 %v5938_v29 }
 0x62a   : > { %3629 = vst.msk [vmem:[%s5871_s19 + $0x98] sm:$0xff] %vm5997_vm8, %v3563_v14  ;;  %v3590_v58 = vpack.c.bf16 %v4441_v25, %v4439_v56  ;;  %4446 = vtanh.f32 %v3130_v38  ;;  %v3131_v49 = vpop.f32.mrf.mxu1  ;;  %v4443_v18 = vpop.eup %4442 }
 0x62b   : > { %4448 = vtanh.f32 %v3219_v42  ;;  %v3132_v45 = vadd.f32 %v3131_v49, %v5851_v28 }
 0x62c   : > { %3656 = vst [vmem:[%s5871_s19 + $0x170] sm:$0xff] %v3590_v58  ;;  %4450 = vtanh.f32 %v3275_v8  ;;  %v3285_v58 = vadd.f32 %v6101_v40, %v5972_v33 }
 0x62e   : > { %v3363_v51 = vpop.f32.mrf.mxu0 }
 0x62f   : > { %v4445_v52 = vpop.eup %4444  ;;  %v3364_v29 = vadd.f32 %v3363_v51, %v5978_v11 }
 0x630   : > { %v4447_v36 = vpop.eup %4446  ;;  %v3565_v21 = vpack.c.bf16 %v4445_v52, %v4443_v18  ;;  %v3220_v54 = vpop.f32.mrf.mxu2 }
 0x631   : > { %v4449_v15 = vpop.eup %4448  ;;  %4452 = vtanh.f32 %v3364_v29  ;;  %v3221_v31 = vadd.f32 %v3220_v54, %v5858_v62 }
 0x632   : > { %3631 = vst.msk [vmem:[%s5871_s19 + $0xa8] sm:$0xff] %vm5997_vm8, %v3565_v21  ;;  %v3592_v26 = vpack.c.bf16 %v4449_v15, %v4447_v36  ;;  %4454 = vtanh.f32 %v3132_v45  ;;  %v3134_v32 = vpop.f32.mrf.mxu1  ;;  %v4451_v41 = vpop.eup %4450 }
 0x633   : > { %4456 = vtanh.f32 %v3221_v31  ;;  %v3135_v17 = vadd.f32 %v3134_v32, %v5851_v28  ;;  %v3294_v21 = vpop.f32.mrf.mxu3  ;;  %v3288_v31 = vadd.f32 %v6117_v53, %v5972_v33 }
 0x634   : > { %3658 = vst [vmem:[%s5871_s19 + $0x180] sm:$0xff] %v3592_v26  ;;  %4458 = vtanh.f32 %v3278_v59 }
 0x636   : > { %v3366_v13 = vpop.f32.mrf.mxu0 }
 0x637   : > { %v4453_v30 = vpop.eup %4452  ;;  %v3367_v63 = vadd.f32 %v3366_v13, %v5978_v11 }
 0x638   : > { %v4455_v23 = vpop.eup %4454  ;;  %v3567_v35 = vpack.c.bf16 %v4453_v30, %v4451_v41  ;;  %v3223_v44 = vpop.f32.mrf.mxu2 }
 0x639   : > { %v4457_v27 = vpop.eup %4456  ;;  %4460 = vtanh.f32 %v3367_v63  ;;  %v3224_v22 = vadd.f32 %v3223_v44, %v5858_v62  ;;  %3405 = vmatmul.bf16.gmra.mxu0 %v5956_v24 }
 0x63a   : > { %3633 = vst.msk [vmem:[%s5871_s19 + $0xb8] sm:$0xff] %vm5997_vm8, %v3567_v35  ;;  %v3594_v6 = vpack.c.bf16 %v4457_v27, %v4455_v23  ;;  %4462 = vtanh.f32 %v3135_v17  ;;  %v3136_v9 = vpop.f32.mrf.mxu1  ;;  %v4459_v1 = vpop.eup %4458 }
 0x63b   : > { %4464 = vtanh.f32 %v3224_v22  ;;  %v3137_v7 = vadd.f32 %v3136_v9, %v5851_v28  ;;  %v3297_v44 = vpop.f32.mrf.mxu3  ;;  %v3290_v22 = vadd.f32 %v6132_v3, %v5972_v33 }
 0x63c   : > { %3660 = vst [vmem:[%s5871_s19 + $0x190] sm:$0xff] %v3594_v6  ;;  %4466 = vtanh.f32 %v3280_v10 }
 0x63e   : > { %v3368_v34 = vpop.f32.mrf.mxu0 }
 0x63f   : > { %v4461_v24 = vpop.eup %4460  ;;  %v3369_v50 = vadd.f32 %v3368_v34, %v5978_v11 }
 0x640   : > { %v4463_v48 = vpop.eup %4462  ;;  %v3569_v37 = vpack.c.bf16 %v4461_v24, %v4459_v1  ;;  %v3225_v2 = vpop.f32.mrf.mxu2 }
 0x641   : > { %v4465_v61 = vpop.eup %4464  ;;  %4468 = vtanh.f32 %v3369_v50  ;;  %v3226_v47 = vadd.f32 %v3225_v2, %v5858_v62 }
 0x642   : > { %3635 = vst.msk [vmem:[%s5871_s19 + $0xc8] sm:$0xff] %vm5997_vm8, %v3569_v37  ;;  %v3596_v46 = vpack.c.bf16 %v4465_v61, %v4463_v48  ;;  %4470 = vtanh.f32 %v3137_v7  ;;  %v3139_v19 = vpop.f32.mrf.mxu1  ;;  %v4467_v43 = vpop.eup %4466 }
 0x643   : > { %4472 = vtanh.f32 %v3226_v47  ;;  %v3140_v16 = vadd.f32 %v3139_v19, %v5851_v28  ;;  %v3299_v2 = vpop.f32.mrf.mxu3 }
 0x644   : > { %3662 = vst [vmem:[%s5871_s19 + $0x1a0] sm:$0xff] %v3596_v46  ;;  %4474 = vtanh.f32 %v3283_v57 }
 0x646   : > { %v3371_v5 = vpop.f32.mrf.mxu0 }
 0x647   : > { %v4469_v38 = vpop.eup %4468  ;;  %v3372_v20 = vadd.f32 %v3371_v5, %v5978_v11  ;;  %v3295_v5 = vadd.f32 %v3294_v21, %v5972_v33 }
 0x648   : > { %v4471_v0 = vpop.eup %4470  ;;  %v3571_v56 = vpack.c.bf16 %v4469_v38, %v4467_v43  ;;  %v3228_v14 = vpop.f32.mrf.mxu2 }
 0x649   : > { %v4473_v55 = vpop.eup %4472  ;;  %4476 = vtanh.f32 %v3372_v20  ;;  %v3229_v4 = vadd.f32 %v3228_v14, %v5858_v62  ;;  %3410 = vmatmul.bf16.gmra.mxu0 %v5975_v12 }
 0x64a   : > { %3637 = vst.msk [vmem:[%s5871_s19 + $0xd8] sm:$0xff] %vm5997_vm8, %v3571_v56  ;;  %v3598_v25 = vpack.c.bf16 %v4473_v55, %v4471_v0  ;;  %4478 = vtanh.f32 %v3140_v16  ;;  %v3141_v42 = vpop.f32.mrf.mxu1  ;;  %v4475_v49 = vpop.eup %4474  ;;  %v3298_v55 = vadd.f32 %v3297_v44, %v5972_v33 }
 0x64b   : > { %4480 = vtanh.f32 %v3229_v4  ;;  %v3142_v8 = vadd.f32 %v3141_v42, %v5851_v28  ;;  %v3302_v0 = vpop.f32.mrf.mxu3 }
 0x64c   : > { %3664 = vst [vmem:[%s5871_s19 + $0x1b0] sm:$0xff] %v3598_v25  ;;  %4482 = vtanh.f32 %v3285_v58  ;;  %v3303_v21 = vadd.f32 %v3302_v0, %v5972_v33 }
 0x64e   : > { %v3373_v18 = vpop.f32.mrf.mxu0 }
 0x64f   : > { %v4477_v45 = vpop.eup %4476  ;;  %v3374_v12 = vadd.f32 %v3373_v18, %v5978_v11  ;;  %v3300_v18 = vadd.f32 %v3299_v2, %v5972_v33 }
 0x650   : > { %v4479_v51 = vpop.eup %4478  ;;  %v3573_v52 = vpack.c.bf16 %v4477_v45, %v4475_v49  ;;  %v3230_v29 = vpop.f32.mrf.mxu2 }
 0x651   : > { %v4481_v36 = vpop.eup %4480  ;;  %4484 = vtanh.f32 %v3374_v12  ;;  %v3231_v54 = vadd.f32 %v3230_v29, %v5858_v62 }
 0x652   : > { %3639 = vst.msk [vmem:[%s5871_s19 + $0xe8] sm:$0xff] %vm5997_vm8, %v3573_v52  ;;  %v3600_v40 = vpack.c.bf16 %v4481_v36, %v4479_v51  ;;  %4486 = vtanh.f32 %v3142_v8  ;;  %v3144_v15 = vpop.f32.mrf.mxu1  ;;  %v4483_v26 = vpop.eup %4482 }
 0x653   : > { %4488 = vtanh.f32 %v3231_v54  ;;  %v3145_v32 = vadd.f32 %v3144_v15, %v5851_v28  ;;  %v3304_v8 = vpop.f32.mrf.mxu3 }
 0x654   : > { %3666 = vst [vmem:[%s5871_s19 + $0x1c0] sm:$0xff] %v3600_v40  ;;  %4490 = vtanh.f32 %v3288_v31 }
 0x656   : > { %v3376_v59 = vpop.f32.mrf.mxu0 }
 0x657   : > { %v4485_v41 = vpop.eup %4484  ;;  %v3377_v17 = vadd.f32 %v3376_v59, %v5978_v11 }
 0x658   : > { %v4487_v13 = vpop.eup %4486  ;;  %v3575_v30 = vpack.c.bf16 %v4485_v41, %v4483_v26  ;;  %v3233_v63 = vpop.f32.mrf.mxu2 }
 0x659   : > { %v4489_v23 = vpop.eup %4488  ;;  %4492 = vtanh.f32 %v3377_v17  ;;  %v3234_v35 = vadd.f32 %v3233_v63, %v5858_v62 }
 0x65a   : > { %3641 = vst.msk [vmem:[%s5871_s19 + $0xf8] sm:$0xff] %vm5997_vm8, %v3575_v30  ;;  %v3602_v53 = vpack.c.bf16 %v4489_v23, %v4487_v13  ;;  %4494 = vtanh.f32 %v3145_v32  ;;  %v3146_v27 = vpop.f32.mrf.mxu1  ;;  %v4491_v6 = vpop.eup %4490  ;;  %v3305_v32 = vadd.f32 %v3304_v8, %v5972_v33 }
 0x65b   : > { %4496 = vtanh.f32 %v3234_v35  ;;  %v3147_v9 = vadd.f32 %v3146_v27, %v5851_v28  ;;  %v3293_v28 = vadd.f32 %v6144_v39, %v5972_v33  ;;  %v3307_v36 = vpop.f32.mrf.mxu3 }
 0x65c   : > { %3668 = vst [vmem:[%s5871_s19 + $0x1d0] sm:$0xff] %v3602_v53  ;;  %4498 = vtanh.f32 %v3290_v22  ;;  %v3308_v23 = vadd.f32 %v3307_v36, %v5972_v33 }
 0x65e   : > { %v3378_v10 = vpop.f32.mrf.mxu0 }
 0x65f   : > { %v4493_v1 = vpop.eup %4492  ;;  %v3379_v7 = vadd.f32 %v3378_v10, %v5978_v11 }
 0x660   : > { %v4495_v34 = vpop.eup %4494  ;;  %v3577_v24 = vpack.c.bf16 %v4493_v1, %v4491_v6  ;;  %v3235_v50 = vpop.f32.mrf.mxu2 }
 0x661   : > { %v4497_v48 = vpop.eup %4496  ;;  %4500 = vtanh.f32 %v3379_v7  ;;  %v3236_v37 = vadd.f32 %v3235_v50, %v5858_v62 }
 0x662   : > { %3643 = vst.msk [vmem:[%s5871_s19 + $0x108] sm:$0xff] %vm5997_vm8, %v3577_v24  ;;  %v3604_v3 = vpack.c.bf16 %v4497_v48, %v4495_v34  ;;  %4502 = vtanh.f32 %v3147_v9  ;;  %v4499_v61 = vpop.eup %4498 }
 0x663   : > { %4504 = vtanh.f32 %v3236_v37  ;;  %v3309_v59 = vpop.f32.mrf.mxu3 }
 0x664   : > { %3670 = vst [vmem:[%s5871_s19 + $0x1e0] sm:$0xff] %v3604_v3  ;;  %4506 = vtanh.f32 %v3293_v28  ;;  %v3310_v9 = vadd.f32 %v3309_v59, %v5972_v33 }
 0x666   : > { %v3381_v47 = vpop.f32.mrf.mxu0 }
 0x667   : > { %v4501_v46 = vpop.eup %4500  ;;  %v3382_v19 = vadd.f32 %v3381_v47, %v5978_v11 }
 0x668   : > { %v4503_v57 = vpop.eup %4502  ;;  %v3579_v62 = vpack.c.bf16 %v4501_v46, %v4499_v61 }
 0x669   : > { %v4505_v43 = vpop.eup %4504  ;;  %4508 = vtanh.f32 %v3382_v19 }
 0x66a   : > { %3645 = vst.msk [vmem:[%s5871_s19 + $0x118] sm:$0xff] %vm5997_vm8, %v3579_v62  ;;  %v3606_v16 = vpack.c.bf16 %v4505_v43, %v4503_v57  ;;  %v4507_v38 = vpop.eup %4506  ;;  %4510 = vtanh.f32 %v3295_v5 }
 0x66b   : > { %v3312_v27 = vpop.f32.mrf.mxu3 }
 0x66c   : > { %3672 = vst [vmem:[%s5871_s19 + $0x1f0] sm:$0xff] %v3606_v16  ;;  %v3313_v48 = vadd.f32 %v3312_v27, %v5972_v33 }
 0x66e   : > { %v3383_v39 = vpop.f32.mrf.mxu0 }
 0x66f   : > { %v4509_v20 = vpop.eup %4508  ;;  %v3384_v56 = vadd.f32 %v3383_v39, %v5978_v11 }
 0x670   : > { %v3581_v14 = vpack.c.bf16 %v4509_v20, %v4507_v38  ;;  %v4511_v4 = vpop.eup %4510 }
 0x671   : > { %4512 = vtanh.f32 %v3384_v56 }
 0x672   : > { %3647 = vst.msk [vmem:[%s5871_s19 + $0x128] sm:$0xff] %vm5997_vm8, %v3581_v14  ;;  %4514 = vtanh.f32 %v3298_v55 }
 0x673   : > { %v3314_v50 = vpop.f32.mrf.mxu3 }
 0x674   : > { %v3315_v46 = vadd.f32 %v3314_v50, %v5972_v33 }
 0x676   : > { %v3386_v25 = vpop.f32.mrf.mxu0 }
 0x677   : > { %v4513_v42 = vpop.eup %4512  ;;  %v3387_v58 = vadd.f32 %v3386_v25, %v5978_v11 }
 0x678   : > { %v3583_v49 = vpack.c.bf16 %v4513_v42, %v4511_v4  ;;  %v4515_v45 = vpop.eup %4514 }
 0x679   : > { %4516 = vtanh.f32 %v3387_v58 }
 0x67a   : > { %3649 = vst.msk [vmem:[%s5871_s19 + $0x138] sm:$0xff] %vm5997_vm8, %v3583_v49  ;;  %4518 = vtanh.f32 %v3300_v18 }
 0x67b   : > { %v3317_v47 = vpop.f32.mrf.mxu3 }
 0x67c   : > { %v3318_v5 = vadd.f32 %v3317_v47, %v5972_v33 }
 0x67e   : > { %v3388_v12 = vpop.f32.mrf.mxu0 }
 0x67f   : > { %v4517_v51 = vpop.eup %4516  ;;  %v3389_v52 = vadd.f32 %v3388_v12, %v5978_v11 }
 0x680   : > { %v3585_v29 = vpack.c.bf16 %v4517_v51, %v4515_v45  ;;  %v4519_v54 = vpop.eup %4518 }
 0x681   : > { %4520 = vtanh.f32 %v3389_v52 }
 0x682   : > { %3651 = vst.msk [vmem:[%s5871_s19 + $0x148] sm:$0xff] %vm5997_vm8, %v3585_v29  ;;  %4522 = vtanh.f32 %v3303_v21 }
 0x683   : > { %v3319_v38 = vpop.f32.mrf.mxu3 }
 0x684   : > { %v3320_v55 = vadd.f32 %v3319_v38, %v5972_v33 }
 0x686   : > { %v3391_v40 = vpop.f32.mrf.mxu0 }
 0x687   : > { %v4521_v15 = vpop.eup %4520  ;;  %v3392_v31 = vadd.f32 %v3391_v40, %v5978_v11 }
 0x688   : > { %v3587_v26 = vpack.c.bf16 %v4521_v15, %v4519_v54  ;;  %v4523_v41 = vpop.eup %4522 }
 0x689   : > { %4524 = vtanh.f32 %v3392_v31 }
 0x68a   : > { %3653 = vst.msk [vmem:[%s5871_s19 + $0x158] sm:$0xff] %vm5997_vm8, %v3587_v26  ;;  %4526 = vtanh.f32 %v3305_v32 }
 0x68b   : > { %v3322_v58 = vpop.f32.mrf.mxu3 }
 0x68c   : > { %v3323_v18 = vadd.f32 %v3322_v58, %v5972_v33 }
 0x68e   : > { %v3393_v17 = vpop.f32.mrf.mxu0 }
 0x68f   : > { %v4525_v13 = vpop.eup %4524  ;;  %v3394_v30 = vadd.f32 %v3393_v17, %v5978_v11 }
 0x690   : > { %v3589_v63 = vpack.c.bf16 %v4525_v13, %v4523_v41  ;;  %v4527_v35 = vpop.eup %4526 }
 0x691   : > { %4528 = vtanh.f32 %v3394_v30 }
 0x692   : > { %3655 = vst.msk [vmem:[%s5871_s19 + $0x168] sm:$0xff] %vm5997_vm8, %v3589_v63  ;;  %4530 = vtanh.f32 %v3308_v23 }
 0x693   : > { %v3324_v36 = vpop.f32.mrf.mxu3 }
 0x694   : > { %v3325_v21 = vadd.f32 %v3324_v36, %v5972_v33 }
 0x696   : > { %v3396_v53 = vpop.f32.mrf.mxu0 }
 0x697   : > { %v4529_v44 = vpop.eup %4528  ;;  %v3397_v22 = vadd.f32 %v3396_v53, %v5978_v11 }
 0x698   : > { %v3591_v6 = vpack.c.bf16 %v4529_v44, %v4527_v35  ;;  %v4531_v10 = vpop.eup %4530 }
 0x699   : > { %4532 = vtanh.f32 %v3397_v22 }
 0x69a   : > { %3657 = vst.msk [vmem:[%s5871_s19 + $0x178] sm:$0xff] %vm5997_vm8, %v3591_v6  ;;  %4534 = vtanh.f32 %v3310_v9 }
 0x69e   : > { %v3398_v1 = vpop.f32.mrf.mxu0 }
 0x69f   : > { %v4533_v7 = vpop.eup %4532  ;;  %v3399_v34 = vadd.f32 %v3398_v1, %v5978_v11 }
 0x6a0   : > { %v3593_v24 = vpack.c.bf16 %v4533_v7, %v4531_v10  ;;  %v4535_v37 = vpop.eup %4534 }
 0x6a1   : > { %4536 = vtanh.f32 %v3399_v34 }
 0x6a2   : > { %3659 = vst.msk [vmem:[%s5871_s19 + $0x188] sm:$0xff] %vm5997_vm8, %v3593_v24  ;;  %4538 = vtanh.f32 %v3313_v48 }
 0x6a6   : > { %v3401_v3 = vpop.f32.mrf.mxu0 }
 0x6a7   : > { %v4537_v28 = vpop.eup %4536  ;;  %v3402_v2 = vadd.f32 %v3401_v3, %v5978_v11 }
 0x6a8   : > { %v3595_v61 = vpack.c.bf16 %v4537_v28, %v4535_v37  ;;  %v4539_v19 = vpop.eup %4538 }
 0x6a9   : > { %4540 = vtanh.f32 %v3402_v2 }
 0x6aa   : > { %3661 = vst.msk [vmem:[%s5871_s19 + $0x198] sm:$0xff] %vm5997_vm8, %v3595_v61  ;;  %4542 = vtanh.f32 %v3315_v46 }
 0x6ae   : > { %v3403_v57 = vpop.f32.mrf.mxu0 }
 0x6af   : > { %v4541_v62 = vpop.eup %4540  ;;  %v3404_v43 = vadd.f32 %v3403_v57, %v5978_v11 }
 0x6b0   : > { %v3597_v16 = vpack.c.bf16 %v4541_v62, %v4539_v19  ;;  %v4543_v39 = vpop.eup %4542 }
 0x6b1   : > { %4544 = vtanh.f32 %v3404_v43 }
 0x6b2   : > { %3663 = vst.msk [vmem:[%s5871_s19 + $0x1a8] sm:$0xff] %vm5997_vm8, %v3597_v16  ;;  %4546 = vtanh.f32 %v3318_v5 }
 0x6b6   : > { %v3406_v20 = vpop.f32.mrf.mxu0 }
 0x6b7   : > { %v4545_v0 = vpop.eup %4544  ;;  %v3407_v56 = vadd.f32 %v3406_v20, %v5978_v11 }
 0x6b8   : > { %v3599_v14 = vpack.c.bf16 %v4545_v0, %v4543_v39  ;;  %v4547_v4 = vpop.eup %4546 }
 0x6b9   : > { %4548 = vtanh.f32 %v3407_v56 }
 0x6ba   : > { %3665 = vst.msk [vmem:[%s5871_s19 + $0x1b8] sm:$0xff] %vm5997_vm8, %v3599_v14  ;;  %4550 = vtanh.f32 %v3320_v55 }
 0x6be   : > { %v3408_v25 = vpop.f32.mrf.mxu0 }
 0x6bf   : > { %v4549_v42 = vpop.eup %4548  ;;  %v3409_v49 = vadd.f32 %v3408_v25, %v5978_v11 }
 0x6c0   : > { %v3601_v8 = vpack.c.bf16 %v4549_v42, %v4547_v4  ;;  %v4551_v45 = vpop.eup %4550 }
 0x6c1   : > { %4552 = vtanh.f32 %v3409_v49 }
 0x6c2   : > { %3667 = vst.msk [vmem:[%s5871_s19 + $0x1c8] sm:$0xff] %vm5997_vm8, %v3601_v8  ;;  %4554 = vtanh.f32 %v3323_v18 }
 0x6c6   : > { %v3411_v12 = vpop.f32.mrf.mxu0 }
 0x6c7   : > { %v4553_v51 = vpop.eup %4552  ;;  %v3412_v52 = vadd.f32 %v3411_v12, %v5978_v11 }
 0x6c8   : > { %v3603_v29 = vpack.c.bf16 %v4553_v51, %v4551_v45  ;;  %v4555_v54 = vpop.eup %4554 }
 0x6c9   : > { %4556 = vtanh.f32 %v3412_v52 }
 0x6ca   : > { %3669 = vst.msk [vmem:[%s5871_s19 + $0x1d8] sm:$0xff] %vm5997_vm8, %v3603_v29  ;;  %4558 = vtanh.f32 %v3325_v21 }
 0x6ce   : > { %v3413_v40 = vpop.f32.mrf.mxu0 }
 0x6cf   : > { %v4557_v15 = vpop.eup %4556  ;;  %v3414_v31 = vadd.f32 %v3413_v40, %v5978_v11 }
 0x6d0   : > { %v3605_v26 = vpack.c.bf16 %v4557_v15, %v4555_v54  ;;  %v4559_v32 = vpop.eup %4558 }
 0x6d1   : > { %4560 = vtanh.f32 %v3414_v31 }
 0x6d2   : > { %3671 = vst.msk [vmem:[%s5871_s19 + $0x1e8] sm:$0xff] %vm5997_vm8, %v3605_v26 }
 0x6d7   : > { %v4561_v59 = vpop.eup %4560 }
 0x6d8   : > { %v3607_v41 = vpack.c.bf16 %v4561_v59, %v4559_v32 }
 0x6da   : > { %3673 = vst.msk [vmem:[%s5871_s19 + $0x1f8] sm:$0xff] %vm5997_vm8, %v3607_v41 }
 0x6db PF: > { %s27_s24 = sadd.s32 1, %s4568_s24  }
 0x6dc   : > { %p24_p4 = scmp.ge.s32.totalorder %s27_s24, 4  }
 0x6de   :  { %26 = sbr.rel (!%p24_p4) target bundleno = 3 (0x3), region = 118 }

</bundles_post_ra>
